<compile_context>
chip_gen: v5e
topology: v5e:2x2
jax: 0.10.0
libtpu: 0.0.40
codegen_flags: <defaults>
</compile_context>

<pallas_src>
import functools

import jax
import jax.numpy as jnp
from jax import lax
from jax.experimental import pallas as pl
from jax.experimental.pallas import tpu as pltpu

C1 = 16  # hidden channels produced by conv1
K = 3    # conv1 kernel size (padding=1)


def _round_up(v, m):
    return (v + m - 1) // m * m


def _unet_kernel(x_ref, w1_ref, b1_ref, w2_ref, b2_ref, out_ref,
                 rp_ref, pf_ref, xcol_ref, *, D, H, W, W2, plane, L, LP):
    # x_ref:    (1, D, H, W)  f32   one batch element, unpadded
    # w1_ref:   (C1, 27)      f32   conv1 weights, k = kd*9 + kh*3 + kw
    # b1_ref:   (C1, 1)       f32
    # w2_ref:   (C1, 1)       f32   conv2 (1x1x1) weights
    # b2_ref:   (1, 1)        f32
    # out_ref:  (1, 1, L)     f32   output in flat padded-coordinate layout (lane-dense)
    # rp_ref:   (D, plane)    f32   scratch: per-depth zero-padded (H+2,W+2) planes, flattened
    # pf_ref:   (LP,)         f32   scratch: flat zero-padded volume (+ zero tail)
    # xcol_ref: (27, L)       f32   scratch: im2col operand, spatial on lanes

    # ---- build the zero-padded volume in VMEM (no wrapper-side jnp.pad) -----------
    rp_ref[...] = jnp.zeros((D, plane), jnp.float32)
    pf_ref[...] = jnp.zeros((LP,), jnp.float32)
    for h in range(H):                         # interior rows at their padded lane offset
        off = (h + 1) * W2 + 1
        rp_ref[:, off:off + W] = x_ref[0, :, h, :]
    for d in range(D):                         # padded planes -> flat buffer (halo stays 0)
        base = (d + 1) * plane
        pf_ref[base:base + plane] = rp_ref[d, :]

    # ---- im2col: 27 contiguous shifted slices of the flat padded volume -----------
    k = 0
    for kd in range(K):
        for kh in range(K):
            for kw in range(K):
                s = kd * plane + kh * W2 + kw
                xcol_ref[k, :] = pf_ref[s:s + L]
                k += 1

    # ---- conv1 on the MXU, bias + ReLU, conv2 as lane-dense weighted reduction ----
    x_col = xcol_ref[...]                                          # (27, L)
    h1 = jnp.dot(w1_ref[...], x_col,
                 preferred_element_type=jnp.float32)               # (C1, L) on the MXU
    h1 = jnp.maximum(h1 + b1_ref[...], 0.0)                        # bias + ReLU
    out = jnp.sum(h1 * w2_ref[...], axis=0, keepdims=True)         # (1, L)  1x1x1 conv
    out = out + b2_ref[...]
    out_ref[0] = out


def dummy_3d_unet(x, w1, b1, w2, b2):
    """x: (N, 1, D, H, W) f32  ->  (N, 1, D, H, W) f32 (PyTorch NCDHW semantics)."""
    N, cin, D, H, W = x.shape
    assert cin == 1, "Dummy3DUnet was built with in_channels=1"
    H2, W2 = H + 2, W + 2
    plane = H2 * W2
    L = _round_up(D * plane, 128)              # lane-dense flat output length
    max_shift = (K - 1) * (plane + W2 + 1)     # largest tap offset
    LP = _round_up(max_shift + L, 128)         # flat padded-volume scratch length

    x_sq = x[:, 0].astype(jnp.float32)                         # (N, D, H, W)
    w1c = w1.reshape(C1, K * K * K).astype(jnp.float32)        # (16, 27)
    b1c = b1.reshape(C1, 1).astype(jnp.float32)                # (16, 1)
    w2c = w2.reshape(C1, 1).astype(jnp.float32)                # (16, 1)
    b2c = b2.reshape(1, 1).astype(jnp.float32)                 # (1, 1)

    kernel = functools.partial(_unet_kernel, D=D, H=H, W=W, W2=W2,
                               plane=plane, L=L, LP=LP)

    cost = pl.CostEstimate(
        flops=2 * N * D * H * W * (C1 * K * K * K + C1),
        transcendentals=0,
        bytes_accessed=N * (D * H * W * 4 + L * 4) + (C1 * (K * K * K + 3) + 1) * 4,
    )

    out_flat = pl.pallas_call(
        kernel,
        out_shape=jax.ShapeDtypeStruct((N, 1, L), jnp.float32),
        grid=(N,),
        in_specs=[
            pl.BlockSpec((1, D, H, W), lambda n: (n, 0, 0, 0)),
            pl.BlockSpec((C1, K * K * K), lambda n: (0, 0)),
            pl.BlockSpec((C1, 1), lambda n: (0, 0)),
            pl.BlockSpec((C1, 1), lambda n: (0, 0)),
            pl.BlockSpec((1, 1), lambda n: (0, 0)),
        ],
        out_specs=pl.BlockSpec((1, 1, L), lambda n: (n, 0, 0)),
        scratch_shapes=[
            pltpu.VMEM((D, plane), jnp.float32),       # rp_ref
            pltpu.VMEM((LP,), jnp.float32),            # pf_ref
            pltpu.VMEM((K * K * K, L), jnp.float32),   # xcol_ref
        ],
        compiler_params=pltpu.CompilerParams(
            dimension_semantics=("parallel",)),        # batch axis -> both TCs on v7x
        cost_estimate=cost,
    )(x_sq, w1c, b1c, w2c, b2c)

    # Crop the halo columns: flat padded-coordinate layout -> (N, D, H, W).
    out = out_flat[:, 0, :D * plane].reshape(N, D, H2, W2)[:, :, :H, :W]
    return out[:, None]  # restore channel dim -> (N, 1, D, H, W)


def _reference(x, w1, b1, w2, b2):
    """Pure-JAX reference mirroring the PyTorch forward (for validation only)."""
    dn1 = lax.conv_dimension_numbers(x.shape, w1.shape, ("NCDHW", "OIDHW", "NCDHW"))
    y = lax.conv_general_dilated(x, w1, (1, 1, 1), ((1, 1), (1, 1), (1, 1)),
                                 dimension_numbers=dn1)
    y = y + b1[None, :, None, None, None]
    y = jnp.maximum(y, 0.0)
    dn2 = lax.conv_dimension_numbers(y.shape, w2.shape, ("NCDHW", "OIDHW", "NCDHW"))
    z = lax.conv_general_dilated(y, w2, (1, 1, 1), ((0, 0), (0, 0), (0, 0)),
                                 dimension_numbers=dn2)
    return z + b2[None, :, None, None, None]


if __name__ == "__main__":
    key = jax.random.PRNGKey(0)
    k_x, k_w1, k_b1, k_w2, k_b2 = jax.random.split(key, 5)

    N, D, H, W = 2, 16, 16, 16
    x = jax.random.normal(k_x, (N, 1, D, H, W), jnp.float32)

    # Deterministic synthetic parameters (same shapes as the nn.Module's layers).
    w1 = 0.1 * jax.random.normal(k_w1, (C1, 1, K, K, K), jnp.float32)   # conv1.weight
    b1 = 0.1 * jax.random.normal(k_b1, (C1,), jnp.float32)              # conv1.bias
    w2 = 0.1 * jax.random.normal(k_w2, (1, C1, 1, 1, 1), jnp.float32)   # conv2.weight
    b2 = 0.1 * jax.random.normal(k_b2, (1,), jnp.float32)               # conv2.bias

    out = jax.block_until_ready(dummy_3d_unet(x, w1, b1, w2, b2))

    ref = _reference(x, w1, b1, w2, b2)
    assert out.shape == ref.shape == (N, 1, D, H, W)
    max_err = float(jnp.max(jnp.abs(out - ref)))
    if max_err > 5e-3:
        raise AssertionError(f"Pallas kernel mismatch vs reference: max abs err {max_err}")

    print("KERNEL_OK")
</pallas_src>

<mosaic_0001>
module attributes {stable_mosaic.version = 11 : i64} {
  func.func @_unet_kernel(%arg0: i32, %arg1: memref<1x16x16x16xf32, #tpu.memory_space<vmem>>, %arg2: memref<16x27xf32, #tpu.memory_space<vmem>>, %arg3: memref<16x1xf32, #tpu.memory_space<vmem>>, %arg4: memref<16x1xf32, #tpu.memory_space<vmem>>, %arg5: memref<1x1xf32, #tpu.memory_space<vmem>>, %arg6: memref<1x1x5248xf32, #tpu.memory_space<vmem>>, %arg7: memref<16x324xf32, #tpu.memory_space<vmem>>, %arg8: memref<6016xf32, #tpu.memory_space<vmem>>, %arg9: memref<27x5248xf32, #tpu.memory_space<vmem>>) attributes {dimension_semantics = [#tpu.dimension_semantics<parallel>], iteration_bounds = array<i64: 2>, scalar_prefetch = 0 : i64, scratch_operands = 3 : i64, tpu.core_type = #tpu.core_type<tc>, window_params = [{transform_indices = @transform_0, window_bounds = array<i64: 1, 16, 16, 16>}, {pipeline_mode = #tpu.pipeline_mode<synchronous>, transform_indices = @transform_1, window_bounds = array<i64: 16, 27>}, {pipeline_mode = #tpu.pipeline_mode<synchronous>, transform_indices = @transform_2, window_bounds = array<i64: 16, 1>}, {pipeline_mode = #tpu.pipeline_mode<synchronous>, transform_indices = @transform_3, window_bounds = array<i64: 16, 1>}, {pipeline_mode = #tpu.pipeline_mode<synchronous>, transform_indices = @transform_4, window_bounds = array<i64: 1, 1>}, {transform_indices = @transform_5, window_bounds = array<i64: 1, 1, 5248>}]} {
    %cst = arith.constant 0.000000e+00 : f32
    %0 = vector.broadcast %cst : f32 to vector<16x324xf32>
    %c0 = arith.constant 0 : index
    %c0_0 = arith.constant 0 : index
    %1 = vector.load %arg7[%c0, %c0_0] : memref<16x324xf32, #tpu.memory_space<vmem>>, vector<16x324xf32>
    tpu.vector_store %arg7[%c0, %c0_0], %0 {strides = array<i32>} : memref<16x324xf32, #tpu.memory_space<vmem>>, vector<16x324xf32>,
    %cst_1 = arith.constant 0.000000e+00 : f32
    %2 = vector.broadcast %cst_1 : f32 to vector<6016xf32>
    %c0_2 = arith.constant 0 : index
    %3 = vector.load %arg8[%c0_2] : memref<6016xf32, #tpu.memory_space<vmem>>, vector<6016xf32>
    tpu.vector_store %arg8[%c0_2], %2 {strides = array<i32>} : memref<6016xf32, #tpu.memory_space<vmem>>, vector<6016xf32>,
    %c0_3 = arith.constant 0 : index
    %c0_4 = arith.constant 0 : index
    %c0_5 = arith.constant 0 : index
    %c0_6 = arith.constant 0 : index
    %4 = vector.load %arg1[%c0_3, %c0_4, %c0_5, %c0_6] : memref<1x16x16x16xf32, #tpu.memory_space<vmem>>, vector<1x16x1x16xf32>
    %5 = vector.shape_cast %4 : vector<1x16x1x16xf32> to vector<16x16xf32>
    %c0_7 = arith.constant 0 : index
    %c19 = arith.constant 19 : index
    %6 = vector.load %arg7[%c0_7, %c19] : memref<16x324xf32, #tpu.memory_space<vmem>>, vector<16x16xf32>
    tpu.vector_store %arg7[%c0_7, %c19], %5 {strides = array<i32>} : memref<16x324xf32, #tpu.memory_space<vmem>>, vector<16x16xf32>,
    %c0_8 = arith.constant 0 : index
    %c0_9 = arith.constant 0 : index
    %c1 = arith.constant 1 : index
    %c0_10 = arith.constant 0 : index
    %7 = vector.load %arg1[%c0_8, %c0_9, %c1, %c0_10] : memref<1x16x16x16xf32, #tpu.memory_space<vmem>>, vector<1x16x1x16xf32>
    %8 = vector.shape_cast %7 : vector<1x16x1x16xf32> to vector<16x16xf32>
    %c0_11 = arith.constant 0 : index
    %c37 = arith.constant 37 : index
    %9 = vector.load %arg7[%c0_11, %c37] : memref<16x324xf32, #tpu.memory_space<vmem>>, vector<16x16xf32>
    tpu.vector_store %arg7[%c0_11, %c37], %8 {strides = array<i32>} : memref<16x324xf32, #tpu.memory_space<vmem>>, vector<16x16xf32>,
    %c0_12 = arith.constant 0 : index
    %c0_13 = arith.constant 0 : index
    %c2 = arith.constant 2 : index
    %c0_14 = arith.constant 0 : index
    %10 = vector.load %arg1[%c0_12, %c0_13, %c2, %c0_14] : memref<1x16x16x16xf32, #tpu.memory_space<vmem>>, vector<1x16x1x16xf32>
    %11 = vector.shape_cast %10 : vector<1x16x1x16xf32> to vector<16x16xf32>
    %c0_15 = arith.constant 0 : index
    %c55 = arith.constant 55 : index
    %12 = vector.load %arg7[%c0_15, %c55] : memref<16x324xf32, #tpu.memory_space<vmem>>, vector<16x16xf32>
    tpu.vector_store %arg7[%c0_15, %c55], %11 {strides = array<i32>} : memref<16x324xf32, #tpu.memory_space<vmem>>, vector<16x16xf32>,
    %c0_16 = arith.constant 0 : index
    %c0_17 = arith.constant 0 : index
    %c3 = arith.constant 3 : index
    %c0_18 = arith.constant 0 : index
    %13 = vector.load %arg1[%c0_16, %c0_17, %c3, %c0_18] : memref<1x16x16x16xf32, #tpu.memory_space<vmem>>, vector<1x16x1x16xf32>
    %14 = vector.shape_cast %13 : vector<1x16x1x16xf32> to vector<16x16xf32>
    %c0_19 = arith.constant 0 : index
    %c73 = arith.constant 73 : index
    %15 = vector.load %arg7[%c0_19, %c73] : memref<16x324xf32, #tpu.memory_space<vmem>>, vector<16x16xf32>
    tpu.vector_store %arg7[%c0_19, %c73], %14 {strides = array<i32>} : memref<16x324xf32, #tpu.memory_space<vmem>>, vector<16x16xf32>,
    %c0_20 = arith.constant 0 : index
    %c0_21 = arith.constant 0 : index
    %c4 = arith.constant 4 : index
    %c0_22 = arith.constant 0 : index
    %16 = vector.load %arg1[%c0_20, %c0_21, %c4, %c0_22] : memref<1x16x16x16xf32, #tpu.memory_space<vmem>>, vector<1x16x1x16xf32>
    %17 = vector.shape_cast %16 : vector<1x16x1x16xf32> to vector<16x16xf32>
    %c0_23 = arith.constant 0 : index
    %c91 = arith.constant 91 : index
    %18 = vector.load %arg7[%c0_23, %c91] : memref<16x324xf32, #tpu.memory_space<vmem>>, vector<16x16xf32>
    tpu.vector_store %arg7[%c0_23, %c91], %17 {strides = array<i32>} : memref<16x324xf32, #tpu.memory_space<vmem>>, vector<16x16xf32>,
    %c0_24 = arith.constant 0 : index
    %c0_25 = arith.constant 0 : index
    %c5 = arith.constant 5 : index
    %c0_26 = arith.constant 0 : index
    %19 = vector.load %arg1[%c0_24, %c0_25, %c5, %c0_26] : memref<1x16x16x16xf32, #tpu.memory_space<vmem>>, vector<1x16x1x16xf32>
    %20 = vector.shape_cast %19 : vector<1x16x1x16xf32> to vector<16x16xf32>
    %c0_27 = arith.constant 0 : index
    %c109 = arith.constant 109 : index
    %21 = vector.load %arg7[%c0_27, %c109] : memref<16x324xf32, #tpu.memory_space<vmem>>, vector<16x16xf32>
    tpu.vector_store %arg7[%c0_27, %c109], %20 {strides = array<i32>} : memref<16x324xf32, #tpu.memory_space<vmem>>, vector<16x16xf32>,
    %c0_28 = arith.constant 0 : index
    %c0_29 = arith.constant 0 : index
    %c6 = arith.constant 6 : index
    %c0_30 = arith.constant 0 : index
    %22 = vector.load %arg1[%c0_28, %c0_29, %c6, %c0_30] : memref<1x16x16x16xf32, #tpu.memory_space<vmem>>, vector<1x16x1x16xf32>
    %23 = vector.shape_cast %22 : vector<1x16x1x16xf32> to vector<16x16xf32>
    %c0_31 = arith.constant 0 : index
    %c127 = arith.constant 127 : index
    %24 = vector.load %arg7[%c0_31, %c127] : memref<16x324xf32, #tpu.memory_space<vmem>>, vector<16x16xf32>
    tpu.vector_store %arg7[%c0_31, %c127], %23 {strides = array<i32>} : memref<16x324xf32, #tpu.memory_space<vmem>>, vector<16x16xf32>,
    %c0_32 = arith.constant 0 : index
    %c0_33 = arith.constant 0 : index
    %c7 = arith.constant 7 : index
    %c0_34 = arith.constant 0 : index
    %25 = vector.load %arg1[%c0_32, %c0_33, %c7, %c0_34] : memref<1x16x16x16xf32, #tpu.memory_space<vmem>>, vector<1x16x1x16xf32>
    %26 = vector.shape_cast %25 : vector<1x16x1x16xf32> to vector<16x16xf32>
    %c0_35 = arith.constant 0 : index
    %c145 = arith.constant 145 : index
    %27 = vector.load %arg7[%c0_35, %c145] : memref<16x324xf32, #tpu.memory_space<vmem>>, vector<16x16xf32>
    tpu.vector_store %arg7[%c0_35, %c145], %26 {strides = array<i32>} : memref<16x324xf32, #tpu.memory_space<vmem>>, vector<16x16xf32>,
    %c0_36 = arith.constant 0 : index
    %c0_37 = arith.constant 0 : index
    %c8 = arith.constant 8 : index
    %c0_38 = arith.constant 0 : index
    %28 = vector.load %arg1[%c0_36, %c0_37, %c8, %c0_38] : memref<1x16x16x16xf32, #tpu.memory_space<vmem>>, vector<1x16x1x16xf32>
    %29 = vector.shape_cast %28 : vector<1x16x1x16xf32> to vector<16x16xf32>
    %c0_39 = arith.constant 0 : index
    %c163 = arith.constant 163 : index
    %30 = vector.load %arg7[%c0_39, %c163] : memref<16x324xf32, #tpu.memory_space<vmem>>, vector<16x16xf32>
    tpu.vector_store %arg7[%c0_39, %c163], %29 {strides = array<i32>} : memref<16x324xf32, #tpu.memory_space<vmem>>, vector<16x16xf32>,
    %c0_40 = arith.constant 0 : index
    %c0_41 = arith.constant 0 : index
    %c9 = arith.constant 9 : index
    %c0_42 = arith.constant 0 : index
    %31 = vector.load %arg1[%c0_40, %c0_41, %c9, %c0_42] : memref<1x16x16x16xf32, #tpu.memory_space<vmem>>, vector<1x16x1x16xf32>
    %32 = vector.shape_cast %31 : vector<1x16x1x16xf32> to vector<16x16xf32>
    %c0_43 = arith.constant 0 : index
    %c181 = arith.constant 181 : index
    %33 = vector.load %arg7[%c0_43, %c181] : memref<16x324xf32, #tpu.memory_space<vmem>>, vector<16x16xf32>
    tpu.vector_store %arg7[%c0_43, %c181], %32 {strides = array<i32>} : memref<16x324xf32, #tpu.memory_space<vmem>>, vector<16x16xf32>,
    %c0_44 = arith.constant 0 : index
    %c0_45 = arith.constant 0 : index
    %c10 = arith.constant 10 : index
    %c0_46 = arith.constant 0 : index
    %34 = vector.load %arg1[%c0_44, %c0_45, %c10, %c0_46] : memref<1x16x16x16xf32, #tpu.memory_space<vmem>>, vector<1x16x1x16xf32>
    %35 = vector.shape_cast %34 : vector<1x16x1x16xf32> to vector<16x16xf32>
    %c0_47 = arith.constant 0 : index
    %c199 = arith.constant 199 : index
    %36 = vector.load %arg7[%c0_47, %c199] : memref<16x324xf32, #tpu.memory_space<vmem>>, vector<16x16xf32>
    tpu.vector_store %arg7[%c0_47, %c199], %35 {strides = array<i32>} : memref<16x324xf32, #tpu.memory_space<vmem>>, vector<16x16xf32>,
    %c0_48 = arith.constant 0 : index
    %c0_49 = arith.constant 0 : index
    %c11 = arith.constant 11 : index
    %c0_50 = arith.constant 0 : index
    %37 = vector.load %arg1[%c0_48, %c0_49, %c11, %c0_50] : memref<1x16x16x16xf32, #tpu.memory_space<vmem>>, vector<1x16x1x16xf32>
    %38 = vector.shape_cast %37 : vector<1x16x1x16xf32> to vector<16x16xf32>
    %c0_51 = arith.constant 0 : index
    %c217 = arith.constant 217 : index
    %39 = vector.load %arg7[%c0_51, %c217] : memref<16x324xf32, #tpu.memory_space<vmem>>, vector<16x16xf32>
    tpu.vector_store %arg7[%c0_51, %c217], %38 {strides = array<i32>} : memref<16x324xf32, #tpu.memory_space<vmem>>, vector<16x16xf32>,
    %c0_52 = arith.constant 0 : index
    %c0_53 = arith.constant 0 : index
    %c12 = arith.constant 12 : index
    %c0_54 = arith.constant 0 : index
    %40 = vector.load %arg1[%c0_52, %c0_53, %c12, %c0_54] : memref<1x16x16x16xf32, #tpu.memory_space<vmem>>, vector<1x16x1x16xf32>
    %41 = vector.shape_cast %40 : vector<1x16x1x16xf32> to vector<16x16xf32>
    %c0_55 = arith.constant 0 : index
    %c235 = arith.constant 235 : index
    %42 = vector.load %arg7[%c0_55, %c235] : memref<16x324xf32, #tpu.memory_space<vmem>>, vector<16x16xf32>
    tpu.vector_store %arg7[%c0_55, %c235], %41 {strides = array<i32>} : memref<16x324xf32, #tpu.memory_space<vmem>>, vector<16x16xf32>,
    %c0_56 = arith.constant 0 : index
    %c0_57 = arith.constant 0 : index
    %c13 = arith.constant 13 : index
    %c0_58 = arith.constant 0 : index
    %43 = vector.load %arg1[%c0_56, %c0_57, %c13, %c0_58] : memref<1x16x16x16xf32, #tpu.memory_space<vmem>>, vector<1x16x1x16xf32>
    %44 = vector.shape_cast %43 : vector<1x16x1x16xf32> to vector<16x16xf32>
    %c0_59 = arith.constant 0 : index
    %c253 = arith.constant 253 : index
    %45 = vector.load %arg7[%c0_59, %c253] : memref<16x324xf32, #tpu.memory_space<vmem>>, vector<16x16xf32>
    tpu.vector_store %arg7[%c0_59, %c253], %44 {strides = array<i32>} : memref<16x324xf32, #tpu.memory_space<vmem>>, vector<16x16xf32>,
    %c0_60 = arith.constant 0 : index
    %c0_61 = arith.constant 0 : index
    %c14 = arith.constant 14 : index
    %c0_62 = arith.constant 0 : index
    %46 = vector.load %arg1[%c0_60, %c0_61, %c14, %c0_62] : memref<1x16x16x16xf32, #tpu.memory_space<vmem>>, vector<1x16x1x16xf32>
    %47 = vector.shape_cast %46 : vector<1x16x1x16xf32> to vector<16x16xf32>
    %c0_63 = arith.constant 0 : index
    %c271 = arith.constant 271 : index
    %48 = vector.load %arg7[%c0_63, %c271] : memref<16x324xf32, #tpu.memory_space<vmem>>, vector<16x16xf32>
    tpu.vector_store %arg7[%c0_63, %c271], %47 {strides = array<i32>} : memref<16x324xf32, #tpu.memory_space<vmem>>, vector<16x16xf32>,
    %c0_64 = arith.constant 0 : index
    %c0_65 = arith.constant 0 : index
    %c15 = arith.constant 15 : index
    %c0_66 = arith.constant 0 : index
    %49 = vector.load %arg1[%c0_64, %c0_65, %c15, %c0_66] : memref<1x16x16x16xf32, #tpu.memory_space<vmem>>, vector<1x16x1x16xf32>
    %50 = vector.shape_cast %49 : vector<1x16x1x16xf32> to vector<16x16xf32>
    %c0_67 = arith.constant 0 : index
    %c289 = arith.constant 289 : index
    %51 = vector.load %arg7[%c0_67, %c289] : memref<16x324xf32, #tpu.memory_space<vmem>>, vector<16x16xf32>
    tpu.vector_store %arg7[%c0_67, %c289], %50 {strides = array<i32>} : memref<16x324xf32, #tpu.memory_space<vmem>>, vector<16x16xf32>,
    %c0_68 = arith.constant 0 : index
    %c0_69 = arith.constant 0 : index
    %52 = vector.load %arg7[%c0_68, %c0_69] : memref<16x324xf32, #tpu.memory_space<vmem>>, vector<1x324xf32>
    %53 = vector.shape_cast %52 : vector<1x324xf32> to vector<324xf32>
    %c324 = arith.constant 324 : index
    %54 = vector.load %arg8[%c324] : memref<6016xf32, #tpu.memory_space<vmem>>, vector<324xf32>
    tpu.vector_store %arg8[%c324], %53 {strides = array<i32>} : memref<6016xf32, #tpu.memory_space<vmem>>, vector<324xf32>,
    %c1_70 = arith.constant 1 : index
    %c0_71 = arith.constant 0 : index
    %55 = vector.load %arg7[%c1_70, %c0_71] : memref<16x324xf32, #tpu.memory_space<vmem>>, vector<1x324xf32>
    %56 = vector.shape_cast %55 : vector<1x324xf32> to vector<324xf32>
    %c648 = arith.constant 648 : index
    %57 = vector.load %arg8[%c648] : memref<6016xf32, #tpu.memory_space<vmem>>, vector<324xf32>
    tpu.vector_store %arg8[%c648], %56 {strides = array<i32>} : memref<6016xf32, #tpu.memory_space<vmem>>, vector<324xf32>,
    %c2_72 = arith.constant 2 : index
    %c0_73 = arith.constant 0 : index
    %58 = vector.load %arg7[%c2_72, %c0_73] : memref<16x324xf32, #tpu.memory_space<vmem>>, vector<1x324xf32>
    %59 = vector.shape_cast %58 : vector<1x324xf32> to vector<324xf32>
    %c972 = arith.constant 972 : index
    %60 = vector.load %arg8[%c972] : memref<6016xf32, #tpu.memory_space<vmem>>, vector<324xf32>
    tpu.vector_store %arg8[%c972], %59 {strides = array<i32>} : memref<6016xf32, #tpu.memory_space<vmem>>, vector<324xf32>,
    %c3_74 = arith.constant 3 : index
    %c0_75 = arith.constant 0 : index
    %61 = vector.load %arg7[%c3_74, %c0_75] : memref<16x324xf32, #tpu.memory_space<vmem>>, vector<1x324xf32>
    %62 = vector.shape_cast %61 : vector<1x324xf32> to vector<324xf32>
    %c1296 = arith.constant 1296 : index
    %63 = vector.load %arg8[%c1296] : memref<6016xf32, #tpu.memory_space<vmem>>, vector<324xf32>
    tpu.vector_store %arg8[%c1296], %62 {strides = array<i32>} : memref<6016xf32, #tpu.memory_space<vmem>>, vector<324xf32>,
    %c4_76 = arith.constant 4 : index
    %c0_77 = arith.constant 0 : index
    %64 = vector.load %arg7[%c4_76, %c0_77] : memref<16x324xf32, #tpu.memory_space<vmem>>, vector<1x324xf32>
    %65 = vector.shape_cast %64 : vector<1x324xf32> to vector<324xf32>
    %c1620 = arith.constant 1620 : index
    %66 = vector.load %arg8[%c1620] : memref<6016xf32, #tpu.memory_space<vmem>>, vector<324xf32>
    tpu.vector_store %arg8[%c1620], %65 {strides = array<i32>} : memref<6016xf32, #tpu.memory_space<vmem>>, vector<324xf32>,
    %c5_78 = arith.constant 5 : index
    %c0_79 = arith.constant 0 : index
    %67 = vector.load %arg7[%c5_78, %c0_79] : memref<16x324xf32, #tpu.memory_space<vmem>>, vector<1x324xf32>
    %68 = vector.shape_cast %67 : vector<1x324xf32> to vector<324xf32>
    %c1944 = arith.constant 1944 : index
    %69 = vector.load %arg8[%c1944] : memref<6016xf32, #tpu.memory_space<vmem>>, vector<324xf32>
    tpu.vector_store %arg8[%c1944], %68 {strides = array<i32>} : memref<6016xf32, #tpu.memory_space<vmem>>, vector<324xf32>,
    %c6_80 = arith.constant 6 : index
    %c0_81 = arith.constant 0 : index
    %70 = vector.load %arg7[%c6_80, %c0_81] : memref<16x324xf32, #tpu.memory_space<vmem>>, vector<1x324xf32>
    %71 = vector.shape_cast %70 : vector<1x324xf32> to vector<324xf32>
    %c2268 = arith.constant 2268 : index
    %72 = vector.load %arg8[%c2268] : memref<6016xf32, #tpu.memory_space<vmem>>, vector<324xf32>
    tpu.vector_store %arg8[%c2268], %71 {strides = array<i32>} : memref<6016xf32, #tpu.memory_space<vmem>>, vector<324xf32>,
    %c7_82 = arith.constant 7 : index
    %c0_83 = arith.constant 0 : index
    %73 = vector.load %arg7[%c7_82, %c0_83] : memref<16x324xf32, #tpu.memory_space<vmem>>, vector<1x324xf32>
    %74 = vector.shape_cast %73 : vector<1x324xf32> to vector<324xf32>
    %c2592 = arith.constant 2592 : index
    %75 = vector.load %arg8[%c2592] : memref<6016xf32, #tpu.memory_space<vmem>>, vector<324xf32>
    tpu.vector_store %arg8[%c2592], %74 {strides = array<i32>} : memref<6016xf32, #tpu.memory_space<vmem>>, vector<324xf32>,
    %c8_84 = arith.constant 8 : index
    %c0_85 = arith.constant 0 : index
    %76 = vector.load %arg7[%c8_84, %c0_85] : memref<16x324xf32, #tpu.memory_space<vmem>>, vector<1x324xf32>
    %77 = vector.shape_cast %76 : vector<1x324xf32> to vector<324xf32>
    %c2916 = arith.constant 2916 : index
    %78 = vector.load %arg8[%c2916] : memref<6016xf32, #tpu.memory_space<vmem>>, vector<324xf32>
    tpu.vector_store %arg8[%c2916], %77 {strides = array<i32>} : memref<6016xf32, #tpu.memory_space<vmem>>, vector<324xf32>,
    %c9_86 = arith.constant 9 : index
    %c0_87 = arith.constant 0 : index
    %79 = vector.load %arg7[%c9_86, %c0_87] : memref<16x324xf32, #tpu.memory_space<vmem>>, vector<1x324xf32>
    %80 = vector.shape_cast %79 : vector<1x324xf32> to vector<324xf32>
    %c3240 = arith.constant 3240 : index
    %81 = vector.load %arg8[%c3240] : memref<6016xf32, #tpu.memory_space<vmem>>, vector<324xf32>
    tpu.vector_store %arg8[%c3240], %80 {strides = array<i32>} : memref<6016xf32, #tpu.memory_space<vmem>>, vector<324xf32>,
    %c10_88 = arith.constant 10 : index
    %c0_89 = arith.constant 0 : index
    %82 = vector.load %arg7[%c10_88, %c0_89] : memref<16x324xf32, #tpu.memory_space<vmem>>, vector<1x324xf32>
    %83 = vector.shape_cast %82 : vector<1x324xf32> to vector<324xf32>
    %c3564 = arith.constant 3564 : index
    %84 = vector.load %arg8[%c3564] : memref<6016xf32, #tpu.memory_space<vmem>>, vector<324xf32>
    tpu.vector_store %arg8[%c3564], %83 {strides = array<i32>} : memref<6016xf32, #tpu.memory_space<vmem>>, vector<324xf32>,
    %c11_90 = arith.constant 11 : index
    %c0_91 = arith.constant 0 : index
    %85 = vector.load %arg7[%c11_90, %c0_91] : memref<16x324xf32, #tpu.memory_space<vmem>>, vector<1x324xf32>
    %86 = vector.shape_cast %85 : vector<1x324xf32> to vector<324xf32>
    %c3888 = arith.constant 3888 : index
    %87 = vector.load %arg8[%c3888] : memref<6016xf32, #tpu.memory_space<vmem>>, vector<324xf32>
    tpu.vector_store %arg8[%c3888], %86 {strides = array<i32>} : memref<6016xf32, #tpu.memory_space<vmem>>, vector<324xf32>,
    %c12_92 = arith.constant 12 : index
    %c0_93 = arith.constant 0 : index
    %88 = vector.load %arg7[%c12_92, %c0_93] : memref<16x324xf32, #tpu.memory_space<vmem>>, vector<1x324xf32>
    %89 = vector.shape_cast %88 : vector<1x324xf32> to vector<324xf32>
    %c4212 = arith.constant 4212 : index
    %90 = vector.load %arg8[%c4212] : memref<6016xf32, #tpu.memory_space<vmem>>, vector<324xf32>
    tpu.vector_store %arg8[%c4212], %89 {strides = array<i32>} : memref<6016xf32, #tpu.memory_space<vmem>>, vector<324xf32>,
    %c13_94 = arith.constant 13 : index
    %c0_95 = arith.constant 0 : index
    %91 = vector.load %arg7[%c13_94, %c0_95] : memref<16x324xf32, #tpu.memory_space<vmem>>, vector<1x324xf32>
    %92 = vector.shape_cast %91 : vector<1x324xf32> to vector<324xf32>
    %c4536 = arith.constant 4536 : index
    %93 = vector.load %arg8[%c4536] : memref<6016xf32, #tpu.memory_space<vmem>>, vector<324xf32>
    tpu.vector_store %arg8[%c4536], %92 {strides = array<i32>} : memref<6016xf32, #tpu.memory_space<vmem>>, vector<324xf32>,
    %c14_96 = arith.constant 14 : index
    %c0_97 = arith.constant 0 : index
    %94 = vector.load %arg7[%c14_96, %c0_97] : memref<16x324xf32, #tpu.memory_space<vmem>>, vector<1x324xf32>
    %95 = vector.shape_cast %94 : vector<1x324xf32> to vector<324xf32>
    %c4860 = arith.constant 4860 : index
    %96 = vector.load %arg8[%c4860] : memref<6016xf32, #tpu.memory_space<vmem>>, vector<324xf32>
    tpu.vector_store %arg8[%c4860], %95 {strides = array<i32>} : memref<6016xf32, #tpu.memory_space<vmem>>, vector<324xf32>,
    %c15_98 = arith.constant 15 : index
    %c0_99 = arith.constant 0 : index
    %97 = vector.load %arg7[%c15_98, %c0_99] : memref<16x324xf32, #tpu.memory_space<vmem>>, vector<1x324xf32>
    %98 = vector.shape_cast %97 : vector<1x324xf32> to vector<324xf32>
    %c5184 = arith.constant 5184 : index
    %99 = vector.load %arg8[%c5184] : memref<6016xf32, #tpu.memory_space<vmem>>, vector<324xf32>
    tpu.vector_store %arg8[%c5184], %98 {strides = array<i32>} : memref<6016xf32, #tpu.memory_space<vmem>>, vector<324xf32>,
    %c0_100 = arith.constant 0 : index
    %100 = vector.load %arg8[%c0_100] : memref<6016xf32, #tpu.memory_space<vmem>>, vector<5248xf32>
    %c0_101 = arith.constant 0 : index
    %c0_102 = arith.constant 0 : index
    %101 = vector.load %arg9[%c0_101, %c0_102] : memref<27x5248xf32, #tpu.memory_space<vmem>>, vector<1x5248xf32>
    %102 = vector.shape_cast %101 : vector<1x5248xf32> to vector<5248xf32>
    %103 = vector.shape_cast %100 : vector<5248xf32> to vector<1x5248xf32>
    tpu.vector_store %arg9[%c0_101, %c0_102], %103 {strides = array<i32>} : memref<27x5248xf32, #tpu.memory_space<vmem>>, vector<1x5248xf32>,
    %c1_103 = arith.constant 1 : index
    %104 = vector.load %arg8[%c1_103] : memref<6016xf32, #tpu.memory_space<vmem>>, vector<5248xf32>
    %c1_104 = arith.constant 1 : index
    %c0_105 = arith.constant 0 : index
    %105 = vector.load %arg9[%c1_104, %c0_105] : memref<27x5248xf32, #tpu.memory_space<vmem>>, vector<1x5248xf32>
    %106 = vector.shape_cast %105 : vector<1x5248xf32> to vector<5248xf32>
    %107 = vector.shape_cast %104 : vector<5248xf32> to vector<1x5248xf32>
    tpu.vector_store %arg9[%c1_104, %c0_105], %107 {strides = array<i32>} : memref<27x5248xf32, #tpu.memory_space<vmem>>, vector<1x5248xf32>,
    %c2_106 = arith.constant 2 : index
    %108 = vector.load %arg8[%c2_106] : memref<6016xf32, #tpu.memory_space<vmem>>, vector<5248xf32>
    %c2_107 = arith.constant 2 : index
    %c0_108 = arith.constant 0 : index
    %109 = vector.load %arg9[%c2_107, %c0_108] : memref<27x5248xf32, #tpu.memory_space<vmem>>, vector<1x5248xf32>
    %110 = vector.shape_cast %109 : vector<1x5248xf32> to vector<5248xf32>
    %111 = vector.shape_cast %108 : vector<5248xf32> to vector<1x5248xf32>
    tpu.vector_store %arg9[%c2_107, %c0_108], %111 {strides = array<i32>} : memref<27x5248xf32, #tpu.memory_space<vmem>>, vector<1x5248xf32>,
    %c18 = arith.constant 18 : index
    %112 = vector.load %arg8[%c18] : memref<6016xf32, #tpu.memory_space<vmem>>, vector<5248xf32>
    %c3_109 = arith.constant 3 : index
    %c0_110 = arith.constant 0 : index
    %113 = vector.load %arg9[%c3_109, %c0_110] : memref<27x5248xf32, #tpu.memory_space<vmem>>, vector<1x5248xf32>
    %114 = vector.shape_cast %113 : vector<1x5248xf32> to vector<5248xf32>
    %115 = vector.shape_cast %112 : vector<5248xf32> to vector<1x5248xf32>
    tpu.vector_store %arg9[%c3_109, %c0_110], %115 {strides = array<i32>} : memref<27x5248xf32, #tpu.memory_space<vmem>>, vector<1x5248xf32>,
    %c19_111 = arith.constant 19 : index
    %116 = vector.load %arg8[%c19_111] : memref<6016xf32, #tpu.memory_space<vmem>>, vector<5248xf32>
    %c4_112 = arith.constant 4 : index
    %c0_113 = arith.constant 0 : index
    %117 = vector.load %arg9[%c4_112, %c0_113] : memref<27x5248xf32, #tpu.memory_space<vmem>>, vector<1x5248xf32>
    %118 = vector.shape_cast %117 : vector<1x5248xf32> to vector<5248xf32>
    %119 = vector.shape_cast %116 : vector<5248xf32> to vector<1x5248xf32>
    tpu.vector_store %arg9[%c4_112, %c0_113], %119 {strides = array<i32>} : memref<27x5248xf32, #tpu.memory_space<vmem>>, vector<1x5248xf32>,
    %c20 = arith.constant 20 : index
    %120 = vector.load %arg8[%c20] : memref<6016xf32, #tpu.memory_space<vmem>>, vector<5248xf32>
    %c5_114 = arith.constant 5 : index
    %c0_115 = arith.constant 0 : index
    %121 = vector.load %arg9[%c5_114, %c0_115] : memref<27x5248xf32, #tpu.memory_space<vmem>>, vector<1x5248xf32>
    %122 = vector.shape_cast %121 : vector<1x5248xf32> to vector<5248xf32>
    %123 = vector.shape_cast %120 : vector<5248xf32> to vector<1x5248xf32>
    tpu.vector_store %arg9[%c5_114, %c0_115], %123 {strides = array<i32>} : memref<27x5248xf32, #tpu.memory_space<vmem>>, vector<1x5248xf32>,
    %c36 = arith.constant 36 : index
    %124 = vector.load %arg8[%c36] : memref<6016xf32, #tpu.memory_space<vmem>>, vector<5248xf32>
    %c6_116 = arith.constant 6 : index
    %c0_117 = arith.constant 0 : index
    %125 = vector.load %arg9[%c6_116, %c0_117] : memref<27x5248xf32, #tpu.memory_space<vmem>>, vector<1x5248xf32>
    %126 = vector.shape_cast %125 : vector<1x5248xf32> to vector<5248xf32>
    %127 = vector.shape_cast %124 : vector<5248xf32> to vector<1x5248xf32>
    tpu.vector_store %arg9[%c6_116, %c0_117], %127 {strides = array<i32>} : memref<27x5248xf32, #tpu.memory_space<vmem>>, vector<1x5248xf32>,
    %c37_118 = arith.constant 37 : index
    %128 = vector.load %arg8[%c37_118] : memref<6016xf32, #tpu.memory_space<vmem>>, vector<5248xf32>
    %c7_119 = arith.constant 7 : index
    %c0_120 = arith.constant 0 : index
    %129 = vector.load %arg9[%c7_119, %c0_120] : memref<27x5248xf32, #tpu.memory_space<vmem>>, vector<1x5248xf32>
    %130 = vector.shape_cast %129 : vector<1x5248xf32> to vector<5248xf32>
    %131 = vector.shape_cast %128 : vector<5248xf32> to vector<1x5248xf32>
    tpu.vector_store %arg9[%c7_119, %c0_120], %131 {strides = array<i32>} : memref<27x5248xf32, #tpu.memory_space<vmem>>, vector<1x5248xf32>,
    %c38 = arith.constant 38 : index
    %132 = vector.load %arg8[%c38] : memref<6016xf32, #tpu.memory_space<vmem>>, vector<5248xf32>
    %c8_121 = arith.constant 8 : index
    %c0_122 = arith.constant 0 : index
    %133 = vector.load %arg9[%c8_121, %c0_122] : memref<27x5248xf32, #tpu.memory_space<vmem>>, vector<1x5248xf32>
    %134 = vector.shape_cast %133 : vector<1x5248xf32> to vector<5248xf32>
    %135 = vector.shape_cast %132 : vector<5248xf32> to vector<1x5248xf32>
    tpu.vector_store %arg9[%c8_121, %c0_122], %135 {strides = array<i32>} : memref<27x5248xf32, #tpu.memory_space<vmem>>, vector<1x5248xf32>,
    %c324_123 = arith.constant 324 : index
    %136 = vector.load %arg8[%c324_123] : memref<6016xf32, #tpu.memory_space<vmem>>, vector<5248xf32>
    %c9_124 = arith.constant 9 : index
    %c0_125 = arith.constant 0 : index
    %137 = vector.load %arg9[%c9_124, %c0_125] : memref<27x5248xf32, #tpu.memory_space<vmem>>, vector<1x5248xf32>
    %138 = vector.shape_cast %137 : vector<1x5248xf32> to vector<5248xf32>
    %139 = vector.shape_cast %136 : vector<5248xf32> to vector<1x5248xf32>
    tpu.vector_store %arg9[%c9_124, %c0_125], %139 {strides = array<i32>} : memref<27x5248xf32, #tpu.memory_space<vmem>>, vector<1x5248xf32>,
    %c325 = arith.constant 325 : index
    %140 = vector.load %arg8[%c325] : memref<6016xf32, #tpu.memory_space<vmem>>, vector<5248xf32>
    %c10_126 = arith.constant 10 : index
    %c0_127 = arith.constant 0 : index
    %141 = vector.load %arg9[%c10_126, %c0_127] : memref<27x5248xf32, #tpu.memory_space<vmem>>, vector<1x5248xf32>
    %142 = vector.shape_cast %141 : vector<1x5248xf32> to vector<5248xf32>
    %143 = vector.shape_cast %140 : vector<5248xf32> to vector<1x5248xf32>
    tpu.vector_store %arg9[%c10_126, %c0_127], %143 {strides = array<i32>} : memref<27x5248xf32, #tpu.memory_space<vmem>>, vector<1x5248xf32>,
    %c326 = arith.constant 326 : index
    %144 = vector.load %arg8[%c326] : memref<6016xf32, #tpu.memory_space<vmem>>, vector<5248xf32>
    %c11_128 = arith.constant 11 : index
    %c0_129 = arith.constant 0 : index
    %145 = vector.load %arg9[%c11_128, %c0_129] : memref<27x5248xf32, #tpu.memory_space<vmem>>, vector<1x5248xf32>
    %146 = vector.shape_cast %145 : vector<1x5248xf32> to vector<5248xf32>
    %147 = vector.shape_cast %144 : vector<5248xf32> to vector<1x5248xf32>
    tpu.vector_store %arg9[%c11_128, %c0_129], %147 {strides = array<i32>} : memref<27x5248xf32, #tpu.memory_space<vmem>>, vector<1x5248xf32>,
    %c342 = arith.constant 342 : index
    %148 = vector.load %arg8[%c342] : memref<6016xf32, #tpu.memory_space<vmem>>, vector<5248xf32>
    %c12_130 = arith.constant 12 : index
    %c0_131 = arith.constant 0 : index
    %149 = vector.load %arg9[%c12_130, %c0_131] : memref<27x5248xf32, #tpu.memory_space<vmem>>, vector<1x5248xf32>
    %150 = vector.shape_cast %149 : vector<1x5248xf32> to vector<5248xf32>
    %151 = vector.shape_cast %148 : vector<5248xf32> to vector<1x5248xf32>
    tpu.vector_store %arg9[%c12_130, %c0_131], %151 {strides = array<i32>} : memref<27x5248xf32, #tpu.memory_space<vmem>>, vector<1x5248xf32>,
    %c343 = arith.constant 343 : index
    %152 = vector.load %arg8[%c343] : memref<6016xf32, #tpu.memory_space<vmem>>, vector<5248xf32>
    %c13_132 = arith.constant 13 : index
    %c0_133 = arith.constant 0 : index
    %153 = vector.load %arg9[%c13_132, %c0_133] : memref<27x5248xf32, #tpu.memory_space<vmem>>, vector<1x5248xf32>
    %154 = vector.shape_cast %153 : vector<1x5248xf32> to vector<5248xf32>
    %155 = vector.shape_cast %152 : vector<5248xf32> to vector<1x5248xf32>
    tpu.vector_store %arg9[%c13_132, %c0_133], %155 {strides = array<i32>} : memref<27x5248xf32, #tpu.memory_space<vmem>>, vector<1x5248xf32>,
    %c344 = arith.constant 344 : index
    %156 = vector.load %arg8[%c344] : memref<6016xf32, #tpu.memory_space<vmem>>, vector<5248xf32>
    %c14_134 = arith.constant 14 : index
    %c0_135 = arith.constant 0 : index
    %157 = vector.load %arg9[%c14_134, %c0_135] : memref<27x5248xf32, #tpu.memory_space<vmem>>, vector<1x5248xf32>
    %158 = vector.shape_cast %157 : vector<1x5248xf32> to vector<5248xf32>
    %159 = vector.shape_cast %156 : vector<5248xf32> to vector<1x5248xf32>
    tpu.vector_store %arg9[%c14_134, %c0_135], %159 {strides = array<i32>} : memref<27x5248xf32, #tpu.memory_space<vmem>>, vector<1x5248xf32>,
    %c360 = arith.constant 360 : index
    %160 = vector.load %arg8[%c360] : memref<6016xf32, #tpu.memory_space<vmem>>, vector<5248xf32>
    %c15_136 = arith.constant 15 : index
    %c0_137 = arith.constant 0 : index
    %161 = vector.load %arg9[%c15_136, %c0_137] : memref<27x5248xf32, #tpu.memory_space<vmem>>, vector<1x5248xf32>
    %162 = vector.shape_cast %161 : vector<1x5248xf32> to vector<5248xf32>
    %163 = vector.shape_cast %160 : vector<5248xf32> to vector<1x5248xf32>
    tpu.vector_store %arg9[%c15_136, %c0_137], %163 {strides = array<i32>} : memref<27x5248xf32, #tpu.memory_space<vmem>>, vector<1x5248xf32>,
    %c361 = arith.constant 361 : index
    %164 = vector.load %arg8[%c361] : memref<6016xf32, #tpu.memory_space<vmem>>, vector<5248xf32>
    %c16 = arith.constant 16 : index
    %c0_138 = arith.constant 0 : index
    %165 = vector.load %arg9[%c16, %c0_138] : memref<27x5248xf32, #tpu.memory_space<vmem>>, vector<1x5248xf32>
    %166 = vector.shape_cast %165 : vector<1x5248xf32> to vector<5248xf32>
    %167 = vector.shape_cast %164 : vector<5248xf32> to vector<1x5248xf32>
    tpu.vector_store %arg9[%c16, %c0_138], %167 {strides = array<i32>} : memref<27x5248xf32, #tpu.memory_space<vmem>>, vector<1x5248xf32>,
    %c362 = arith.constant 362 : index
    %168 = vector.load %arg8[%c362] : memref<6016xf32, #tpu.memory_space<vmem>>, vector<5248xf32>
    %c17 = arith.constant 17 : index
    %c0_139 = arith.constant 0 : index
    %169 = vector.load %arg9[%c17, %c0_139] : memref<27x5248xf32, #tpu.memory_space<vmem>>, vector<1x5248xf32>
    %170 = vector.shape_cast %169 : vector<1x5248xf32> to vector<5248xf32>
    %171 = vector.shape_cast %168 : vector<5248xf32> to vector<1x5248xf32>
    tpu.vector_store %arg9[%c17, %c0_139], %171 {strides = array<i32>} : memref<27x5248xf32, #tpu.memory_space<vmem>>, vector<1x5248xf32>,
    %c648_140 = arith.constant 648 : index
    %172 = vector.load %arg8[%c648_140] : memref<6016xf32, #tpu.memory_space<vmem>>, vector<5248xf32>
    %c18_141 = arith.constant 18 : index
    %c0_142 = arith.constant 0 : index
    %173 = vector.load %arg9[%c18_141, %c0_142] : memref<27x5248xf32, #tpu.memory_space<vmem>>, vector<1x5248xf32>
    %174 = vector.shape_cast %173 : vector<1x5248xf32> to vector<5248xf32>
    %175 = vector.shape_cast %172 : vector<5248xf32> to vector<1x5248xf32>
    tpu.vector_store %arg9[%c18_141, %c0_142], %175 {strides = array<i32>} : memref<27x5248xf32, #tpu.memory_space<vmem>>, vector<1x5248xf32>,
    %c649 = arith.constant 649 : index
    %176 = vector.load %arg8[%c649] : memref<6016xf32, #tpu.memory_space<vmem>>, vector<5248xf32>
    %c19_143 = arith.constant 19 : index
    %c0_144 = arith.constant 0 : index
    %177 = vector.load %arg9[%c19_143, %c0_144] : memref<27x5248xf32, #tpu.memory_space<vmem>>, vector<1x5248xf32>
    %178 = vector.shape_cast %177 : vector<1x5248xf32> to vector<5248xf32>
    %179 = vector.shape_cast %176 : vector<5248xf32> to vector<1x5248xf32>
    tpu.vector_store %arg9[%c19_143, %c0_144], %179 {strides = array<i32>} : memref<27x5248xf32, #tpu.memory_space<vmem>>, vector<1x5248xf32>,
    %c650 = arith.constant 650 : index
    %180 = vector.load %arg8[%c650] : memref<6016xf32, #tpu.memory_space<vmem>>, vector<5248xf32>
    %c20_145 = arith.constant 20 : index
    %c0_146 = arith.constant 0 : index
    %181 = vector.load %arg9[%c20_145, %c0_146] : memref<27x5248xf32, #tpu.memory_space<vmem>>, vector<1x5248xf32>
    %182 = vector.shape_cast %181 : vector<1x5248xf32> to vector<5248xf32>
    %183 = vector.shape_cast %180 : vector<5248xf32> to vector<1x5248xf32>
    tpu.vector_store %arg9[%c20_145, %c0_146], %183 {strides = array<i32>} : memref<27x5248xf32, #tpu.memory_space<vmem>>, vector<1x5248xf32>,
    %c666 = arith.constant 666 : index
    %184 = vector.load %arg8[%c666] : memref<6016xf32, #tpu.memory_space<vmem>>, vector<5248xf32>
    %c21 = arith.constant 21 : index
    %c0_147 = arith.constant 0 : index
    %185 = vector.load %arg9[%c21, %c0_147] : memref<27x5248xf32, #tpu.memory_space<vmem>>, vector<1x5248xf32>
    %186 = vector.shape_cast %185 : vector<1x5248xf32> to vector<5248xf32>
    %187 = vector.shape_cast %184 : vector<5248xf32> to vector<1x5248xf32>
    tpu.vector_store %arg9[%c21, %c0_147], %187 {strides = array<i32>} : memref<27x5248xf32, #tpu.memory_space<vmem>>, vector<1x5248xf32>,
    %c667 = arith.constant 667 : index
    %188 = vector.load %arg8[%c667] : memref<6016xf32, #tpu.memory_space<vmem>>, vector<5248xf32>
    %c22 = arith.constant 22 : index
    %c0_148 = arith.constant 0 : index
    %189 = vector.load %arg9[%c22, %c0_148] : memref<27x5248xf32, #tpu.memory_space<vmem>>, vector<1x5248xf32>
    %190 = vector.shape_cast %189 : vector<1x5248xf32> to vector<5248xf32>
    %191 = vector.shape_cast %188 : vector<5248xf32> to vector<1x5248xf32>
    tpu.vector_store %arg9[%c22, %c0_148], %191 {strides = array<i32>} : memref<27x5248xf32, #tpu.memory_space<vmem>>, vector<1x5248xf32>,
    %c668 = arith.constant 668 : index
    %192 = vector.load %arg8[%c668] : memref<6016xf32, #tpu.memory_space<vmem>>, vector<5248xf32>
    %c23 = arith.constant 23 : index
    %c0_149 = arith.constant 0 : index
    %193 = vector.load %arg9[%c23, %c0_149] : memref<27x5248xf32, #tpu.memory_space<vmem>>, vector<1x5248xf32>
    %194 = vector.shape_cast %193 : vector<1x5248xf32> to vector<5248xf32>
    %195 = vector.shape_cast %192 : vector<5248xf32> to vector<1x5248xf32>
    tpu.vector_store %arg9[%c23, %c0_149], %195 {strides = array<i32>} : memref<27x5248xf32, #tpu.memory_space<vmem>>, vector<1x5248xf32>,
    %c684 = arith.constant 684 : index
    %196 = vector.load %arg8[%c684] : memref<6016xf32, #tpu.memory_space<vmem>>, vector<5248xf32>
    %c24 = arith.constant 24 : index
    %c0_150 = arith.constant 0 : index
    %197 = vector.load %arg9[%c24, %c0_150] : memref<27x5248xf32, #tpu.memory_space<vmem>>, vector<1x5248xf32>
    %198 = vector.shape_cast %197 : vector<1x5248xf32> to vector<5248xf32>
    %199 = vector.shape_cast %196 : vector<5248xf32> to vector<1x5248xf32>
    tpu.vector_store %arg9[%c24, %c0_150], %199 {strides = array<i32>} : memref<27x5248xf32, #tpu.memory_space<vmem>>, vector<1x5248xf32>,
    %c685 = arith.constant 685 : index
    %200 = vector.load %arg8[%c685] : memref<6016xf32, #tpu.memory_space<vmem>>, vector<5248xf32>
    %c25 = arith.constant 25 : index
    %c0_151 = arith.constant 0 : index
    %201 = vector.load %arg9[%c25, %c0_151] : memref<27x5248xf32, #tpu.memory_space<vmem>>, vector<1x5248xf32>
    %202 = vector.shape_cast %201 : vector<1x5248xf32> to vector<5248xf32>
    %203 = vector.shape_cast %200 : vector<5248xf32> to vector<1x5248xf32>
    tpu.vector_store %arg9[%c25, %c0_151], %203 {strides = array<i32>} : memref<27x5248xf32, #tpu.memory_space<vmem>>, vector<1x5248xf32>,
    %c686 = arith.constant 686 : index
    %204 = vector.load %arg8[%c686] : memref<6016xf32, #tpu.memory_space<vmem>>, vector<5248xf32>
    %c26 = arith.constant 26 : index
    %c0_152 = arith.constant 0 : index
    %205 = vector.load %arg9[%c26, %c0_152] : memref<27x5248xf32, #tpu.memory_space<vmem>>, vector<1x5248xf32>
    %206 = vector.shape_cast %205 : vector<1x5248xf32> to vector<5248xf32>
    %207 = vector.shape_cast %204 : vector<5248xf32> to vector<1x5248xf32>
    tpu.vector_store %arg9[%c26, %c0_152], %207 {strides = array<i32>} : memref<27x5248xf32, #tpu.memory_space<vmem>>, vector<1x5248xf32>,
    %c0_153 = arith.constant 0 : index
    %c0_154 = arith.constant 0 : index
    %208 = vector.load %arg9[%c0_153, %c0_154] : memref<27x5248xf32, #tpu.memory_space<vmem>>, vector<27x5248xf32>
    %c0_155 = arith.constant 0 : index
    %c0_156 = arith.constant 0 : index
    %209 = vector.load %arg2[%c0_155, %c0_156] : memref<16x27xf32, #tpu.memory_space<vmem>>, vector<16x27xf32>
    %cst_157 = arith.constant dense<0.000000e+00> : vector<16x5248xf32>
    %210 = tpu.matmul %209, %208, %cst_157 {dimension_numbers = #tpu.dot_dimension_numbers<[1], [0], [0], [1], [0, 0, 1, 1], [], []>} : vector<16x27xf32>, vector<27x5248xf32>, vector<16x5248xf32> -> vector<16x5248xf32>
    %c0_158 = arith.constant 0 : index
    %c0_159 = arith.constant 0 : index
    %211 = vector.load %arg3[%c0_158, %c0_159] : memref<16x1xf32, #tpu.memory_space<vmem>>, vector<16x1xf32>
    %212 = vector.broadcast %211 : vector<16x1xf32> to vector<16x5248xf32>
    %213 = arith.addf %210, %212 : vector<16x5248xf32>
    %cst_160 = arith.constant 0.000000e+00 : f32
    %214 = vector.broadcast %cst_160 : f32 to vector<16x5248xf32>
    %215 = arith.maximumf %213, %214 : vector<16x5248xf32>
    %c0_161 = arith.constant 0 : index
    %c0_162 = arith.constant 0 : index
    %216 = vector.load %arg4[%c0_161, %c0_162] : memref<16x1xf32, #tpu.memory_space<vmem>>, vector<16x1xf32>
    %217 = vector.broadcast %216 : vector<16x1xf32> to vector<16x5248xf32>
    %218 = arith.mulf %215, %217 : vector<16x5248xf32>
    %cst_163 = arith.constant dense<0.000000e+00> : vector<5248xf32>
    %219 = vector.multi_reduction <add>, %218, %cst_163 [0] : vector<16x5248xf32> to vector<5248xf32>
    %220 = vector.shape_cast %219 : vector<5248xf32> to vector<1x5248xf32>
    %c0_164 = arith.constant 0 : index
    %c0_165 = arith.constant 0 : index
    %221 = vector.load %arg5[%c0_164, %c0_165] : memref<1x1xf32, #tpu.memory_space<vmem>>, vector<1x1xf32>
    %222 = vector.broadcast %221 : vector<1x1xf32> to vector<1x5248xf32>
    %223 = arith.addf %220, %222 : vector<1x5248xf32>
    %c0_166 = arith.constant 0 : index
    %c0_167 = arith.constant 0 : index
    %c0_168 = arith.constant 0 : index
    %224 = vector.load %arg6[%c0_166, %c0_167, %c0_168] : memref<1x1x5248xf32, #tpu.memory_space<vmem>>, vector<1x1x5248xf32>
    %225 = vector.shape_cast %224 : vector<1x1x5248xf32> to vector<1x5248xf32>
    %226 = vector.shape_cast %223 : vector<1x5248xf32> to vector<1x1x5248xf32>
    tpu.vector_store %arg6[%c0_166, %c0_167, %c0_168], %226 {strides = array<i32>} : memref<1x1x5248xf32, #tpu.memory_space<vmem>>, vector<1x1x5248xf32>,
    return
  }
  func.func @transform_0(%arg0: i32) -> (i32, i32, i32, i32) {
    %c0_i32 = arith.constant 0 : i32
    %c0_i32_0 = arith.constant 0 : i32
    %c0_i32_1 = arith.constant 0 : i32
    %c0_i32_2 = arith.constant 0 : i32
    return %arg0, %c0_i32, %c0_i32_0, %c0_i32_1 : i32, i32, i32, i32
  }
  func.func @transform_1(%arg0: i32) -> (i32, i32) {
    %c0_i32 = arith.constant 0 : i32
    %c0_i32_0 = arith.constant 0 : i32
    %c0_i32_1 = arith.constant 0 : i32
    return %c0_i32, %c0_i32_0 : i32, i32
  }
  func.func @transform_2(%arg0: i32) -> (i32, i32) {
    %c0_i32 = arith.constant 0 : i32
    %c0_i32_0 = arith.constant 0 : i32
    %c0_i32_1 = arith.constant 0 : i32
    return %c0_i32, %c0_i32_0 : i32, i32
  }
  func.func @transform_3(%arg0: i32) -> (i32, i32) {
    %c0_i32 = arith.constant 0 : i32
    %c0_i32_0 = arith.constant 0 : i32
    %c0_i32_1 = arith.constant 0 : i32
    return %c0_i32, %c0_i32_0 : i32, i32
  }
  func.func @transform_4(%arg0: i32) -> (i32, i32) {
    %c0_i32 = arith.constant 0 : i32
    %c0_i32_0 = arith.constant 0 : i32
    %c0_i32_1 = arith.constant 0 : i32
    return %c0_i32, %c0_i32_0 : i32, i32
  }
  func.func @transform_5(%arg0: i32) -> (i32, i32, i32) {
    %c0_i32 = arith.constant 0 : i32
    %c0_i32_0 = arith.constant 0 : i32
    %c0_i32_1 = arith.constant 0 : i32
    return %arg0, %c0_i32, %c0_i32_0 : i32, i32, i32
  }
}

</mosaic_0001>

<bundles_post_ra>
// kernel: tpu_custom_call.1
= control target key start
LH: loop header
LB: loop body
LE: loop exit
PB: predicated region body
PF: predicated region fallthrough
CT: control target
= control target key end

     0   :  { %s8691_s0 = inlined_call_operand.hbm [shape: f32[2,16,16,16], index: 0, kind: input, shape index: {}]   ;;  %s8692_s1 = inlined_call_operand.vmem [shape: f32[16,27], index: 1, kind: input, shape index: {}]   ;;  %s8693_s2 = inlined_call_operand.vmem [shape: f32[16,1], index: 2, kind: input, shape index: {}]   ;;  %s8694_s3 = inlined_call_operand.vmem [shape: f32[16,1], index: 3, kind: input, shape index: {}]   ;;  %s8695_s4 = inlined_call_operand.<no memory space> [shape: f32[1,1], index: 4, kind: input, shape index: {}]   ;;  %s8696_s5 = inlined_call_operand.hbm [shape: f32[2,1,5248], index: 5, kind: output, shape index: {}]  }
   0x1   :  { %v10_v0 = vstv %s8695_s4 }
   0x2   :  { %11 = vst [vmem:[#allocation5] sm:$0x1] %v10_v0 }
   0x3   :  { %12 = vsyncpa [#allocation7], 0 }
   0x4   :  { %14 = vsyncpa [#allocation7 + $0x1], 0 }
   0x5   :  { %15 = vsyncpa [#allocation8], 0 }
   0x6   :  { %17 = vsyncpa [#allocation8 + $0x1], 0  ;;  %s5726_s20 = smov 0   ;;  %s5728_s21 = smov 0  }
   0x7   :  { %s5730_s22 = smov 0   ;;  %s5732_s23 = smov 0  }
   0x8 LB: > { %s5747_s4 = sadd.s32 4294967295, %s5638_s23   ;;  %s5297_s24 = sadd.s32 4294967294, %s5638_s23   ;;  %s5638_s23 = sphi %s5732_s23, %s8877_s23   ;;  %s5634_s22 = sphi %s5730_s22, %s8876_s22   ;;  %s5630_s21 = sphi %s5728_s21, %s8875_s21   ;;  %s5626_s20 = sphi %s5726_s20, %s8874_s20  }
   0x9   : > { %s5751_s25 = sadd.s32 1, %s5638_s23   ;;  %s30_s26 = sadd.s32 1, %s5634_s22 }
   0xa   : > { %s27_s27 = ssub.s32 %s5638_s23, %s5751_s25  ;;  %p37_p0 = scmp.ne.s32.totalorder %s5634_s22, %s5630_s21 }
   0xb   : > { %p28_p1 = scmp.eq.s32.totalorder %s27_s27, 0  ;;  %p38_p2 = scmp.eq.s32.totalorder %s5638_s23, 0 }
   0xc   : > { %p43_p3 = scmp.ne.s32.totalorder %s5630_s21, %s5626_s20  ;;  %p44_p4 = scmp.eq.s32.totalorder %s5747_s4, 0 }
   0xd   : > { %s5763_s28 = scalar_select %p28_p1, %s5634_s22, %s30_s26  }
   0xe   : > { %p5765_p5 = por %p38_p2, %p37_p0  ;;  %p5769_p6 = por %p44_p4, %p43_p3 }
   0xf   : > { %p151_p7 = scmp.eq.s32.totalorder %s5747_s4, 1  ;;  %p157_p8 = scmp.eq.s32.totalorder %s5297_s24, 1 }
  0x10   : > { %p5449_p10 = scmp.lt.s32.totalorder %s5638_s23, 2  ;;  %s189_s8 = sand.u32 1, %s5634_s22  }
  0x11   : > { %p5776_p11 = por %p151_p7, %p37_p0  ;;  %p5780_p12 = por %p157_p8, %p43_p3 }
  0x12   : > { %s5430_s9 = sshll.u32 %s5638_s23, 8  ;;  %s5300_s10 = sshll.u32 %s189_s8, 8 }
  0x13   : > { %s198_s13 = scalar_lea.hbm %s8691_s0, %s5430_s9  ;;  %s193_s15 = scalar_lea.vmem [#allocation6], %s5300_s10 }
  0x14   : > { %s199_s14 = sshll.u32 %s198_s13, 4  ;;  %s201_s16 = sshll.u32 %s193_s15, 4  ;;  %s200_s14 = int_to_ptr.hbm [resolvable:$true] %s199_s14  ;;  %s202_s16 = int_to_ptr.vmem [resolvable:$true] %s201_s16 }
  0x15   : > { %p5791_p13 = pnand %p5449_p10, %p5765_p5  ;;  %p5303_p0 = scmp.ge.s32.totalorder %s5638_s23, 1 }
  0x16   : > { %p209_p1 = scmp.lt.s32.totalorder %s5638_s23, 3  ;;  %s190_s18 = scalar_lea.sflag [#allocation7], %s189_s8 }
  0x17   : > { %s5542_s19 = sshra.s32 %s200_s14, 4  ;;  %p5546_p3 = pneg %p5791_p13  ;;  %s5543_s19 = int_to_ptr.hbm [resolvable:$true] %s5542_s19 }
  0x18   : > { %s5544_s24 = scalar_lea.hbm %s5543_s19, 256  ;;  %s5549_s29 = scalar_lea.hbm %s8691_s0, 512 }
  0x19   : > { %p5545_p2 = scmp.ne.s32.totalorder %s5543_s19, %s5544_s24  ;;  %p5550_p5 = scmp.lt.s32.totalorder %s5543_s19, %s8691_s0 }
  0x1a   : > { %p5551_p8 = scmp.lt.s32.totalorder %s5549_s29, %s5544_s24 }
  0x1b   : > { %p5547_p4 = pnand %p5546_p3, %p5545_p2 }
  0x1c   : > { %p5552_p10 = por %p5551_p8, %p5550_p5 }
  0x1d   : > { %p5548_p7 = pneg %p5547_p4 }
  0x1f   : > { %p5553_p9 = pnand %p5552_p10, %p5548_p7 }
  0x21   : > { %5556 = shalt.err (!%p5553_p9)
}
  0x22   : > { %s5640_s8 = smov 128   ;;  %s5641_s11 = smov 8  }
  0x23   : > { %5444 = dma.hbm_to_vmem [thread:$0]  (!%p5791_p13), %s200_s14, 4096, %s202_s16, %s190_s18, %s5640_s8, %s5640_s8, %s5641_s11  }
  0x24   : > { %p210_p2 = pnand %p5303_p0, %p209_p1 }
  0x25   : > { %s5812_s12 = sand.u32 (!%p210_p2), 1, %s5630_s21  }
  0x26   : > { %213 = sbr.rel (%p210_p2) target bundleno = 1160 (0x488), region = 40  ;;  %s5304_s13 = sshll.u32 (!%p210_p2), %s5812_s12, 8 }
  0x27   : > { %s216_s15 = scalar_lea.sflag (!%p210_p2), [#allocation7], %s5812_s12  ;;  %s5816_s19 = scalar_lea.vmem (!%p210_p2), [#allocation6], %s5304_s13 }
  0x2b   : > { %5617 = dma.done.wait (%p5769_p6), %s216_s15, 4096  }
  0x2c   : > { %5619 = vsyncadd (%p5769_p6), %s216_s15, 4294963200  ;;  %vm297_vm0 = vcmask 1041409   ;;  %vm8699_vm1 = vcmask 1042434   ;;  %vm303_vm2 = vcmask 1043459   ;;  %vm8698_vm3 = vcmask 1044484   ;;  %s5642_s30 = smov 37  }
  0x2d   : > { %vm309_vm4 = vcmask 1045509   ;;  %vm8697_vm5 = vcmask 1046534   ;;  %v340_v1 = vld [vmem:[%s5816_s19 + $0x1] sm:$0x1]  ;;  %v341_v2 = vld [vmem:[%s5816_s19 + $0x11] sm:$0x1] }
  0x2e   : > { %v342_v3 = vld [vmem:[%s5816_s19 + $0x21] sm:$0x1]  ;;  %v343_v4 = vld [vmem:[%s5816_s19 + $0x31] sm:$0x1]  ;;  %v372_v9 = vrot.slane %v341_v2, 7  ;;  %vm315_vm6 = vcmask 1047559  }
  0x2f   : > { %v344_v5 = vld [vmem:[%s5816_s19 + $0x41] sm:$0x1]  ;;  %v345_v6 = vld [vmem:[%s5816_s19 + $0x51] sm:$0x1]  ;;  %v374_v10 = vrot.slane %v342_v3, 6  ;;  %v376_v11 = vrot.slane %v343_v4, 5 }
  0x30   : > { %v346_v7 = vld [vmem:[%s5816_s19 + $0x61] sm:$0x1]  ;;  %v347_v8 = vld [vmem:[%s5816_s19 + $0x71] sm:$0x1]  ;;  %v378_v12 = vrot.slane %v344_v5, 4  ;;  %v380_v13 = vrot.slane %v345_v6, 3  ;;  %v373_v15 = vsel %vm297_vm0, %v372_v9, %v340_v1 }
  0x31   : > { %v264_v14 = vld [vmem:[%s5816_s19] sm:$0x1]  ;;  %v382_v16 = vrot.slane %v346_v7, 2  ;;  %v384_v17 = vrot.slane %v347_v8, 1  ;;  %v265_v18 = vld [vmem:[%s5816_s19 + $0x10] sm:$0x1]  ;;  %v375_v20 = vsel %vm8699_vm1, %v374_v10, %v373_v15 }
  0x32   : > { %v266_v19 = vld [vmem:[%s5816_s19 + $0x20] sm:$0x1]  ;;  %v267_v21 = vld [vmem:[%s5816_s19 + $0x30] sm:$0x1]  ;;  %v377_v24 = vsel %vm303_vm2, %v376_v11, %v375_v20  ;;  %v296_v27 = vrot.slane %v265_v18, 7  ;;  %s5643_s14 = smov 19  }
  0x33   : > { %v268_v22 = vld [vmem:[%s5816_s19 + $0x40] sm:$0x1]  ;;  %v269_v23 = vld [vmem:[%s5816_s19 + $0x50] sm:$0x1]  ;;  %v299_v28 = vrot.slane %v266_v19, 6  ;;  %v379_v29 = vsel %vm8698_vm3, %v378_v12, %v377_v24  ;;  %v302_v30 = vrot.slane %v267_v21, 5 }
  0x34   : > { %v270_v25 = vld [vmem:[%s5816_s19 + $0x60] sm:$0x1]  ;;  %v271_v26 = vld [vmem:[%s5816_s19 + $0x70] sm:$0x1]  ;;  %v305_v31 = vrot.slane %v268_v22, 4  ;;  %v308_v32 = vrot.slane %v269_v23, 3  ;;  %v381_v34 = vsel %vm309_vm4, %v380_v13, %v379_v29  ;;  %v298_v35 = vsel %vm297_vm0, %v296_v27, %v264_v14 }
  0x35   : > { %v348_v33 = vld [vmem:[%s5816_s19 + $0x81] sm:$0x1]  ;;  %v311_v36 = vrot.slane %v270_v25, 2  ;;  %v314_v37 = vrot.slane %v271_v26, 1  ;;  %v349_v38 = vld [vmem:[%s5816_s19 + $0x91] sm:$0x1]  ;;  %v383_v40 = vsel %vm8697_vm5, %v382_v16, %v381_v34  ;;  %v301_v41 = vsel %vm8699_vm1, %v299_v28, %v298_v35 }
  0x36   : > { %v350_v39 = vld [vmem:[%s5816_s19 + $0xa1] sm:$0x1]  ;;  %v351_v42 = vld [vmem:[%s5816_s19 + $0xb1] sm:$0x1]  ;;  %v385_v45 = vsel %vm315_vm6, %v384_v17, %v383_v40  ;;  %v304_v46 = vsel %vm303_vm2, %v302_v30, %v301_v41  ;;  %v386_v49 = vrot.slane %v349_v38, 7  ;;  %s5644_s16 = smov 73  }
  0x37   : > { %v352_v43 = vld [vmem:[%s5816_s19 + $0xc1] sm:$0x1]  ;;  %v353_v44 = vld [vmem:[%s5816_s19 + $0xd1] sm:$0x1]  ;;  %v388_v50 = vrot.slane %v350_v39, 6  ;;  %400 = vrot.lane.b32.xlu1 %v385_v45, %s5642_s30  ;;  %v307_v51 = vsel %vm8698_vm3, %v305_v31, %v304_v46  ;;  %v390_v52 = vrot.slane %v351_v42, 5 }
  0x38   : > { %v354_v47 = vld [vmem:[%s5816_s19 + $0xe1] sm:$0x1]  ;;  %v355_v48 = vld [vmem:[%s5816_s19 + $0xf1] sm:$0x1]  ;;  %v392_v53 = vrot.slane %v352_v43, 4  ;;  %v394_v54 = vrot.slane %v353_v44, 3  ;;  %v310_v56 = vsel %vm309_vm4, %v308_v32, %v307_v51  ;;  %v387_v57 = vsel %vm297_vm0, %v386_v49, %v348_v33 }
  0x39   : > { %v272_v55 = vld [vmem:[%s5816_s19 + $0x80] sm:$0x1]  ;;  %v396_v58 = vrot.slane %v354_v47, 2  ;;  %v398_v59 = vrot.slane %v355_v48, 1  ;;  %v273_v60 = vld [vmem:[%s5816_s19 + $0x90] sm:$0x1]  ;;  %v313_v62 = vsel %vm8697_vm5, %v311_v36, %v310_v56  ;;  %v389_v63 = vsel %vm8699_vm1, %v388_v50, %v387_v57 }
  0x3a   : > { %v274_v61 = vld [vmem:[%s5816_s19 + $0xa0] sm:$0x1]  ;;  %v275_v0 = vld [vmem:[%s5816_s19 + $0xb0] sm:$0x1]  ;;  %v316_v3 = vsel %vm315_vm6, %v314_v37, %v313_v62  ;;  %v391_v4 = vsel %vm303_vm2, %v390_v52, %v389_v63  ;;  %v317_v7 = vrot.slane %v273_v60, 7  ;;  %s5645_s17 = smov 109  }
  0x3b   : > { %v276_v1 = vld [vmem:[%s5816_s19 + $0xc0] sm:$0x1]  ;;  %v277_v2 = vld [vmem:[%s5816_s19 + $0xd0] sm:$0x1]  ;;  %v319_v8 = vrot.slane %v274_v61, 6  ;;  %331 = vrot.lane.b32.xlu0 %v316_v3, %s5643_s14  ;;  %v393_v9 = vsel %vm8698_vm3, %v392_v53, %v391_v4  ;;  %v321_v10 = vrot.slane %v275_v0, 5 }
  0x3c   : > { %v278_v5 = vld [vmem:[%s5816_s19 + $0xe0] sm:$0x1]  ;;  %v279_v6 = vld [vmem:[%s5816_s19 + $0xf0] sm:$0x1]  ;;  %v323_v11 = vrot.slane %v276_v1, 4  ;;  %v325_v12 = vrot.slane %v277_v2, 3  ;;  %v395_v14 = vsel %vm309_vm4, %v394_v54, %v393_v9  ;;  %v318_v15 = vsel %vm297_vm0, %v317_v7, %v272_v55 }
  0x3d   : > { %v486_v13 = vld [vmem:[%s5816_s19 + $0x83] sm:$0x1]  ;;  %v327_v16 = vrot.slane %v278_v5, 2  ;;  %v329_v17 = vrot.slane %v279_v6, 1  ;;  %v487_v18 = vld [vmem:[%s5816_s19 + $0x93] sm:$0x1]  ;;  %v397_v20 = vsel %vm8697_vm5, %v396_v58, %v395_v14  ;;  %v320_v21 = vsel %vm8699_vm1, %v319_v8, %v318_v15 }
  0x3e   : > { %v488_v19 = vld [vmem:[%s5816_s19 + $0xa3] sm:$0x1]  ;;  %v489_v22 = vld [vmem:[%s5816_s19 + $0xb3] sm:$0x1]  ;;  %v399_v25 = vsel %vm315_vm6, %v398_v59, %v397_v20  ;;  %v322_v26 = vsel %vm303_vm2, %v321_v10, %v320_v21  ;;  %v524_v29 = vrot.slane %v487_v18, 7  ;;  %s5646_s18 = smov 91  }
  0x3f   : > { %v490_v23 = vld [vmem:[%s5816_s19 + $0xc3] sm:$0x1]  ;;  %v491_v24 = vld [vmem:[%s5816_s19 + $0xd3] sm:$0x1]  ;;  %v526_v30 = vrot.slane %v488_v19, 6  ;;  %402 = vrot.lane.b32.xlu1 %v399_v25, %s5642_s30  ;;  %v324_v31 = vsel %vm8698_vm3, %v323_v11, %v322_v26  ;;  %v528_v32 = vrot.slane %v489_v22, 5 }
  0x40   : > { %v492_v27 = vld [vmem:[%s5816_s19 + $0xe3] sm:$0x1]  ;;  %v493_v28 = vld [vmem:[%s5816_s19 + $0xf3] sm:$0x1]  ;;  %v530_v33 = vrot.slane %v490_v23, 4  ;;  %v532_v34 = vrot.slane %v491_v24, 3  ;;  %v326_v36 = vsel %vm309_vm4, %v325_v12, %v324_v31  ;;  %v525_v37 = vsel %vm297_vm0, %v524_v29, %v486_v13 }
  0x41   : > { %v478_v35 = vld [vmem:[%s5816_s19 + $0x3] sm:$0x1]  ;;  %v534_v38 = vrot.slane %v492_v27, 2  ;;  %v536_v39 = vrot.slane %v493_v28, 1  ;;  %v479_v40 = vld [vmem:[%s5816_s19 + $0x13] sm:$0x1]  ;;  %v328_v42 = vsel %vm8697_vm5, %v327_v16, %v326_v36  ;;  %v527_v43 = vsel %vm8699_vm1, %v526_v30, %v525_v37 }
  0x42   : > { %v480_v41 = vld [vmem:[%s5816_s19 + $0x23] sm:$0x1]  ;;  %v481_v44 = vld [vmem:[%s5816_s19 + $0x33] sm:$0x1]  ;;  %v330_v47 = vsel %vm315_vm6, %v329_v17, %v328_v42  ;;  %v529_v48 = vsel %vm303_vm2, %v528_v32, %v527_v43  ;;  %v510_v51 = vrot.slane %v479_v40, 7  ;;  %s5647_s24 = smov 55  }
  0x43   : > { %v482_v45 = vld [vmem:[%s5816_s19 + $0x43] sm:$0x1]  ;;  %v483_v46 = vld [vmem:[%s5816_s19 + $0x53] sm:$0x1]  ;;  %v512_v52 = vrot.slane %v480_v41, 6  ;;  %333 = vrot.lane.b32.xlu0 %v330_v47, %s5643_s14  ;;  %v531_v53 = vsel %vm8698_vm3, %v530_v33, %v529_v48  ;;  %v514_v54 = vrot.slane %v481_v44, 5 }
  0x44   : > { %v484_v49 = vld [vmem:[%s5816_s19 + $0x63] sm:$0x1]  ;;  %v485_v50 = vld [vmem:[%s5816_s19 + $0x73] sm:$0x1]  ;;  %v516_v55 = vrot.slane %v482_v45, 4  ;;  %v518_v56 = vrot.slane %v483_v46, 3  ;;  %v533_v58 = vsel %vm309_vm4, %v532_v34, %v531_v53  ;;  %v511_v59 = vsel %vm297_vm0, %v510_v51, %v478_v35 }
  0x45   : > { %v616_v57 = vld [vmem:[%s5816_s19 + $0x5] sm:$0x1]  ;;  %v520_v60 = vrot.slane %v484_v49, 2  ;;  %v522_v61 = vrot.slane %v485_v50, 1  ;;  %v617_v62 = vld [vmem:[%s5816_s19 + $0x15] sm:$0x1]  ;;  %v535_v0 = vsel %vm8697_vm5, %v534_v38, %v533_v58  ;;  %v513_v1 = vsel %vm8699_vm1, %v512_v52, %v511_v59 }
  0x46   : > { %v618_v63 = vld [vmem:[%s5816_s19 + $0x25] sm:$0x1]  ;;  %v619_v2 = vld [vmem:[%s5816_s19 + $0x35] sm:$0x1]  ;;  %v537_v5 = vsel %vm315_vm6, %v536_v39, %v535_v0  ;;  %v515_v6 = vsel %vm303_vm2, %v514_v54, %v513_v1  ;;  %v648_v9 = vrot.slane %v617_v62, 7  ;;  %s5648_s26 = smov 127  }
  0x47   : > { %v620_v3 = vld [vmem:[%s5816_s19 + $0x45] sm:$0x1]  ;;  %v621_v4 = vld [vmem:[%s5816_s19 + $0x55] sm:$0x1]  ;;  %v650_v10 = vrot.slane %v618_v63, 6  ;;  %540 = vrot.lane.b32.xlu1 %v537_v5, %s5644_s16  ;;  %v517_v11 = vsel %vm8698_vm3, %v516_v55, %v515_v6  ;;  %v652_v12 = vrot.slane %v619_v2, 5 }
  0x48   : > { %v622_v7 = vld [vmem:[%s5816_s19 + $0x65] sm:$0x1]  ;;  %v623_v8 = vld [vmem:[%s5816_s19 + $0x75] sm:$0x1]  ;;  %v654_v13 = vrot.slane %v620_v3, 4  ;;  %v656_v14 = vrot.slane %v621_v4, 3  ;;  %v519_v16 = vsel %vm309_vm4, %v518_v56, %v517_v11  ;;  %v649_v17 = vsel %vm297_vm0, %v648_v9, %v616_v57 }
  0x49   : > { %v555_v15 = vld [vmem:[%s5816_s19 + $0x84] sm:$0x1]  ;;  %v658_v18 = vrot.slane %v622_v7, 2  ;;  %v660_v19 = vrot.slane %v623_v8, 1  ;;  %v556_v20 = vld [vmem:[%s5816_s19 + $0x94] sm:$0x1]  ;;  %v521_v22 = vsel %vm8697_vm5, %v520_v60, %v519_v16  ;;  %v651_v23 = vsel %vm8699_vm1, %v650_v10, %v649_v17 }
  0x4a   : > { %v557_v21 = vld [vmem:[%s5816_s19 + $0xa4] sm:$0x1]  ;;  %v558_v24 = vld [vmem:[%s5816_s19 + $0xb4] sm:$0x1]  ;;  %v523_v27 = vsel %vm315_vm6, %v522_v61, %v521_v22  ;;  %v653_v28 = vsel %vm303_vm2, %v652_v12, %v651_v23  ;;  %v593_v31 = vrot.slane %v556_v20, 7  ;;  %s5649_s27 = smov 35  }
  0x4b   : > { %v559_v25 = vld [vmem:[%s5816_s19 + $0xc4] sm:$0x1]  ;;  %v560_v26 = vld [vmem:[%s5816_s19 + $0xd4] sm:$0x1]  ;;  %v595_v32 = vrot.slane %v557_v21, 6  ;;  %538 = vrot.lane.b32.xlu0 %v523_v27, %s5644_s16  ;;  %v655_v33 = vsel %vm8698_vm3, %v654_v13, %v653_v28  ;;  %v597_v34 = vrot.slane %v558_v24, 5 }
  0x4c   : > { %v561_v29 = vld [vmem:[%s5816_s19 + $0xe4] sm:$0x1]  ;;  %v562_v30 = vld [vmem:[%s5816_s19 + $0xf4] sm:$0x1]  ;;  %v599_v35 = vrot.slane %v559_v25, 4  ;;  %v601_v36 = vrot.slane %v560_v26, 3  ;;  %v657_v38 = vsel %vm309_vm4, %v656_v14, %v655_v33  ;;  %v594_v39 = vsel %vm297_vm0, %v593_v31, %v555_v15 }
  0x4d   : > { %v409_v37 = vld [vmem:[%s5816_s19 + $0x2] sm:$0x1]  ;;  %v603_v40 = vrot.slane %v561_v29, 2  ;;  %v605_v41 = vrot.slane %v562_v30, 1  ;;  %v410_v42 = vld [vmem:[%s5816_s19 + $0x12] sm:$0x1]  ;;  %v659_v44 = vsel %vm8697_vm5, %v658_v18, %v657_v38  ;;  %v596_v45 = vsel %vm8699_vm1, %v595_v32, %v594_v39 }
  0x4e   : > { %v411_v43 = vld [vmem:[%s5816_s19 + $0x22] sm:$0x1]  ;;  %v412_v46 = vld [vmem:[%s5816_s19 + $0x32] sm:$0x1]  ;;  %v661_v49 = vsel %vm315_vm6, %v660_v19, %v659_v44  ;;  %v598_v50 = vsel %vm303_vm2, %v597_v34, %v596_v45  ;;  %v441_v53 = vrot.slane %v410_v42, 7  ;;  %s5650_s29 = smov 17  }
  0x4f   : > { %v413_v47 = vld [vmem:[%s5816_s19 + $0x42] sm:$0x1]  ;;  %v414_v48 = vld [vmem:[%s5816_s19 + $0x52] sm:$0x1]  ;;  %v443_v54 = vrot.slane %v411_v43, 6  ;;  %676 = vrot.lane.b32.xlu1 %v661_v49, %s5645_s17  ;;  %v600_v55 = vsel %vm8698_vm3, %v599_v35, %v598_v50  ;;  %v445_v56 = vrot.slane %v412_v46, 5 }
  0x50   : > { %v415_v51 = vld [vmem:[%s5816_s19 + $0x62] sm:$0x1]  ;;  %v416_v52 = vld [vmem:[%s5816_s19 + $0x72] sm:$0x1]  ;;  %v447_v57 = vrot.slane %v413_v47, 4  ;;  %v449_v58 = vrot.slane %v414_v48, 3  ;;  %v602_v60 = vsel %vm309_vm4, %v601_v36, %v600_v55  ;;  %v442_v61 = vsel %vm297_vm0, %v441_v53, %v409_v37 }
  0x51   : > { %v693_v59 = vld [vmem:[%s5816_s19 + $0x86] sm:$0x1]  ;;  %v451_v62 = vrot.slane %v415_v51, 2  ;;  %v453_v63 = vrot.slane %v416_v52, 1  ;;  %v694_v0 = vld [vmem:[%s5816_s19 + $0x96] sm:$0x1]  ;;  %v604_v2 = vsel %vm8697_vm5, %v603_v40, %v602_v60  ;;  %v444_v3 = vsel %vm8699_vm1, %v443_v54, %v442_v61 }
  0x52   : > { %v695_v1 = vld [vmem:[%s5816_s19 + $0xa6] sm:$0x1]  ;;  %v696_v4 = vld [vmem:[%s5816_s19 + $0xb6] sm:$0x1]  ;;  %v606_v7 = vsel %vm315_vm6, %v605_v41, %v604_v2  ;;  %v446_v8 = vsel %vm303_vm2, %v445_v56, %v444_v3  ;;  %v731_v11 = vrot.slane %v694_v0, 7  ;;  %s5651_s9 = smov 53  }
  0x53   : > { %v697_v5 = vld [vmem:[%s5816_s19 + $0xc6] sm:$0x1]  ;;  %v698_v6 = vld [vmem:[%s5816_s19 + $0xd6] sm:$0x1]  ;;  %v733_v12 = vrot.slane %v695_v1, 6  ;;  %609 = vrot.lane.b32.xlu0 %v606_v7, %s5646_s18  ;;  %v448_v13 = vsel %vm8698_vm3, %v447_v57, %v446_v8  ;;  %v735_v14 = vrot.slane %v696_v4, 5 }
  0x54   : > { %v699_v9 = vld [vmem:[%s5816_s19 + $0xe6] sm:$0x1]  ;;  %v700_v10 = vld [vmem:[%s5816_s19 + $0xf6] sm:$0x1]  ;;  %v737_v15 = vrot.slane %v697_v5, 4  ;;  %v739_v16 = vrot.slane %v698_v6, 3  ;;  %v450_v18 = vsel %vm309_vm4, %v449_v58, %v448_v13  ;;  %v732_v19 = vsel %vm297_vm0, %v731_v11, %v693_v59 }
  0x55   : > { %v685_v17 = vld [vmem:[%s5816_s19 + $0x6] sm:$0x1]  ;;  %v741_v20 = vrot.slane %v699_v9, 2  ;;  %v743_v21 = vrot.slane %v700_v10, 1  ;;  %v686_v22 = vld [vmem:[%s5816_s19 + $0x16] sm:$0x1]  ;;  %v452_v24 = vsel %vm8697_vm5, %v451_v62, %v450_v18  ;;  %v734_v25 = vsel %vm8699_vm1, %v733_v12, %v732_v19 }
  0x56   : > { %v687_v23 = vld [vmem:[%s5816_s19 + $0x26] sm:$0x1]  ;;  %v688_v26 = vld [vmem:[%s5816_s19 + $0x36] sm:$0x1]  ;;  %v454_v29 = vsel %vm315_vm6, %v453_v63, %v452_v24  ;;  %v736_v30 = vsel %vm303_vm2, %v735_v14, %v734_v25  ;;  %v717_v33 = vrot.slane %v686_v22, 7  ;;  %s5652_s10 = smov 89  }
  0x57   : > { %v689_v27 = vld [vmem:[%s5816_s19 + $0x46] sm:$0x1]  ;;  %v690_v28 = vld [vmem:[%s5816_s19 + $0x56] sm:$0x1]  ;;  %v719_v34 = vrot.slane %v687_v23, 6  ;;  %469 = vrot.lane.b32.xlu2 %v454_v29, %s5647_s24  ;;  %v738_v35 = vsel %vm8698_vm3, %v737_v15, %v736_v30  ;;  %v721_v36 = vrot.slane %v688_v26, 5 }
  0x58   : > { %v691_v31 = vld [vmem:[%s5816_s19 + $0x66] sm:$0x1]  ;;  %v692_v32 = vld [vmem:[%s5816_s19 + $0x76] sm:$0x1]  ;;  %v723_v37 = vrot.slane %v689_v27, 4  ;;  %v725_v38 = vrot.slane %v690_v28, 3  ;;  %v740_v40 = vsel %vm309_vm4, %v739_v16, %v738_v35  ;;  %v718_v41 = vsel %vm297_vm0, %v717_v33, %v685_v17 }
  0x59   : > { %v417_v39 = vld [vmem:[%s5816_s19 + $0x82] sm:$0x1]  ;;  %v727_v42 = vrot.slane %v691_v31, 2  ;;  %v729_v43 = vrot.slane %v692_v32, 1  ;;  %v418_v44 = vld [vmem:[%s5816_s19 + $0x92] sm:$0x1]  ;;  %v742_v46 = vsel %vm8697_vm5, %v741_v20, %v740_v40  ;;  %v720_v47 = vsel %vm8699_vm1, %v719_v34, %v718_v41 }
  0x5a   : > { %v419_v45 = vld [vmem:[%s5816_s19 + $0xa2] sm:$0x1]  ;;  %v420_v48 = vld [vmem:[%s5816_s19 + $0xb2] sm:$0x1]  ;;  %v744_v51 = vsel %vm315_vm6, %v743_v21, %v742_v46  ;;  %v722_v52 = vsel %vm303_vm2, %v721_v36, %v720_v47  ;;  %v455_v55 = vrot.slane %v418_v44, 7  ;;  %s5653_s8 = smov 71  }
  0x5b   : > { %v421_v49 = vld [vmem:[%s5816_s19 + $0xc2] sm:$0x1]  ;;  %v422_v50 = vld [vmem:[%s5816_s19 + $0xd2] sm:$0x1]  ;;  %v457_v56 = vrot.slane %v419_v45, 6  ;;  %747 = vrot.lane.b32.xlu1 %v744_v51, %s5648_s26  ;;  %v724_v57 = vsel %vm8698_vm3, %v723_v37, %v722_v52  ;;  %v459_v58 = vrot.slane %v420_v48, 5 }
  0x5c   : > { %v423_v53 = vld [vmem:[%s5816_s19 + $0xe2] sm:$0x1]  ;;  %v424_v54 = vld [vmem:[%s5816_s19 + $0xf2] sm:$0x1]  ;;  %v461_v59 = vrot.slane %v421_v49, 4  ;;  %v463_v60 = vrot.slane %v422_v50, 3  ;;  %v726_v62 = vsel %vm309_vm4, %v725_v38, %v724_v57  ;;  %v456_v63 = vsel %vm297_vm0, %v455_v55, %v417_v39 }
  0x5d   : > { %v826_v61 = vld [vmem:[%s5816_s19 + $0x8] sm:$0x1]  ;;  %v465_v0 = vrot.slane %v423_v53, 2  ;;  %v467_v1 = vrot.slane %v424_v54, 1  ;;  %v827_v2 = vld [vmem:[%s5816_s19 + $0x18] sm:$0x1]  ;;  %v728_v4 = vsel %vm8697_vm5, %v727_v42, %v726_v62  ;;  %v458_v5 = vsel %vm8699_vm1, %v457_v56, %v456_v63 }
  0x5e   : > { %v828_v3 = vld [vmem:[%s5816_s19 + $0x28] sm:$0x1]  ;;  %v829_v6 = vld [vmem:[%s5816_s19 + $0x38] sm:$0x1]  ;;  %v730_v9 = vsel %vm315_vm6, %v729_v43, %v728_v4  ;;  %v460_v10 = vsel %vm303_vm2, %v459_v58, %v458_v5  ;;  %v858_v13 = vrot.slane %v827_v2, 7  ;;  %s5654_s11 = smov 107  }
  0x5f   : > { %v830_v7 = vld [vmem:[%s5816_s19 + $0x48] sm:$0x1]  ;;  %v831_v8 = vld [vmem:[%s5816_s19 + $0x58] sm:$0x1]  ;;  %v860_v14 = vrot.slane %v828_v3, 6  ;;  %745 = vrot.lane.b32.xlu0 %v730_v9, %s5648_s26  ;;  %v462_v15 = vsel %vm8698_vm3, %v461_v59, %v460_v10  ;;  %v862_v16 = vrot.slane %v829_v6, 5 }
  0x60   : > { %v832_v11 = vld [vmem:[%s5816_s19 + $0x68] sm:$0x1]  ;;  %v833_v12 = vld [vmem:[%s5816_s19 + $0x78] sm:$0x1]  ;;  %v864_v17 = vrot.slane %v830_v7, 4  ;;  %v866_v18 = vrot.slane %v831_v8, 3  ;;  %v464_v20 = vsel %vm309_vm4, %v463_v60, %v462_v15  ;;  %v859_v21 = vsel %vm297_vm0, %v858_v13, %v826_v61 }
  0x61   : > { %v765_v19 = vld [vmem:[%s5816_s19 + $0x87] sm:$0x1]  ;;  %v868_v22 = vrot.slane %v832_v11, 2  ;;  %v870_v23 = vrot.slane %v833_v12, 1  ;;  %v766_v24 = vld [vmem:[%s5816_s19 + $0x97] sm:$0x1]  ;;  %v466_v26 = vsel %vm8697_vm5, %v465_v0, %v464_v20  ;;  %v861_v27 = vsel %vm8699_vm1, %v860_v14, %v859_v21 }
  0x62   : > { %v767_v25 = vld [vmem:[%s5816_s19 + $0xa7] sm:$0x1]  ;;  %v768_v28 = vld [vmem:[%s5816_s19 + $0xb7] sm:$0x1]  ;;  %v468_v31 = vsel %vm315_vm6, %v467_v1, %v466_v26  ;;  %v863_v32 = vsel %vm303_vm2, %v862_v16, %v861_v27  ;;  %v803_v35 = vrot.slane %v766_v24, 7  ;;  %s5655_s13 = smov 15  }
  0x63   : > { %v769_v29 = vld [vmem:[%s5816_s19 + $0xc7] sm:$0x1]  ;;  %v770_v30 = vld [vmem:[%s5816_s19 + $0xd7] sm:$0x1]  ;;  %v805_v36 = vrot.slane %v767_v25, 6  ;;  %471 = vrot.lane.b32.xlu2 %v468_v31, %s5647_s24  ;;  %v865_v37 = vsel %vm8698_vm3, %v864_v17, %v863_v32  ;;  %v807_v38 = vrot.slane %v768_v28, 5 }
  0x64   : > { %v771_v33 = vld [vmem:[%s5816_s19 + $0xe7] sm:$0x1]  ;;  %v772_v34 = vld [vmem:[%s5816_s19 + $0xf7] sm:$0x1]  ;;  %v809_v39 = vrot.slane %v769_v29, 4  ;;  %v811_v40 = vrot.slane %v770_v30, 3  ;;  %v867_v42 = vsel %vm309_vm4, %v866_v18, %v865_v37  ;;  %v804_v43 = vsel %vm297_vm0, %v803_v35, %v765_v19 }
  0x65   : > { %v547_v41 = vld [vmem:[%s5816_s19 + $0x4] sm:$0x1]  ;;  %v813_v44 = vrot.slane %v771_v33, 2  ;;  %v815_v45 = vrot.slane %v772_v34, 1  ;;  %v548_v46 = vld [vmem:[%s5816_s19 + $0x14] sm:$0x1]  ;;  %v869_v48 = vsel %vm8697_vm5, %v868_v22, %v867_v42  ;;  %v806_v49 = vsel %vm8699_vm1, %v805_v36, %v804_v43 }
  0x66   : > { %v549_v47 = vld [vmem:[%s5816_s19 + $0x24] sm:$0x1]  ;;  %v550_v50 = vld [vmem:[%s5816_s19 + $0x34] sm:$0x1]  ;;  %v871_v53 = vsel %vm315_vm6, %v870_v23, %v869_v48  ;;  %v808_v54 = vsel %vm303_vm2, %v807_v38, %v806_v49  ;;  %v579_v57 = vrot.slane %v548_v46, 7  ;;  %s5656_s15 = smov 125  }
  0x67   : > { %v551_v51 = vld [vmem:[%s5816_s19 + $0x44] sm:$0x1]  ;;  %v552_v52 = vld [vmem:[%s5816_s19 + $0x54] sm:$0x1]  ;;  %v581_v58 = vrot.slane %v549_v47, 6  ;;  %886 = vrot.lane.b32.xlu1 %v871_v53, %s5649_s27  ;;  %v810_v59 = vsel %vm8698_vm3, %v809_v39, %v808_v54  ;;  %v583_v60 = vrot.slane %v550_v50, 5 }
  0x68   : > { %v553_v55 = vld [vmem:[%s5816_s19 + $0x64] sm:$0x1]  ;;  %v554_v56 = vld [vmem:[%s5816_s19 + $0x74] sm:$0x1]  ;;  %v585_v61 = vrot.slane %v551_v51, 4  ;;  %v587_v62 = vrot.slane %v552_v52, 3  ;;  %v812_v0 = vsel %vm309_vm4, %v811_v40, %v810_v59  ;;  %v580_v1 = vsel %vm297_vm0, %v579_v57, %v547_v41 }
  0x69   : > { %v903_v63 = vld [vmem:[%s5816_s19 + $0x89] sm:$0x1]  ;;  %v589_v2 = vrot.slane %v553_v55, 2  ;;  %v591_v3 = vrot.slane %v554_v56, 1  ;;  %v904_v4 = vld [vmem:[%s5816_s19 + $0x99] sm:$0x1]  ;;  %v814_v6 = vsel %vm8697_vm5, %v813_v44, %v812_v0  ;;  %v582_v7 = vsel %vm8699_vm1, %v581_v58, %v580_v1 }
  0x6a   : > { %v905_v5 = vld [vmem:[%s5816_s19 + $0xa9] sm:$0x1]  ;;  %v906_v8 = vld [vmem:[%s5816_s19 + $0xb9] sm:$0x1]  ;;  %v816_v11 = vsel %vm315_vm6, %v815_v45, %v814_v6  ;;  %v584_v12 = vsel %vm303_vm2, %v583_v60, %v582_v7  ;;  %v941_v15 = vrot.slane %v904_v4, 7  ;;  %s5657_s30 = smov 33  }
  0x6b   : > { %v907_v9 = vld [vmem:[%s5816_s19 + $0xc9] sm:$0x1]  ;;  %v908_v10 = vld [vmem:[%s5816_s19 + $0xd9] sm:$0x1]  ;;  %v943_v16 = vrot.slane %v905_v5, 6  ;;  %819 = vrot.lane.b32.xlu0 %v816_v11, %s5650_s29  ;;  %v586_v17 = vsel %vm8698_vm3, %v585_v61, %v584_v12  ;;  %v945_v18 = vrot.slane %v906_v8, 5 }
  0x6c   : > { %v909_v13 = vld [vmem:[%s5816_s19 + $0xe9] sm:$0x1]  ;;  %v910_v14 = vld [vmem:[%s5816_s19 + $0xf9] sm:$0x1]  ;;  %v947_v19 = vrot.slane %v907_v9, 4  ;;  %v949_v20 = vrot.slane %v908_v10, 3  ;;  %v588_v22 = vsel %vm309_vm4, %v587_v62, %v586_v17  ;;  %v942_v23 = vsel %vm297_vm0, %v941_v15, %v903_v63 }
  0x6d   : > { %v895_v21 = vld [vmem:[%s5816_s19 + $0x9] sm:$0x1]  ;;  %v951_v24 = vrot.slane %v909_v13, 2  ;;  %v953_v25 = vrot.slane %v910_v14, 1  ;;  %v896_v26 = vld [vmem:[%s5816_s19 + $0x19] sm:$0x1]  ;;  %v590_v28 = vsel %vm8697_vm5, %v589_v2, %v588_v22  ;;  %v944_v29 = vsel %vm8699_vm1, %v943_v16, %v942_v23 }
  0x6e   : > { %v897_v27 = vld [vmem:[%s5816_s19 + $0x29] sm:$0x1]  ;;  %v898_v30 = vld [vmem:[%s5816_s19 + $0x39] sm:$0x1]  ;;  %v592_v33 = vsel %vm315_vm6, %v591_v3, %v590_v28  ;;  %v946_v34 = vsel %vm303_vm2, %v945_v18, %v944_v29  ;;  %v927_v37 = vrot.slane %v896_v26, 7  ;;  %vm337_vm7 = vcmask 285848  }
  0x6f   : > { %v899_v31 = vld [vmem:[%s5816_s19 + $0x49] sm:$0x1]  ;;  %v900_v32 = vld [vmem:[%s5816_s19 + $0x59] sm:$0x1]  ;;  %v929_v38 = vrot.slane %v897_v27, 6  ;;  %607 = vrot.lane.b32.xlu2 %v592_v33, %s5646_s18  ;;  %v948_v39 = vsel %vm8698_vm3, %v947_v19, %v946_v34  ;;  %v931_v40 = vrot.slane %v898_v30, 5 }
  0x70   : > { %v901_v35 = vld [vmem:[%s5816_s19 + $0x69] sm:$0x1]  ;;  %v902_v36 = vld [vmem:[%s5816_s19 + $0x79] sm:$0x1]  ;;  %v933_v41 = vrot.slane %v899_v31, 4  ;;  %v935_v42 = vrot.slane %v900_v32, 3  ;;  %v950_v44 = vsel %vm309_vm4, %v949_v20, %v948_v39  ;;  %v928_v45 = vsel %vm297_vm0, %v927_v37, %v895_v21 }
  0x71   : > { %v624_v43 = vld [vmem:[%s5816_s19 + $0x85] sm:$0x1]  ;;  %v937_v46 = vrot.slane %v901_v35, 2  ;;  %v939_v47 = vrot.slane %v902_v36, 1  ;;  %v625_v48 = vld [vmem:[%s5816_s19 + $0x95] sm:$0x1]  ;;  %v952_v50 = vsel %vm8697_vm5, %v951_v24, %v950_v44  ;;  %v930_v51 = vsel %vm8699_vm1, %v929_v38, %v928_v45 }
  0x72   : > { %v626_v49 = vld [vmem:[%s5816_s19 + $0xa5] sm:$0x1]  ;;  %v627_v52 = vld [vmem:[%s5816_s19 + $0xb5] sm:$0x1]  ;;  %v954_v55 = vsel %vm315_vm6, %v953_v25, %v952_v50  ;;  %v932_v56 = vsel %vm303_vm2, %v931_v40, %v930_v51  ;;  %v662_v59 = vrot.slane %v625_v48, 7  ;;  %vm406_vm8 = vcmask 433448  }
  0x73   : > { %v628_v53 = vld [vmem:[%s5816_s19 + $0xc5] sm:$0x1]  ;;  %v629_v54 = vld [vmem:[%s5816_s19 + $0xd5] sm:$0x1]  ;;  %v664_v60 = vrot.slane %v626_v49, 6  ;;  %957 = vrot.lane.b32.xlu1 %v954_v55, %s5651_s9  ;;  %v934_v61 = vsel %vm8698_vm3, %v933_v41, %v932_v56  ;;  %v666_v62 = vrot.slane %v627_v52, 5 }
  0x74   : > { %v630_v57 = vld [vmem:[%s5816_s19 + $0xe5] sm:$0x1]  ;;  %v631_v58 = vld [vmem:[%s5816_s19 + $0xf5] sm:$0x1]  ;;  %v668_v63 = vrot.slane %v628_v53, 4  ;;  %v670_v0 = vrot.slane %v629_v54, 3  ;;  %v936_v2 = vsel %vm309_vm4, %v935_v42, %v934_v61  ;;  %v663_v3 = vsel %vm297_vm0, %v662_v59, %v624_v43 }
  0x75   : > { %v1033_v1 = vld [vmem:[%s5816_s19 + $0xb] sm:$0x1]  ;;  %v672_v4 = vrot.slane %v630_v57, 2  ;;  %v674_v5 = vrot.slane %v631_v58, 1  ;;  %v1034_v6 = vld [vmem:[%s5816_s19 + $0x1b] sm:$0x1]  ;;  %v938_v8 = vsel %vm8697_vm5, %v937_v46, %v936_v2  ;;  %v665_v9 = vsel %vm8699_vm1, %v664_v60, %v663_v3 }
  0x76   : > { %v1035_v7 = vld [vmem:[%s5816_s19 + $0x2b] sm:$0x1]  ;;  %v1036_v10 = vld [vmem:[%s5816_s19 + $0x3b] sm:$0x1]  ;;  %v940_v13 = vsel %vm315_vm6, %v939_v47, %v938_v8  ;;  %v667_v14 = vsel %vm303_vm2, %v666_v62, %v665_v9  ;;  %v1065_v17 = vrot.slane %v1034_v6, 7  ;;  %vm475_vm9 = vcmask 581048  }
  0x77   : > { %v1037_v11 = vld [vmem:[%s5816_s19 + $0x4b] sm:$0x1]  ;;  %v1038_v12 = vld [vmem:[%s5816_s19 + $0x5b] sm:$0x1]  ;;  %v1067_v18 = vrot.slane %v1035_v7, 6  ;;  %955 = vrot.lane.b32.xlu0 %v940_v13, %s5651_s9  ;;  %v669_v19 = vsel %vm8698_vm3, %v668_v63, %v667_v14  ;;  %v1069_v20 = vrot.slane %v1036_v10, 5 }
  0x78   : > { %v1039_v15 = vld [vmem:[%s5816_s19 + $0x6b] sm:$0x1]  ;;  %v1040_v16 = vld [vmem:[%s5816_s19 + $0x7b] sm:$0x1]  ;;  %v1071_v21 = vrot.slane %v1037_v11, 4  ;;  %v1073_v22 = vrot.slane %v1038_v12, 3  ;;  %v671_v24 = vsel %vm309_vm4, %v670_v0, %v669_v19  ;;  %v1066_v25 = vsel %vm297_vm0, %v1065_v17, %v1033_v1 }
  0x79   : > { %v972_v23 = vld [vmem:[%s5816_s19 + $0x8a] sm:$0x1]  ;;  %v1075_v26 = vrot.slane %v1039_v15, 2  ;;  %v1077_v27 = vrot.slane %v1040_v16, 1  ;;  %v973_v28 = vld [vmem:[%s5816_s19 + $0x9a] sm:$0x1]  ;;  %v673_v30 = vsel %vm8697_vm5, %v672_v4, %v671_v24  ;;  %v1068_v31 = vsel %vm8699_vm1, %v1067_v18, %v1066_v25 }
  0x7a   : > { %v974_v29 = vld [vmem:[%s5816_s19 + $0xaa] sm:$0x1]  ;;  %v975_v32 = vld [vmem:[%s5816_s19 + $0xba] sm:$0x1]  ;;  %v675_v35 = vsel %vm315_vm6, %v674_v5, %v673_v30  ;;  %v1070_v36 = vsel %vm303_vm2, %v1069_v20, %v1068_v31  ;;  %v1010_v39 = vrot.slane %v973_v28, 7  ;;  %vm544_vm10 = vcmask 728648  }
  0x7b   : > { %v976_v33 = vld [vmem:[%s5816_s19 + $0xca] sm:$0x1]  ;;  %v977_v34 = vld [vmem:[%s5816_s19 + $0xda] sm:$0x1]  ;;  %v1012_v40 = vrot.slane %v974_v29, 6  ;;  %678 = vrot.lane.b32.xlu2 %v675_v35, %s5645_s17  ;;  %v1072_v41 = vsel %vm8698_vm3, %v1071_v21, %v1070_v36  ;;  %v1014_v42 = vrot.slane %v975_v32, 5 }
  0x7c   : > { %v978_v37 = vld [vmem:[%s5816_s19 + $0xea] sm:$0x1]  ;;  %v979_v38 = vld [vmem:[%s5816_s19 + $0xfa] sm:$0x1]  ;;  %v1016_v43 = vrot.slane %v976_v33, 4  ;;  %v1018_v44 = vrot.slane %v977_v34, 3  ;;  %v1074_v46 = vsel %vm309_vm4, %v1073_v22, %v1072_v41  ;;  %v1011_v47 = vsel %vm297_vm0, %v1010_v39, %v972_v23 }
  0x7d   : > { %v757_v45 = vld [vmem:[%s5816_s19 + $0x7] sm:$0x1]  ;;  %v1020_v48 = vrot.slane %v978_v37, 2  ;;  %v1022_v49 = vrot.slane %v979_v38, 1  ;;  %v758_v50 = vld [vmem:[%s5816_s19 + $0x17] sm:$0x1]  ;;  %v1076_v52 = vsel %vm8697_vm5, %v1075_v26, %v1074_v46  ;;  %v1013_v53 = vsel %vm8699_vm1, %v1012_v40, %v1011_v47 }
  0x7e   : > { %v759_v51 = vld [vmem:[%s5816_s19 + $0x27] sm:$0x1]  ;;  %v760_v54 = vld [vmem:[%s5816_s19 + $0x37] sm:$0x1]  ;;  %v1078_v57 = vsel %vm315_vm6, %v1077_v27, %v1076_v52  ;;  %v1015_v58 = vsel %vm303_vm2, %v1014_v42, %v1013_v53  ;;  %v789_v61 = vrot.slane %v758_v50, 7  ;;  %vm613_vm11 = vcmask 876248  }
  0x7f   : > { %v761_v55 = vld [vmem:[%s5816_s19 + $0x47] sm:$0x1]  ;;  %v762_v56 = vld [vmem:[%s5816_s19 + $0x57] sm:$0x1]  ;;  %v791_v62 = vrot.slane %v759_v51, 6  ;;  %1093 = vrot.lane.b32.xlu1 %v1078_v57, %s5652_s10  ;;  %v1017_v63 = vsel %vm8698_vm3, %v1016_v43, %v1015_v58  ;;  %v793_v0 = vrot.slane %v760_v54, 5 }
  0x80   : > { %v763_v59 = vld [vmem:[%s5816_s19 + $0x67] sm:$0x1]  ;;  %v764_v60 = vld [vmem:[%s5816_s19 + $0x77] sm:$0x1]  ;;  %v795_v1 = vrot.slane %v761_v55, 4  ;;  %v797_v2 = vrot.slane %v762_v56, 3  ;;  %v1019_v4 = vsel %vm309_vm4, %v1018_v44, %v1017_v63  ;;  %v790_v5 = vsel %vm297_vm0, %v789_v61, %v757_v45 }
  0x81   : > { %v1110_v3 = vld [vmem:[%s5816_s19 + $0x8c] sm:$0x1]  ;;  %v799_v6 = vrot.slane %v763_v59, 2  ;;  %v801_v7 = vrot.slane %v764_v60, 1  ;;  %v1111_v8 = vld [vmem:[%s5816_s19 + $0x9c] sm:$0x1]  ;;  %v1021_v10 = vsel %vm8697_vm5, %v1020_v48, %v1019_v4  ;;  %v792_v11 = vsel %vm8699_vm1, %v791_v62, %v790_v5 }
  0x82   : > { %v1112_v9 = vld [vmem:[%s5816_s19 + $0xac] sm:$0x1]  ;;  %v1113_v12 = vld [vmem:[%s5816_s19 + $0xbc] sm:$0x1]  ;;  %v1023_v15 = vsel %vm315_vm6, %v1022_v49, %v1021_v10  ;;  %v794_v16 = vsel %vm303_vm2, %v793_v0, %v792_v11  ;;  %v1148_v19 = vrot.slane %v1111_v8, 7  ;;  %vm682_vm12 = vcmask 1023848  }
  0x83   : > { %v1114_v13 = vld [vmem:[%s5816_s19 + $0xcc] sm:$0x1]  ;;  %v1115_v14 = vld [vmem:[%s5816_s19 + $0xdc] sm:$0x1]  ;;  %v1150_v20 = vrot.slane %v1112_v9, 6  ;;  %1026 = vrot.lane.b32.xlu0 %v1023_v15, %s5653_s8  ;;  %v796_v21 = vsel %vm8698_vm3, %v795_v1, %v794_v16  ;;  %v1152_v22 = vrot.slane %v1113_v12, 5 }
  0x84   : > { %v1116_v17 = vld [vmem:[%s5816_s19 + $0xec] sm:$0x1]  ;;  %v1117_v18 = vld [vmem:[%s5816_s19 + $0xfc] sm:$0x1]  ;;  %v1154_v23 = vrot.slane %v1114_v13, 4  ;;  %v1156_v24 = vrot.slane %v1115_v14, 3  ;;  %v798_v26 = vsel %vm309_vm4, %v797_v2, %v796_v21  ;;  %v1149_v27 = vsel %vm297_vm0, %v1148_v19, %v1110_v3 }
  0x85   : > { %v1102_v25 = vld [vmem:[%s5816_s19 + $0xc] sm:$0x1]  ;;  %v1158_v28 = vrot.slane %v1116_v17, 2  ;;  %v1160_v29 = vrot.slane %v1117_v18, 1  ;;  %v1103_v30 = vld [vmem:[%s5816_s19 + $0x1c] sm:$0x1]  ;;  %v800_v32 = vsel %vm8697_vm5, %v799_v6, %v798_v26  ;;  %v1151_v33 = vsel %vm8699_vm1, %v1150_v20, %v1149_v27 }
  0x86   : > { %v1104_v31 = vld [vmem:[%s5816_s19 + $0x2c] sm:$0x1]  ;;  %v1105_v34 = vld [vmem:[%s5816_s19 + $0x3c] sm:$0x1]  ;;  %v802_v37 = vsel %vm315_vm6, %v801_v7, %v800_v32  ;;  %v1153_v38 = vsel %vm303_vm2, %v1152_v22, %v1151_v33  ;;  %v1134_v41 = vrot.slane %v1103_v30, 7  ;;  %vm753_vm13 = vcmask 121856  }
  0x87   : > { %v1106_v35 = vld [vmem:[%s5816_s19 + $0x4c] sm:$0x1]  ;;  %v1107_v36 = vld [vmem:[%s5816_s19 + $0x5c] sm:$0x1]  ;;  %v1136_v42 = vrot.slane %v1104_v31, 6  ;;  %817 = vrot.lane.b32.xlu2 %v802_v37, %s5650_s29  ;;  %v1155_v43 = vsel %vm8698_vm3, %v1154_v23, %v1153_v38  ;;  %v1138_v44 = vrot.slane %v1105_v34, 5 }
  0x88   : > { %v1108_v39 = vld [vmem:[%s5816_s19 + $0x6c] sm:$0x1]  ;;  %v1109_v40 = vld [vmem:[%s5816_s19 + $0x7c] sm:$0x1]  ;;  %v1140_v45 = vrot.slane %v1106_v35, 4  ;;  %v1142_v46 = vrot.slane %v1107_v36, 3  ;;  %v1157_v48 = vsel %vm309_vm4, %v1156_v24, %v1155_v43  ;;  %v1135_v49 = vsel %vm297_vm0, %v1134_v41, %v1102_v25 }
  0x89   : > { %v834_v47 = vld [vmem:[%s5816_s19 + $0x88] sm:$0x1]  ;;  %v1144_v50 = vrot.slane %v1108_v39, 2  ;;  %v1146_v51 = vrot.slane %v1109_v40, 1  ;;  %v835_v52 = vld [vmem:[%s5816_s19 + $0x98] sm:$0x1]  ;;  %v1159_v54 = vsel %vm8697_vm5, %v1158_v28, %v1157_v48  ;;  %v1137_v55 = vsel %vm8699_vm1, %v1136_v42, %v1135_v49 }
  0x8a   : > { %v836_v53 = vld [vmem:[%s5816_s19 + $0xa8] sm:$0x1]  ;;  %v837_v56 = vld [vmem:[%s5816_s19 + $0xb8] sm:$0x1]  ;;  %v1161_v59 = vsel %vm315_vm6, %v1160_v29, %v1159_v54  ;;  %v1139_v60 = vsel %vm303_vm2, %v1138_v44, %v1137_v55  ;;  %v872_v63 = vrot.slane %v835_v52, 7  ;;  %vm751_vm14 = vcmask 1048568  }
  0x8b   : > { %v838_v57 = vld [vmem:[%s5816_s19 + $0xc8] sm:$0x1]  ;;  %v839_v58 = vld [vmem:[%s5816_s19 + $0xd8] sm:$0x1]  ;;  %v874_v0 = vrot.slane %v836_v53, 6  ;;  %1164 = vrot.lane.b32.xlu1 %v1161_v59, %s5654_s11  ;;  %v1141_v1 = vsel %vm8698_vm3, %v1140_v45, %v1139_v60  ;;  %v876_v2 = vrot.slane %v837_v56, 5 }
  0x8c   : > { %v840_v61 = vld [vmem:[%s5816_s19 + $0xe8] sm:$0x1]  ;;  %v841_v62 = vld [vmem:[%s5816_s19 + $0xf8] sm:$0x1]  ;;  %v878_v3 = vrot.slane %v838_v57, 4  ;;  %v880_v4 = vrot.slane %v839_v58, 3  ;;  %v1143_v6 = vsel %vm309_vm4, %v1142_v46, %v1141_v1  ;;  %v873_v7 = vsel %vm297_vm0, %v872_v63, %v834_v47 }
  0x8d   : > { %v1243_v5 = vld [vmem:[%s5816_s19 + $0xe] sm:$0x1]  ;;  %v882_v8 = vrot.slane %v840_v61, 2  ;;  %v884_v9 = vrot.slane %v841_v62, 1  ;;  %v1244_v10 = vld [vmem:[%s5816_s19 + $0x1e] sm:$0x1]  ;;  %v1145_v12 = vsel %vm8697_vm5, %v1144_v50, %v1143_v6  ;;  %v875_v13 = vsel %vm8699_vm1, %v874_v0, %v873_v7 }
  0x8e   : > { %v1245_v11 = vld [vmem:[%s5816_s19 + $0x2e] sm:$0x1]  ;;  %v1246_v14 = vld [vmem:[%s5816_s19 + $0x3e] sm:$0x1]  ;;  %v1147_v17 = vsel %vm315_vm6, %v1146_v51, %v1145_v12  ;;  %v877_v18 = vsel %vm303_vm2, %v876_v2, %v875_v13  ;;  %v1275_v21 = vrot.slane %v1244_v10, 7  ;;  %vm823_vm15 = vcmask 269448  }
  0x8f   : > { %v1247_v15 = vld [vmem:[%s5816_s19 + $0x4e] sm:$0x1]  ;;  %v1248_v16 = vld [vmem:[%s5816_s19 + $0x5e] sm:$0x1]  ;;  %v1277_v22 = vrot.slane %v1245_v11, 6  ;;  %1162 = vrot.lane.b32.xlu0 %v1147_v17, %s5654_s11  ;;  %v879_v23 = vsel %vm8698_vm3, %v878_v3, %v877_v18  ;;  %v1279_v24 = vrot.slane %v1246_v14, 5 }
  0x90   : > { %v1249_v19 = vld [vmem:[%s5816_s19 + $0x6e] sm:$0x1]  ;;  %v1250_v20 = vld [vmem:[%s5816_s19 + $0x7e] sm:$0x1]  ;;  %v1281_v25 = vrot.slane %v1247_v15, 4  ;;  %v1283_v26 = vrot.slane %v1248_v16, 3  ;;  %v881_v28 = vsel %vm309_vm4, %v880_v4, %v879_v23  ;;  %v1276_v29 = vsel %vm297_vm0, %v1275_v21, %v1243_v5 }
  0x91   : > { %v1179_v27 = vld [vmem:[%s5816_s19 + $0x8d] sm:$0x1]  ;;  %v1285_v30 = vrot.slane %v1249_v19, 2  ;;  %v1287_v31 = vrot.slane %v1250_v20, 1  ;;  %v1180_v32 = vld [vmem:[%s5816_s19 + $0x9d] sm:$0x1]  ;;  %v883_v34 = vsel %vm8697_vm5, %v882_v8, %v881_v28  ;;  %v1278_v35 = vsel %vm8699_vm1, %v1277_v22, %v1276_v29 }
  0x92   : > { %v1181_v33 = vld [vmem:[%s5816_s19 + $0xad] sm:$0x1]  ;;  %v1182_v36 = vld [vmem:[%s5816_s19 + $0xbd] sm:$0x1]  ;;  %v885_v39 = vsel %vm315_vm6, %v884_v9, %v883_v34  ;;  %v1280_v40 = vsel %vm303_vm2, %v1279_v24, %v1278_v35  ;;  %v1217_v43 = vrot.slane %v1180_v32, 7  ;;  %s5660_s14 = smov 8  }
  0x93   : > { %v1183_v37 = vld [vmem:[%s5816_s19 + $0xcd] sm:$0x1]  ;;  %v1184_v38 = vld [vmem:[%s5816_s19 + $0xdd] sm:$0x1]  ;;  %v1219_v44 = vrot.slane %v1181_v33, 6  ;;  %888 = vrot.lane.b32.xlu2 %v885_v39, %s5649_s27  ;;  %v1282_v45 = vsel %vm8698_vm3, %v1281_v25, %v1280_v40  ;;  %v1221_v46 = vrot.slane %v1182_v36, 5 }
  0x94   : > { %v1185_v41 = vld [vmem:[%s5816_s19 + $0xed] sm:$0x1]  ;;  %v1186_v42 = vld [vmem:[%s5816_s19 + $0xfd] sm:$0x1]  ;;  %v1223_v47 = vrot.slane %v1183_v37, 4  ;;  %v1225_v48 = vrot.slane %v1184_v38, 3  ;;  %v1284_v50 = vsel %vm309_vm4, %v1283_v26, %v1282_v45  ;;  %v1218_v51 = vsel %vm297_vm0, %v1217_v43, %v1179_v27 }
  0x95   : > { %v964_v49 = vld [vmem:[%s5816_s19 + $0xa] sm:$0x1]  ;;  %v1227_v52 = vrot.slane %v1185_v41, 2  ;;  %v1229_v53 = vrot.slane %v1186_v42, 1  ;;  %v965_v54 = vld [vmem:[%s5816_s19 + $0x1a] sm:$0x1]  ;;  %v1286_v56 = vsel %vm8697_vm5, %v1285_v30, %v1284_v50  ;;  %v1220_v57 = vsel %vm8699_vm1, %v1219_v44, %v1218_v51 }
  0x96   : > { %v966_v55 = vld [vmem:[%s5816_s19 + $0x2a] sm:$0x1]  ;;  %v967_v58 = vld [vmem:[%s5816_s19 + $0x3a] sm:$0x1]  ;;  %v1288_v61 = vsel %vm315_vm6, %v1287_v31, %v1286_v56  ;;  %v1222_v62 = vsel %vm303_vm2, %v1221_v46, %v1220_v57  ;;  %v996_v1 = vrot.slane %v965_v54, 7  ;;  %s5661_s16 = smov 68  }
  0x97   : > { %v968_v59 = vld [vmem:[%s5816_s19 + $0x4a] sm:$0x1]  ;;  %v969_v60 = vld [vmem:[%s5816_s19 + $0x5a] sm:$0x1]  ;;  %v998_v2 = vrot.slane %v966_v55, 6  ;;  %1303 = vrot.lane.b32.xlu1 %v1288_v61, %s5655_s13  ;;  %v1224_v3 = vsel %vm8698_vm3, %v1223_v47, %v1222_v62  ;;  %v1000_v4 = vrot.slane %v967_v58, 5 }
  0x98   : > { %v970_v63 = vld [vmem:[%s5816_s19 + $0x6a] sm:$0x1]  ;;  %v971_v0 = vld [vmem:[%s5816_s19 + $0x7a] sm:$0x1]  ;;  %v1002_v5 = vrot.slane %v968_v59, 4  ;;  %v1004_v6 = vrot.slane %v969_v60, 3  ;;  %v1226_v8 = vsel %vm309_vm4, %v1225_v48, %v1224_v3  ;;  %v997_v9 = vsel %vm297_vm0, %v996_v1, %v964_v49 }
  0x99   : > { %v1320_v7 = vld [vmem:[%s5816_s19 + $0x8f] sm:$0x1]  ;;  %v1006_v10 = vrot.slane %v970_v63, 2  ;;  %v1008_v11 = vrot.slane %v971_v0, 1  ;;  %v1321_v12 = vld [vmem:[%s5816_s19 + $0x9f] sm:$0x1]  ;;  %v1228_v14 = vsel %vm8697_vm5, %v1227_v52, %v1226_v8  ;;  %v999_v15 = vsel %vm8699_vm1, %v998_v2, %v997_v9 }
  0x9a   : > { %v1322_v13 = vld [vmem:[%s5816_s19 + $0xaf] sm:$0x1]  ;;  %v1323_v16 = vld [vmem:[%s5816_s19 + $0xbf] sm:$0x1]  ;;  %v1230_v19 = vsel %vm315_vm6, %v1229_v53, %v1228_v14  ;;  %v1001_v20 = vsel %vm303_vm2, %v1000_v4, %v999_v15  ;;  %v1358_v23 = vrot.slane %v1321_v12, 7  ;;  %s8702_s24 = smov 24  }
  0x9b   : > { %v1324_v17 = vld [vmem:[%s5816_s19 + $0xcf] sm:$0x1]  ;;  %v1325_v18 = vld [vmem:[%s5816_s19 + $0xdf] sm:$0x1]  ;;  %v1360_v24 = vrot.slane %v1322_v13, 6  ;;  %1233 = vrot.lane.b32.xlu0 %v1230_v19, %s5656_s15  ;;  %v1003_v25 = vsel %vm8698_vm3, %v1002_v5, %v1001_v20  ;;  %v1362_v26 = vrot.slane %v1323_v16, 5 }
  0x9c   : > { %v1326_v21 = vld [vmem:[%s5816_s19 + $0xef] sm:$0x1]  ;;  %v1327_v22 = vld [vmem:[%s5816_s19 + $0xff] sm:$0x1]  ;;  %v1364_v27 = vrot.slane %v1324_v17, 4  ;;  %v1366_v28 = vrot.slane %v1325_v18, 3  ;;  %v1005_v30 = vsel %vm309_vm4, %v1004_v6, %v1003_v25  ;;  %v1359_v31 = vsel %vm297_vm0, %v1358_v23, %v1320_v7 }
  0x9d   : > { %v1312_v29 = vld [vmem:[%s5816_s19 + $0xf] sm:$0x1]  ;;  %v1368_v32 = vrot.slane %v1326_v21, 2  ;;  %v1370_v33 = vrot.slane %v1327_v22, 1  ;;  %v1313_v34 = vld [vmem:[%s5816_s19 + $0x1f] sm:$0x1]  ;;  %v1007_v36 = vsel %vm8697_vm5, %v1006_v10, %v1005_v30  ;;  %v1361_v37 = vsel %vm8699_vm1, %v1360_v24, %v1359_v31 }
  0x9e   : > { %v1314_v35 = vld [vmem:[%s5816_s19 + $0x2f] sm:$0x1]  ;;  %v1315_v38 = vld [vmem:[%s5816_s19 + $0x3f] sm:$0x1]  ;;  %v1009_v41 = vsel %vm315_vm6, %v1008_v11, %v1007_v36  ;;  %v1363_v42 = vsel %vm303_vm2, %v1362_v26, %v1361_v37  ;;  %v1344_v45 = vrot.slane %v1313_v34, 7  ;;  %s5663_s27 = smov 84  }
  0x9f   : > { %v1316_v39 = vld [vmem:[%s5816_s19 + $0x4f] sm:$0x1]  ;;  %v1317_v40 = vld [vmem:[%s5816_s19 + $0x5f] sm:$0x1]  ;;  %v1346_v46 = vrot.slane %v1314_v35, 6  ;;  %1024 = vrot.lane.b32.xlu2 %v1009_v41, %s5653_s8  ;;  %v1365_v47 = vsel %vm8698_vm3, %v1364_v27, %v1363_v42  ;;  %v1348_v48 = vrot.slane %v1315_v38, 5 }
  0xa0   : > { %v1318_v43 = vld [vmem:[%s5816_s19 + $0x6f] sm:$0x1]  ;;  %v1319_v44 = vld [vmem:[%s5816_s19 + $0x7f] sm:$0x1]  ;;  %v1350_v49 = vrot.slane %v1316_v39, 4  ;;  %v1352_v50 = vrot.slane %v1317_v40, 3  ;;  %v1367_v52 = vsel %vm309_vm4, %v1366_v28, %v1365_v47  ;;  %v1345_v53 = vsel %vm297_vm0, %v1344_v45, %v1312_v29 }
  0xa1   : > { %v1041_v51 = vld [vmem:[%s5816_s19 + $0x8b] sm:$0x1]  ;;  %v1354_v54 = vrot.slane %v1318_v43, 2  ;;  %v1356_v55 = vrot.slane %v1319_v44, 1  ;;  %v1042_v56 = vld [vmem:[%s5816_s19 + $0x9b] sm:$0x1]  ;;  %v1369_v58 = vsel %vm8697_vm5, %v1368_v32, %v1367_v52  ;;  %v1347_v59 = vsel %vm8699_vm1, %v1346_v46, %v1345_v53 }
  0xa2   : > { %v1043_v57 = vld [vmem:[%s5816_s19 + $0xab] sm:$0x1]  ;;  %v1044_v60 = vld [vmem:[%s5816_s19 + $0xbb] sm:$0x1]  ;;  %v1371_v63 = vsel %vm315_vm6, %v1370_v33, %v1369_v58  ;;  %v1349_v0 = vsel %vm303_vm2, %v1348_v48, %v1347_v59  ;;  %v1079_v3 = vrot.slane %v1042_v56, 7  ;;  %v5658_v59 = vmov 0.0  }
  0xa3   : > { %v1045_v61 = vld [vmem:[%s5816_s19 + $0xcb] sm:$0x1]  ;;  %v1046_v62 = vld [vmem:[%s5816_s19 + $0xdb] sm:$0x1]  ;;  %v1081_v4 = vrot.slane %v1043_v57, 6  ;;  %1374 = vrot.lane.b32.xlu1 %v1371_v63, %s5657_s30  ;;  %v1351_v5 = vsel %vm8698_vm3, %v1350_v49, %v1349_v0  ;;  %v1083_v6 = vrot.slane %v1044_v60, 5 }
  0xa4   : > { %v1047_v1 = vld [vmem:[%s5816_s19 + $0xeb] sm:$0x1]  ;;  %v1048_v2 = vld [vmem:[%s5816_s19 + $0xfb] sm:$0x1]  ;;  %v1085_v7 = vrot.slane %v1045_v61, 4  ;;  %v1087_v8 = vrot.slane %v1046_v62, 3  ;;  %v1353_v10 = vsel %vm309_vm4, %v1352_v50, %v1351_v5  ;;  %v1080_v11 = vsel %vm297_vm0, %v1079_v3, %v1041_v51 }
  0xa5   : > { %v1171_v9 = vld [vmem:[%s5816_s19 + $0xd] sm:$0x1]  ;;  %v1089_v12 = vrot.slane %v1047_v1, 2  ;;  %v1091_v13 = vrot.slane %v1048_v2, 1  ;;  %v1172_v14 = vld [vmem:[%s5816_s19 + $0x1d] sm:$0x1]  ;;  %v1355_v16 = vsel %vm8697_vm5, %v1354_v54, %v1353_v10  ;;  %v1082_v17 = vsel %vm8699_vm1, %v1081_v4, %v1080_v11 }
  0xa6   : > { %v1173_v15 = vld [vmem:[%s5816_s19 + $0x2d] sm:$0x1]  ;;  %v1174_v18 = vld [vmem:[%s5816_s19 + $0x3d] sm:$0x1]  ;;  %v1357_v21 = vsel %vm315_vm6, %v1356_v55, %v1355_v16  ;;  %v1084_v22 = vsel %vm303_vm2, %v1083_v6, %v1082_v17  ;;  %v1203_v24 = vrot.slane %v1172_v14, 7  ;;  %247 = vst [vmem:[#allocation2] sm:$0xff] %v5658_v59 }
  0xa7   : > { %v1175_v19 = vld [vmem:[%s5816_s19 + $0x4d] sm:$0x1]  ;;  %v1176_v20 = vld [vmem:[%s5816_s19 + $0x5d] sm:$0x1]  ;;  %v1205_v25 = vrot.slane %v1173_v15, 6  ;;  %1372 = vrot.lane.b32.xlu0 %v1357_v21, %s5657_s30  ;;  %v1086_v26 = vsel %vm8698_vm3, %v1085_v7, %v1084_v22  ;;  %v1207_v28 = vrot.slane %v1174_v18, 5 }
  0xa8   : > { %v1177_v23 = vld [vmem:[%s5816_s19 + $0x6d] sm:$0x1]  ;;  %v1178_v27 = vld [vmem:[%s5816_s19 + $0x7d] sm:$0x1]  ;;  %v1209_v29 = vrot.slane %v1175_v19, 4  ;;  %v1211_v30 = vrot.slane %v1176_v20, 3  ;;  %v1088_v31 = vsel %vm309_vm4, %v1087_v8, %v1086_v26  ;;  %v1204_v32 = vsel %vm297_vm0, %v1203_v24, %v1171_v9 }
  0xa9   : > { %v1251_v33 = vld [vmem:[%s5816_s19 + $0x8e] sm:$0x1]  ;;  %v1252_v34 = vld [vmem:[%s5816_s19 + $0x9e] sm:$0x1]  ;;  %v1090_v36 = vsel %vm8697_vm5, %v1089_v12, %v1088_v31  ;;  %v1206_v37 = vsel %vm8699_vm1, %v1205_v25, %v1204_v32  ;;  %v1213_v38 = vrot.slane %v1177_v23, 2  ;;  %v401_v41 = vpop.permute.xlu1 %400  ;;  %v1215_v51 = vrot.slane %v1178_v27, 1 }
  0xaa   : > { %v1253_v35 = vld [vmem:[%s5816_s19 + $0xae] sm:$0x1]  ;;  %v1254_v39 = vld [vmem:[%s5816_s19 + $0xbe] sm:$0x1]  ;;  %v1092_v42 = vsel %vm315_vm6, %v1091_v13, %v1090_v36  ;;  %v1208_v43 = vsel %vm303_vm2, %v1207_v28, %v1206_v37  ;;  %v1289_v44 = vrot.slane %v1252_v34, 7  ;;  %248 = vst [vmem:[#allocation2 + $0x8] sm:$0xff] %v5658_v59 }
  0xab   : > { %v1255_v40 = vld [vmem:[%s5816_s19 + $0xce] sm:$0x1]  ;;  %v1291_v45 = vrot.slane %v1253_v35, 6  ;;  %1095 = vrot.lane.b32.xlu2 %v1092_v42, %s5652_s10  ;;  %v1210_v46 = vsel %vm8698_vm3, %v1209_v29, %v1208_v43  ;;  %v1256_v47 = vld [vmem:[%s5816_s19 + $0xde] sm:$0x1]  ;;  %v1293_v48 = vrot.slane %v1254_v39, 5 }
  0xac   : > { %v1295_v49 = vrot.slane %v1255_v40, 4  ;;  %v1212_v50 = vsel %vm309_vm4, %v1211_v30, %v1210_v46  ;;  %v1290_v52 = vsel %vm297_vm0, %v1289_v44, %v1251_v33  ;;  %v1257_v56 = vld [vmem:[%s5816_s19 + $0xee] sm:$0x1]  ;;  %v1297_v58 = vrot.slane %v1256_v47, 3  ;;  %v1258_v62 = vld [vmem:[%s5816_s19 + $0xfe] sm:$0x1] }
  0xad   : > { %v1214_v53 = vsel %vm8697_vm5, %v1213_v38, %v1212_v50  ;;  %v1292_v54 = vsel %vm8699_vm1, %v1291_v45, %v1290_v52  ;;  %v332_v55 = vpop.permute.xlu0 %331  ;;  %v1299_v63 = vrot.slane %v1257_v56, 2  ;;  %251 = vst [vmem:[#allocation2 + $0x18] sm:$0xff] %v5658_v59  ;;  %v1301_v3 = vrot.slane %v1258_v62, 1  ;;  %s5659_s19 = smov 76   ;;  %s5664_s29 = smov 16  }
  0xae   : > { %v1294_v57 = vsel %vm303_vm2, %v1293_v48, %v1292_v54  ;;  %338 = vst.msk [vmem:[#allocation2] sm:$0xff] %vm337_vm7, %v332_v55  ;;  %v1216_v61 = vsel %vm315_vm6, %v1215_v51, %v1214_v53  ;;  %vm892_vm0 = vcmask 417048   ;;  %vm961_vm2 = vcmask 564648   ;;  %s5665_s9 = smov 100   ;;  %s5666_s10 = smov 32  }
  0xaf   : > { %v1296_v60 = vsel %vm8698_vm3, %v1295_v49, %v1294_v57  ;;  %252 = vst [vmem:[#allocation2 + $0x20] sm:$0xff] %v5658_v59  ;;  %s5667_s8 = smov 92   ;;  %s5668_s11 = smov 48   ;;  %v259_v50 = vlaneseq }
  0xb0   : > { %v1298_v1 = vsel %vm309_vm4, %v1297_v58, %v1296_v60  ;;  %254 = vst [vmem:[#allocation3] sm:$0xff] %v5658_v59  ;;  %vm249_vm4 = vcmask 556032   ;;  %s5671_s30 = smov 124  }
  0xb1   : > { %v403_v0 = vpop.permute.xlu1 %402  ;;  %v470_v2 = vpop.permute.xlu2 %469  ;;  %255 = vst [vmem:[#allocation3 + $0x8] sm:$0xff] %v5658_v59  ;;  %v1300_v4 = vsel %vm8697_vm5, %v1299_v63, %v1298_v1 }
  0xb2   : > { %256 = vst [vmem:[#allocation3 + $0x10] sm:$0xff] %v5658_v59  ;;  %v1302_v6 = vsel %vm315_vm6, %v1301_v3, %v1300_v4  ;;  %vm1030_vm6 = vcmask 712248  }
  0xb3   : > { %1231 = vrot.lane.b32.xlu2 %v1216_v61, %s5656_s15  ;;  %257 = vst [vmem:[#allocation3 + $0x18] sm:$0xff] %v5658_v59  ;;  %s5670_s15 = smov 40  }
  0xb4   : > { %258 = vst [vmem:[#allocation3 + $0x20] sm:$0xff] %v5658_v59 }
  0xb5   : > { %v334_v5 = vpop.permute.xlu0 %333  ;;  %407 = vst.msk [vmem:[#allocation2] sm:$0xff] %vm406_vm8, %v401_v41 }
  0xb6   : > { %476 = vst.msk [vmem:[#allocation2] sm:$0xff] %vm475_vm9, %v470_v2 }
  0xb7   : > { %339 = vst.msk [vmem:[#allocation2 + $0x18] sm:$0xff] %vm337_vm7, %v334_v5  ;;  %vm1099_vm7 = vcmask 859848  }
  0xb8   : > { %408 = vst.msk [vmem:[#allocation2 + $0x18] sm:$0xff] %vm406_vm8, %v403_v0  ;;  %vm1168_vm8 = vcmask 1007448  }
  0xb9   : > { %v541_v7 = vpop.permute.xlu1 %540  ;;  %250 = vst.msk [vmem:[#allocation2 + $0x10] sm:$0xff] %vm249_vm4, %v5658_v59 }
  0xba   : > { %253 = vst.msk [vmem:[#allocation2 + $0x28] sm:$0xff] %vm249_vm4, %v5658_v59 }
  0xbb   : > { %1305 = vrot.lane.b32.xlu2 %v1302_v6, %s5655_s13  ;;  %s5669_s13 = smov 108  }
  0xbd   : > { %v472_v8 = vpop.permute.xlu2 %471  ;;  %v539_v9 = vpop.permute.xlu0 %538 }
  0xbe   : > { %477 = vst.msk [vmem:[#allocation2 + $0x18] sm:$0xff] %vm475_vm9, %v472_v8  ;;  %vm1237_vm9 = vcmask 1048552  }
  0xbf   : > { %546 = vst.msk [vmem:[#allocation2 + $0x18] sm:$0xff] %vm544_vm10, %v541_v7 }
  0xc0   : > { %545 = vst.msk [vmem:[#allocation2] sm:$0xff] %vm544_vm10, %v539_v9  ;;  %vm1309_vm10 = vcmask 253048  }
  0xc1   : > { %v677_v10 = vpop.permute.xlu1 %676 }
  0xc5   : > { %v610_v11 = vpop.permute.xlu0 %609 }
  0xc6   : > { %615 = vst.msk [vmem:[#allocation2 + $0x18] sm:$0xff] %vm613_vm11, %v610_v11 }
  0xc9   : > { %v608_v12 = vpop.permute.xlu2 %607 }
  0xca   : > { %614 = vst.msk [vmem:[#allocation2] sm:$0xff] %vm613_vm11, %v608_v12  ;;  %vm1239_vm11 = vcmask 105472  }
  0xcb   : > { %683 = vst.msk [vmem:[#allocation2] sm:$0xff] %vm682_vm12, %v677_v10 }
  0xcd   : > { %v748_v13 = vpop.permute.xlu1 %747 }
  0xce   : > { %756 = vst.msk [vmem:[#allocation2 + $0x20] sm:$0xff] %vm753_vm13, %v748_v13 }
  0xd1   : > { %v746_v14 = vpop.permute.xlu0 %745 }
  0xd2   : > { %752 = vst.msk [vmem:[#allocation2] sm:$0xff] %vm751_vm14, %v746_v14 }
  0xd3   : > { %754 = vst.msk [vmem:[#allocation2 + $0x8] sm:$0xff] %vm753_vm13, %v746_v14  ;;  %vm1388_vm13 = vcmp.ge.s32.totalorder %v259_v50, 68 }
  0xd5   : > { %v679_v15 = vpop.permute.xlu2 %678 }
  0xd6   : > { %684 = vst.msk [vmem:[#allocation2 + $0x18] sm:$0xff] %vm682_vm12, %v679_v15  ;;  %vm1378_vm12 = vcmask 400648  }
  0xd7   : > { %755 = vst.msk [vmem:[#allocation2 + $0x18] sm:$0xff] %vm751_vm14, %v748_v13  ;;  %vm1389_vm14 = vcmp.lt.s32.totalorder %v259_v50, 392 }
  0xd9   : > { %v887_v18 = vpop.permute.xlu1 %886 }
  0xdd   : > { %v820_v16 = vpop.permute.xlu0 %819 }
  0xde   : > { %825 = vst.msk [vmem:[#allocation2 + $0x20] sm:$0xff] %vm823_vm15, %v820_v16 }
  0xe1   : > { %v818_v17 = vpop.permute.xlu2 %817 }
  0xe2   : > { %824 = vst.msk [vmem:[#allocation2 + $0x8] sm:$0xff] %vm823_vm15, %v818_v17  ;;  %vm1390_vm15 = vmand %vm1388_vm13, %vm1389_vm14 }
  0xe3   : > { %893 = vst.msk [vmem:[#allocation2 + $0x8] sm:$0xff] %vm892_vm0, %v887_v18 }
  0xe5   : > { %v958_v21 = vpop.permute.xlu1 %957 }
  0xe9   : > { %v956_v19 = vpop.permute.xlu0 %955 }
  0xea   : > { %962 = vst.msk [vmem:[#allocation2 + $0x8] sm:$0xff] %vm961_vm2, %v956_v19 }
  0xed   : > { %v889_v20 = vpop.permute.xlu2 %888 }
  0xee   : > { %894 = vst.msk [vmem:[#allocation2 + $0x20] sm:$0xff] %vm892_vm0, %v889_v20  ;;  %vm6351_vm0 = vcmp.ge.s32.totalorder %v259_v50, 8 }
  0xef   : > { %963 = vst.msk [vmem:[#allocation2 + $0x20] sm:$0xff] %vm961_vm2, %v958_v21  ;;  %vm6356_vm2 = vcmp.lt.s32.totalorder %v259_v50, 332 }
  0xf1   : > { %v1094_v23 = vpop.permute.xlu1 %1093 }
  0xf5   : > { %v1027_v22 = vpop.permute.xlu0 %1026 }
  0xf6   : > { %1032 = vst.msk [vmem:[#allocation2 + $0x20] sm:$0xff] %vm1030_vm6, %v1027_v22 }
  0xf9   : > { %v1025_v24 = vpop.permute.xlu2 %1024 }
  0xfa   : > { %1031 = vst.msk [vmem:[#allocation2 + $0x8] sm:$0xff] %vm1030_vm6, %v1025_v24  ;;  %vm6361_vm6 = vcmp.ge.s32.totalorder %v259_v50, 76 }
  0xfb   : > { %1100 = vst.msk [vmem:[#allocation2 + $0x8] sm:$0xff] %vm1099_vm7, %v1094_v23 }
  0xfd   : > { %v1165_v25 = vpop.permute.xlu1 %1164 }
 0x101   : > { %v1163_v26 = vpop.permute.xlu0 %1162 }
 0x102   : > { %1169 = vst.msk [vmem:[#allocation2 + $0x8] sm:$0xff] %vm1168_vm8, %v1163_v26 }
 0x105   : > { %v1096_v27 = vpop.permute.xlu2 %1095 }
 0x106   : > { %1101 = vst.msk [vmem:[#allocation2 + $0x20] sm:$0xff] %vm1099_vm7, %v1096_v27  ;;  %vm6371_vm7 = vcmp.ge.s32.totalorder %v259_v50, 16 }
 0x107   : > { %1170 = vst.msk [vmem:[#allocation2 + $0x20] sm:$0xff] %vm1168_vm8, %v1165_v25  ;;  %vm6376_vm8 = vcmp.lt.s32.totalorder %v259_v50, 340 }
 0x108   : > { %vm1429_vm14 = vmand %vm6371_vm7, %vm6376_vm8  ;;  %vm8700_vm7 = vcmask 195584   ;;  %vm1437_vm8 = vcmask 687104  }
 0x109   : > { %v1304_v28 = vpop.permute.xlu1 %1303 }
 0x10d   : > { %v1232_v29 = vpop.permute.xlu2 %1231  ;;  %v1234_v30 = vpop.permute.xlu0 %1233 }
 0x10e   : > { %1238 = vst.msk [vmem:[#allocation2 + $0x8] sm:$0xff] %vm1237_vm9, %v1232_v29 }
 0x10f   : > { %1240 = vst.msk [vmem:[#allocation2 + $0x10] sm:$0xff] %vm1239_vm11, %v1232_v29 }
 0x110   : > { %1310 = vst.msk [vmem:[#allocation2 + $0x10] sm:$0xff] %vm1309_vm10, %v1304_v28 }
 0x111   : > { %1241 = vst.msk [vmem:[#allocation2 + $0x20] sm:$0xff] %vm1237_vm9, %v1234_v30  ;;  %vm1411_vm9 = vcmask 621568  }
 0x112   : > { %1242 = vst.msk [vmem:[#allocation2 + $0x28] sm:$0xff] %vm1239_vm11, %v1234_v30  ;;  %vm1403_vm11 = vmand %vm6351_vm0, %vm6356_vm2  ;;  %vm6394_vm0 = vcmp.ge.s32.totalorder %v259_v50, 84  ;;  %vm6399_vm2 = vcmp.lt.s32.totalorder %v259_v50, 408 }
 0x115   : > { %v1306_v31 = vpop.permute.xlu2 %1305  ;;  %v1375_v32 = vpop.permute.xlu1 %1374 }
 0x116   : > { %1311 = vst.msk [vmem:[#allocation2 + $0x28] sm:$0xff] %vm1309_vm10, %v1306_v31  ;;  %vm1398_vm10 = vcmask 64512  }
 0x117   : > { %1380 = vst.msk [vmem:[#allocation2 + $0x28] sm:$0xff] %vm1378_vm12, %v1375_v32 }
 0x119   : > { %v1373_v33 = vpop.permute.xlu0 %1372 }
 0x11a   : > { %1379 = vst.msk [vmem:[#allocation2 + $0x10] sm:$0xff] %vm1378_vm12, %v1373_v33  ;;  %vm1424_vm12 = vcmask 130048  }
 0x11e   : > { %v1484_v40 = vld [vmem:[#allocation2 + $0x18] ss:$8 sm:$0x7]  ;;  %v1523_v43 = vld [vmem:[#allocation2 + $0x1b] ss:$8 sm:$0x7] }
 0x11f   : > { %v1510_v44 = vld [vmem:[#allocation2 + $0x1a] ss:$8 sm:$0x7]  ;;  %v1497_v45 = vld [vmem:[#allocation2 + $0x19] ss:$8 sm:$0x7] }
 0x120   : > { %v1562_v46 = vld [vmem:[#allocation2 + $0x1e] ss:$8 sm:$0x7]  ;;  %v1549_v47 = vld [vmem:[#allocation2 + $0x1d] ss:$8 sm:$0x7] }
 0x121   : > { %v1406_v34 = vld [vmem:[#allocation2 + $0x2] ss:$8 sm:$0x7]  ;;  %v1393_v35 = vld [vmem:[#allocation2 + $0x1] ss:$8 sm:$0x7] }
 0x122   : > { %1408 = vrot.lane.b32.xlu1 %v1406_v34, %s5659_s19  ;;  %1395 = vrot.lane.b32.xlu0 %v1393_v35, %s5660_s14  ;;  %v1381_v36 = vld [vmem:[#allocation2] ss:$8 sm:$0x7]  ;;  %v1445_v37 = vld [vmem:[#allocation2 + $0x5] ss:$8 sm:$0x7] }
 0x123   : > { %1383 = vrot.lane.b32.xlu2 %v1381_v36, %s5661_s16  ;;  %v1432_v38 = vld [vmem:[#allocation2 + $0x4] ss:$8 sm:$0x7]  ;;  %v1419_v39 = vld [vmem:[#allocation2 + $0x3] ss:$8 sm:$0x7] }
 0x124   : > { %v1471_v41 = vld [vmem:[#allocation2 + $0x7] ss:$8 sm:$0x7]  ;;  %v1458_v42 = vld [vmem:[#allocation2 + $0x6] ss:$8 sm:$0x7] }
 0x125   : > { %s5672_s19 = smov 56   ;;  %v1536_v48 = vld [vmem:[#allocation2 + $0x1c] ss:$8 sm:$0x7]  ;;  %s5673_s14 = smov 116  }
 0x126   : > { %v1575_v49 = vld [vmem:[#allocation2 + $0x1f] ss:$8 sm:$0x7]  ;;  %s5674_s16 = smov 64  }
 0x12a   : > { %1447 = vrot.lane.b32.xlu1 %v1445_v37, %s8702_s24  ;;  %1434 = vrot.lane.b32.xlu0 %v1432_v38, %s5663_s27  ;;  %s8706_s24 = smov 102  }
 0x12b   : > { %1421 = vrot.lane.b32.xlu2 %v1419_v39, %s5664_s29  ;;  %s8722_s29 = smov 22  }
 0x132   : > { %1486 = vrot.lane.b32.xlu1 %v1484_v40, %s5665_s9  ;;  %1473 = vrot.lane.b32.xlu0 %v1471_v41, %s5666_s10  ;;  %s8728_s10 = smov 82  }
 0x133   : > { %1460 = vrot.lane.b32.xlu2 %v1458_v42, %s5667_s8 }
 0x13a   : > { %1525 = vrot.lane.b32.xlu1 %v1523_v43, %s5668_s11  ;;  %1512 = vrot.lane.b32.xlu0 %v1510_v44, %s5669_s13  ;;  %s5677_s11 = smov 126  }
 0x13b   : > { %1499 = vrot.lane.b32.xlu2 %v1497_v45, %s5670_s15 }
 0x142   : > { %1564 = vrot.lane.b32.xlu1 %v1562_v46, %s5671_s30  ;;  %1551 = vrot.lane.b32.xlu0 %v1549_v47, %s5672_s19  ;;  %s8726_s30 = smov 83   ;;  %s8704_s19 = smov 120  }
 0x143   : > { %1538 = vrot.lane.b32.xlu2 %v1536_v48, %s5673_s14  ;;  %s5680_s14 = smov 110  }
 0x14b   : > { %1577 = vrot.lane.b32.xlu2 %v1575_v49, %s5674_s16  ;;  %s5681_s16 = smov 118  }
 0x17d   : > { %v1384_v51 = vpop.permute.xlu2 %1383 }
 0x17e   : > { %v1385_v52 = vrot.slane %v1384_v51, 7 }
 0x180   : > { %v1386_v53 = vsel %vm249_vm4, %v1385_v52, %v1384_v51  ;;  %vm6366_vm4 = vcmp.lt.s32.totalorder %v259_v50, 400 }
 0x181   : > { %1391 = vst.msk [vmem:[#allocation3 + $0x2] sm:$0xf] %vm1390_vm15, %v1386_v53  ;;  %vm1416_vm13 = vmand %vm6361_vm6, %vm6366_vm4  ;;  %vm261_vm15 = vcmp.lt.s32.totalorder %v259_v50, 896  ;;  %vm6404_vm6 = vcmp.ge.s32.totalorder %v259_v50, 24  ;;  %vm6409_vm4 = vcmp.lt.s32.totalorder %v259_v50, 348 }
 0x182   : > { %263 = vst.msk [vmem:[#allocation3 + $0x28] sm:$0x7f] %vm261_vm15, %v5658_v59  ;;  %vm6448_vm15 = vcmp.ge.s32.totalorder %v259_v50, 32 }
 0x185   : > { %v1422_v54 = vpop.permute.xlu2 %1421 }
 0x186   : > { %v1423_v1 = vrot.slane %v1422_v54, 7 }
 0x188   : > { %v1425_v6 = vsel %vm1424_vm12, %v1423_v1, %v1422_v54  ;;  %vm1463_vm12 = vcmask 752640  }
 0x18d   : > { %v1461_v57 = vpop.permute.xlu2 %1460 }
 0x18e   : > { %v1462_v15 = vrot.slane %v1461_v57, 7 }
 0x190   : > { %v1464_v23 = vsel %vm1463_vm12, %v1462_v15, %v1461_v57 }
 0x194   : > { %v1409_v63 = vpop.permute.xlu1 %1408  ;;  %v1396_v0 = vpop.permute.xlu0 %1395 }
 0x195   : > { %v1410_v2 = vrot.slane %v1409_v63, 7  ;;  %v1397_v3 = vrot.slane %v1396_v0, 7  ;;  %v1500_v17 = vpop.permute.xlu2 %1499 }
 0x196   : > { %v1501_v32 = vrot.slane %v1500_v17, 7 }
 0x197   : > { %v1412_v4 = vsel %vm1411_vm9, %v1410_v2, %v1409_v63  ;;  %v1399_v5 = vsel %vm1398_vm10, %v1397_v3, %v1396_v0  ;;  %vm6415_vm9 = vcmp.ge.s32.totalorder %v259_v50, 92  ;;  %vm6420_vm10 = vcmp.lt.s32.totalorder %v259_v50, 416 }
 0x198   : > { %1404 = vst.msk [vmem:[#allocation3 + $0x5] sm:$0x7] %vm1403_vm11, %v1399_v5  ;;  %vm1442_vm11 = vmand %vm6394_vm0, %vm6399_vm2  ;;  %vm6453_vm0 = vcmp.lt.s32.totalorder %v259_v50, 356  ;;  %vm1489_vm2 = vcmask 818176  }
 0x199   : > { %1417 = vst.msk [vmem:[#allocation3 + $0x7] sm:$0xf] %vm1416_vm13, %v1412_v4  ;;  %vm1455_vm13 = vmand %vm6404_vm6, %vm6409_vm4  ;;  %vm6458_vm6 = vcmp.ge.s32.totalorder %v259_v50, 100  ;;  %vm6463_vm4 = vcmp.lt.s32.totalorder %v259_v50, 424 }
 0x19a   : > { %1430 = vst.msk [vmem:[#allocation3 + $0xa] sm:$0x7] %vm1429_vm14, %v1425_v6  ;;  %vm1468_vm14 = vmand %vm6415_vm9, %vm6420_vm10  ;;  %vm1476_vm9 = vcmask 261120   ;;  %vm6468_vm10 = vcmp.ge.s32.totalorder %v259_v50, 40 }
 0x19b   : > { %vm1494_vm5 = vmand %vm6458_vm6, %vm6463_vm4  ;;  %vm1528_vm6 = vcmask 392192   ;;  %vm6510_vm4 = vcmp.ge.s32.totalorder %v259_v50, 48 }
 0x19c   : > { %v1448_v11 = vpop.permute.xlu1 %1447  ;;  %v1435_v12 = vpop.permute.xlu0 %1434 }
 0x19d   : > { %v1449_v16 = vrot.slane %v1448_v11, 7  ;;  %v1436_v59 = vrot.slane %v1435_v12, 7  ;;  %v1539_v38 = vpop.permute.xlu2 %1538 }
 0x19e   : > { %v1540_v49 = vrot.slane %v1539_v38, 7 }
 0x19f   : > { %v1451_v18 = vsel %vm8700_vm7, %v1449_v16, %v1448_v11  ;;  %v1438_v19 = vsel %vm1437_vm8, %v1436_v59, %v1435_v12 }
 0x1a0   : > { %1443 = vst.msk [vmem:[#allocation3 + $0xc] sm:$0xf] %vm1442_vm11, %v1438_v19  ;;  %v6438_v20 = vld [vmem:[#allocation3 + $0x2] sm:$0xff]  ;;  %vm6473_vm11 = vcmp.lt.s32.totalorder %v259_v50, 364 }
 0x1a1   : > { %v6440_v21 = vld [vmem:[#allocation3] sm:$0xff]  ;;  %2677 = vrot.lane.b32.xlu2 %v6438_v20, %s8722_s29  ;;  %1456 = vst.msk [vmem:[#allocation3 + $0xf] sm:$0x7] %vm1455_vm13, %v1451_v18  ;;  %vm1481_vm13 = vmand %vm6448_vm15, %vm6453_vm0  ;;  %vm6500_vm15 = vcmp.ge.s32.totalorder %v259_v50, 108  ;;  %vm6505_vm0 = vcmp.lt.s32.totalorder %v259_v50, 432 }
 0x1a2   : > { %v1587_v22 = vld [vmem:[#allocation3] sm:$0xff]  ;;  %1624 = vrot.lane.b32.xlu0 %v6440_v21, %s5648_s26  ;;  %1469 = vst.msk [vmem:[#allocation3 + $0x11] sm:$0xf] %vm1468_vm14, %v1464_v23  ;;  %vm8701_vm14 = vcmask 326656   ;;  %vm1507_vm3 = vmand %vm6468_vm10, %vm6473_vm11  ;;  %vm6520_vm10 = vcmp.ge.s32.totalorder %v259_v50, 116 }
 0x1a3   : > { %1593 = vst [vmem:[#allocation4] ss:$8 sm:$0xf] %v1587_v22  ;;  %v1503_v40 = vsel %vm8701_vm14, %v1501_v32, %v1500_v17  ;;  %vm1520_vm11 = vmand %vm6500_vm15, %vm6505_vm0  ;;  %vm6550_vm15 = vcmp.ge.s32.totalorder %v259_v50, 56  ;;  %vm6555_vm0 = vcmp.lt.s32.totalorder %v259_v50, 380 }
 0x1a4   : > { %v1487_v28 = vpop.permute.xlu1 %1486  ;;  %v1474_v29 = vpop.permute.xlu0 %1473  ;;  %1594 = vst [vmem:[#allocation4] ss:$8 sm:$0xf0] %v1587_v22 }
 0x1a5   : > { %v1488_v33 = vrot.slane %v1487_v28, 7  ;;  %v1475_v34 = vrot.slane %v1474_v29, 7  ;;  %v1578_v57 = vpop.permute.xlu2 %1577 }
 0x1a6   : > { %v1579_v3 = vrot.slane %v1578_v57, 7 }
 0x1a7   : > { %v1490_v35 = vsel %vm1489_vm2, %v1488_v33, %v1487_v28  ;;  %v1477_v36 = vsel %vm1476_vm9, %v1475_v34, %v1474_v29  ;;  %v6486_v37 = vld [vmem:[#allocation3 + $0x5] sm:$0xff]  ;;  %vm6515_vm9 = vcmp.lt.s32.totalorder %v259_v50, 372 }
 0x1a8   : > { %1482 = vst.msk [vmem:[#allocation3 + $0x14] sm:$0x7] %vm1481_vm13, %v1477_v36  ;;  %3269 = vrot.lane.b32.xlu1 %v6486_v37, %s8728_s10  ;;  %v1588_v39 = vld [vmem:[#allocation3 + $0x8] sm:$0xff]  ;;  %vm1541_vm13 = vcmask 949248   ;;  %vm1533_vm1 = vmand %vm6510_vm4, %vm6515_vm9  ;;  %vm6560_vm4 = vcmp.ge.s32.totalorder %v259_v50, 124  ;;  %vm1554_vm9 = vcmask 457728  }
 0x1a9   : > { %3203 = vrot.lane.b32.xlu2 %v6486_v37, %s8726_s30  ;;  %1495 = vst.msk [vmem:[#allocation3 + $0x16] sm:$0xf] %vm1494_vm5, %v1490_v35  ;;  %vm1515_vm5 = vcmask 883712   ;;  %v1542_v56 = vsel %vm1541_vm13, %v1540_v49, %v1539_v38  ;;  %v6600_v11 = vld [vmem:[#allocation3 + $0x8] sm:$0xff] }
 0x1aa   : > { %1691 = vrot.lane.b32.xlu0 %v6440_v21, %s5677_s11  ;;  %1508 = vst.msk [vmem:[#allocation3 + $0x19] sm:$0x7] %vm1507_vm3, %v1503_v40  ;;  %vm6525_vm3 = vcmp.lt.s32.totalorder %v259_v50, 440  ;;  %v6649_v15 = vld [vmem:[#allocation3 + $0xa] sm:$0xff] }
 0x1ab   : > { %1596 = vst [vmem:[#allocation4 + $0x40] ss:$8 sm:$0xf] %v1588_v39  ;;  %vm1546_vm7 = vmand %vm6520_vm10, %vm6525_vm3  ;;  %vm6570_vm10 = vcmp.ge.s32.totalorder %v259_v50, 64 }
 0x1ac   : > { %v1526_v45 = vpop.permute.xlu1 %1525  ;;  %v1513_v46 = vpop.permute.xlu0 %1512  ;;  %1597 = vst [vmem:[#allocation4 + $0x40] ss:$8 sm:$0xf0] %v1588_v39  ;;  %vm1559_vm3 = vmand %vm6550_vm15, %vm6555_vm0  ;;  %vm6609_vm15 = vcmp.lt.s32.totalorder %v259_v50, 128  ;;  %vm3288_vm0 = vcmask 670720  }
 0x1ad   : > { %v1527_v51 = vrot.slane %v1526_v45, 7  ;;  %v1514_v52 = vrot.slane %v1513_v46, 7 }
 0x1af   : > { %v1529_v53 = vsel %vm1528_vm6, %v1527_v51, %v1526_v45  ;;  %v1516_v54 = vsel %vm1515_vm5, %v1514_v52, %v1513_v46  ;;  %vm1567_vm6 = vcmask 1014784   ;;  %v6594_v8 = vld [vmem:[#allocation3 + $0xd] sm:$0xff] }
 0x1b0   : > { %1521 = vst.msk [vmem:[#allocation3 + $0x1b] sm:$0xf] %vm1520_vm11, %v1516_v54  ;;  %2743 = vrot.lane.b32.xlu1 %v6486_v37, %s8704_s19  ;;  %v1589_v55 = vld [vmem:[#allocation3 + $0x10] sm:$0xff]  ;;  %vm1580_vm11 = vcmask 523264  }
 0x1b1   : > { %2875 = vrot.lane.b32.xlu2 %v6486_v37, %s5681_s16  ;;  %1534 = vst.msk [vmem:[#allocation3 + $0x1e] sm:$0x7] %vm1533_vm1, %v1529_v53  ;;  %vm6565_vm1 = vcmp.lt.s32.totalorder %v259_v50, 448  ;;  %v1581_v10 = vsel %vm1580_vm11, %v1579_v3, %v1578_v57  ;;  %vm8713_vm11 = vcmask 179200  }
 0x1b2   : > { %1757 = vrot.lane.b32.xlu0 %v6440_v21, %s5680_s14  ;;  %1547 = vst.msk [vmem:[#allocation3 + $0x20] sm:$0xf] %vm1546_vm7, %v1542_v56  ;;  %vm6575_vm7 = vcmp.lt.s32.totalorder %v259_v50, 388  ;;  %vm1572_vm13 = vmand %vm6560_vm4, %vm6565_vm1  ;;  %v6623_v50 = vld [vmem:[#allocation3 + $0x10] sm:$0xff]  ;;  %vm8708_vm4 = vcmask 834560   ;;  %vm1644_vm1 = vcmask 1039360  }
 0x1b3   : > { %1599 = vst [vmem:[#allocation4 + $0x80] ss:$8 sm:$0xf] %v1589_v55  ;;  %vm1585_vm14 = vmand %vm6570_vm10, %vm6575_vm7  ;;  %vm1776_vm10 = vcmask 900096   ;;  %vm1842_vm7 = vcmask 891904  }
 0x1b4   : > { %v1565_v63 = vpop.permute.xlu1 %1564  ;;  %v1552_v0 = vpop.permute.xlu0 %1551  ;;  %1600 = vst [vmem:[#allocation4 + $0x80] ss:$8 sm:$0xf0] %v1589_v55 }
 0x1b5   : > { %v1566_v4 = vrot.slane %v1565_v63, 7  ;;  %v1553_v5 = vrot.slane %v1552_v0, 7 }
 0x1b7   : > { %v1568_v6 = vsel %vm1567_vm6, %v1566_v4, %v1565_v63  ;;  %v1555_v7 = vsel %vm1554_vm9, %v1553_v5, %v1552_v0  ;;  %vm8711_vm6 = vcmask 982016   ;;  %vm1710_vm9 = vcmask 1031168  }
 0x1b8   : > { %1560 = vst.msk [vmem:[#allocation3 + $0x23] sm:$0x7] %vm1559_vm3, %v1555_v7  ;;  %2941 = vrot.lane.b32.xlu1 %v6486_v37, %s8706_s24  ;;  %v1590_v9 = vld [vmem:[#allocation3 + $0x18] sm:$0xff]  ;;  %vm2038_vm3 = vcmask 744448  }
 0x1b9   : > { %1573 = vst.msk [vmem:[#allocation3 + $0x25] sm:$0xf] %vm1572_vm13, %v1568_v6  ;;  %3271 = vrot.lane.b32.xlu2 %v6594_v8, %s8728_s10  ;;  %v6673_v17 = vld [vmem:[#allocation3 + $0x18] sm:$0xff]  ;;  %vm2630_vm13 = vcmask 187392  }
 0x1ba   : > { %1823 = vrot.lane.b32.xlu0 %v6440_v21, %s5645_s17  ;;  %1586 = vst.msk [vmem:[#allocation3 + $0x28] sm:$0xf] %vm1585_vm14, %v1581_v10  ;;  %vm1642_vm14 = vcmask 1046528  }
 0x1bb   : > { %1602 = vst [vmem:[#allocation4 + $0xc0] ss:$8 sm:$0xf] %v1590_v9 }
 0x1bc   : > { %1603 = vst [vmem:[#allocation4 + $0xc0] ss:$8 sm:$0xf0] %v1590_v9 }
 0x1c0   : > { %1626 = vrot.lane.b32.xlu1 %v6600_v11, %s5648_s26  ;;  %v1591_v12 = vld [vmem:[#allocation3 + $0x20] sm:$0xff] }
 0x1c1   : > { %2745 = vrot.lane.b32.xlu2 %v6594_v8, %s8704_s19  ;;  %1605 = vst [vmem:[#allocation4 + $0x100] ss:$8 sm:$0xf] %v1591_v12  ;;  %v1592_v14 = vld [vmem:[#allocation3 + $0x28] sm:$0x1]  ;;  %s8720_s19 = smov 23  }
 0x1c2   : > { %1889 = vrot.lane.b32.xlu0 %v6440_v21, %s5669_s13  ;;  %1606 = vst [vmem:[#allocation4 + $0x100] ss:$8 sm:$0xf0] %v1591_v12  ;;  %v6681_v19 = vld [vmem:[#allocation3 + $0x20] sm:$0xff]  ;;  %v1617_v22 = vld [vmem:[#allocation3 + $0x28] sm:$0x3] }
 0x1c3   : > { %1610 = vst.msk [vmem:[#allocation4 + $0x140] ss:$8 sm:$0x1] %vm6609_vm15, %v1592_v14  ;;  %v1684_v25 = vld [vmem:[#allocation3 + $0x28] sm:$0x3] }
 0x1c4   : > { %v1750_v33 = vld [vmem:[#allocation3 + $0x28] sm:$0x3] }
 0x1c5   : > { %v1816_v42 = vld [vmem:[#allocation3 + $0x28] sm:$0x3] }
 0x1c6   : > { %v1882_v51 = vld [vmem:[#allocation3 + $0x28] sm:$0x3] }
 0x1c7   : > { %v1947_v63 = vld [vmem:[#allocation3 + $0x28] sm:$0x3] }
 0x1c8   : > { %1693 = vrot.lane.b32.xlu1 %v6600_v11, %s5677_s11  ;;  %v2012_v12 = vld [vmem:[#allocation3 + $0x28] sm:$0x3] }
 0x1c9   : > { %2943 = vrot.lane.b32.xlu2 %v6594_v8, %s8706_s24  ;;  %s8714_s24 = smov 119  }
 0x1ca   : > { %1954 = vrot.lane.b32.xlu0 %v6440_v21, %s5667_s8 }
 0x1d0   : > { %1759 = vrot.lane.b32.xlu1 %v6600_v11, %s5680_s14 }
 0x1d1   : > { %1628 = vrot.lane.b32.xlu2 %v6623_v50, %s5648_s26 }
 0x1d2   : > { %2019 = vrot.lane.b32.xlu0 %v6440_v21, %s5646_s18 }
 0x1d8   : > { %1825 = vrot.lane.b32.xlu1 %v6600_v11, %s5645_s17 }
 0x1d9   : > { %1695 = vrot.lane.b32.xlu2 %v6623_v50, %s5677_s11 }
 0x1da   : > { %2611 = vrot.lane.b32.xlu0 %v6438_v20, %s8720_s19 }
 0x1e0   : > { %1891 = vrot.lane.b32.xlu1 %v6600_v11, %s5669_s13 }
 0x1e1   : > { %1761 = vrot.lane.b32.xlu2 %v6623_v50, %s5680_s14 }
 0x1e2   : > { %3138 = vrot.lane.b32.xlu0 %v6486_v37, %s5663_s27 }
 0x1e8   : > { %1956 = vrot.lane.b32.xlu1 %v6600_v11, %s5667_s8 }
 0x1e9   : > { %1827 = vrot.lane.b32.xlu2 %v6623_v50, %s5645_s17 }
 0x1ea   : > { %2809 = vrot.lane.b32.xlu0 %v6486_v37, %s8714_s24 }
 0x1f0   : > { %2021 = vrot.lane.b32.xlu1 %v6600_v11, %s5646_s18 }
 0x1f1   : > { %1893 = vrot.lane.b32.xlu2 %v6623_v50, %s5669_s13 }
 0x1f2   : > { %2679 = vrot.lane.b32.xlu0 %v6649_v15, %s8722_s29 }
 0x1f8   : > { %2613 = vrot.lane.b32.xlu1 %v6649_v15, %s8720_s19 }
 0x1f9   : > { %1958 = vrot.lane.b32.xlu2 %v6623_v50, %s5667_s8 }
 0x1fa   : > { %3205 = vrot.lane.b32.xlu0 %v6594_v8, %s8726_s30 }
 0x1fb   : > { %v6661_v16 = vpop.permute.xlu2 %2677 }
 0x200   : > { %3140 = vrot.lane.b32.xlu1 %v6594_v8, %s5663_s27 }
 0x201   : > { %2023 = vrot.lane.b32.xlu2 %v6623_v50, %s5646_s18 }
 0x202   : > { %2877 = vrot.lane.b32.xlu0 %v6594_v8, %s5681_s16 }
 0x203   : > { %v6669_v59 = vpop.permute.xlu2 %3203 }
 0x208   : > { %2811 = vrot.lane.b32.xlu1 %v6594_v8, %s8714_s24 }
 0x209   : > { %3073 = vrot.lane.b32.xlu2 %v6486_v37, %s5665_s9 }
 0x20a   : > { %1630 = vrot.lane.b32.xlu0 %v6673_v17, %s5648_s26 }
 0x20b   : > { %v6679_v18 = vpop.permute.xlu2 %2875 }
 0x210   : > { %1632 = vrot.lane.b32.xlu1 %v6681_v19, %s5648_s26 }
 0x211   : > { %1634 = vrot.lane.b32.xlu2 %v1617_v22, %s5648_s26  ;;  %s8732_s26 = smov 60  }
 0x212   : > { %1697 = vrot.lane.b32.xlu0 %v6673_v17, %s5677_s11 }
 0x213   : > { %v6688_v24 = vpop.permute.xlu2 %3271 }
 0x214   : > { %v1625_v23 = vpop.permute.xlu0 %1624  ;;  %v3282_v27 = vrot.slane %v6688_v24, 1 }
 0x215   : > { %v1636_v53 = vrot.slane %v1625_v23, 1 }
 0x218   : > { %1699 = vrot.lane.b32.xlu1 %v6681_v19, %s5677_s11 }
 0x219   : > { %1701 = vrot.lane.b32.xlu2 %v1684_v25, %s5677_s11  ;;  %s8718_s11 = smov 42  }
 0x21a   : > { %1763 = vrot.lane.b32.xlu0 %v6673_v17, %s5680_s14  ;;  %v3270_v26 = vpop.permute.xlu1 %3269 }
 0x21b   : > { %v3281_v28 = vrot.slane %v3270_v26, 1  ;;  %v6698_v30 = vpop.permute.xlu2 %2745 }
 0x21c   : > { %v6696_v29 = vpop.permute.xlu0 %1691  ;;  %v2756_v35 = vrot.slane %v6698_v30, 1 }
 0x21d   : > { %v3287_v31 = vsel %vm1642_vm14, %v3281_v28, %v3282_v27  ;;  %v1703_v1 = vrot.slane %v6696_v29, 1 }
 0x21e   : > { %v3289_v32 = vsel %vm3288_vm0, %v3270_v26, %v3287_v31 }
 0x21f   : > { %3306 = vst [vmem:[#allocation4 + $0x3da] ss:$8 sm:$0xf] %v3289_v32 }
 0x220   : > { %3307 = vst [vmem:[#allocation4 + $0x3da] ss:$8 sm:$0xf0] %v3289_v32  ;;  %1765 = vrot.lane.b32.xlu1 %v6681_v19, %s5680_s14 }
 0x221   : > { %1767 = vrot.lane.b32.xlu2 %v1750_v33, %s5680_s14  ;;  %s8709_s14 = smov 41  }
 0x222   : > { %1829 = vrot.lane.b32.xlu0 %v6673_v17, %s5645_s17  ;;  %v2744_v34 = vpop.permute.xlu1 %2743 }
 0x223   : > { %v2755_v36 = vrot.slane %v2744_v34, 1  ;;  %v6712_v39 = vpop.permute.xlu2 %2943 }
 0x224   : > { %v6710_v38 = vpop.permute.xlu0 %1757  ;;  %v2954_v44 = vrot.slane %v6712_v39, 1 }
 0x225   : > { %v2761_v40 = vsel %vm1642_vm14, %v2755_v36, %v2756_v35  ;;  %v1769_v22 = vrot.slane %v6710_v38, 1 }
 0x226   : > { %v2763_v41 = vsel %vm8711_vm6, %v2744_v34, %v2761_v40  ;;  %vm8712_vm6 = vcmask 965632  }
 0x227   : > { %2780 = vst [vmem:[#allocation4 + $0x292] ss:$8 sm:$0xf] %v2763_v41 }
 0x228   : > { %2781 = vst [vmem:[#allocation4 + $0x292] ss:$8 sm:$0xf0] %v2763_v41  ;;  %1831 = vrot.lane.b32.xlu1 %v6681_v19, %s5645_s17 }
 0x229   : > { %1833 = vrot.lane.b32.xlu2 %v1816_v42, %s5645_s17  ;;  %s8716_s17 = smov 101  }
 0x22a   : > { %1895 = vrot.lane.b32.xlu0 %v6673_v17, %s5669_s13  ;;  %v2942_v43 = vpop.permute.xlu1 %2941 }
 0x22b   : > { %v2953_v45 = vrot.slane %v2942_v43, 1  ;;  %v6726_v47 = vpop.permute.xlu2 %1628 }
 0x22c   : > { %v6724_v46 = vpop.permute.xlu0 %1823  ;;  %v1638_v54 = vrot.slane %v6726_v47, 1 }
 0x22d   : > { %v2959_v48 = vsel %vm1642_vm14, %v2953_v45, %v2954_v44  ;;  %v1835_v33 = vrot.slane %v6724_v46, 1 }
 0x22e   : > { %v2961_v49 = vsel %vm8708_vm4, %v2942_v43, %v2959_v48  ;;  %vm3222_vm4 = vcmask 678912  }
 0x22f   : > { %2978 = vst [vmem:[#allocation4 + $0x295] ss:$8 sm:$0xf] %v2961_v49 }
 0x230   : > { %2979 = vst [vmem:[#allocation4 + $0x295] ss:$8 sm:$0xf0] %v2961_v49  ;;  %1897 = vrot.lane.b32.xlu1 %v6681_v19, %s5669_s13 }
 0x231   : > { %1899 = vrot.lane.b32.xlu2 %v1882_v51, %s5669_s13  ;;  %s8724_s13 = smov 58  }
 0x232   : > { %1960 = vrot.lane.b32.xlu0 %v6673_v17, %s5667_s8  ;;  %v1627_v52 = vpop.permute.xlu1 %1626 }
 0x233   : > { %v1637_v55 = vrot.slane %v1627_v52, 1  ;;  %v6740_v57 = vpop.permute.xlu2 %1695 }
 0x234   : > { %v6738_v56 = vpop.permute.xlu0 %1889  ;;  %v1705_v2 = vrot.slane %v6740_v57, 1 }
 0x235   : > { %v1643_v58 = vsel %vm1642_vm14, %v1636_v53, %v1637_v55  ;;  %v1646_v60 = vsel %vm1642_vm14, %v1637_v55, %v1638_v54  ;;  %v1901_v45 = vrot.slane %v6738_v56, 1 }
 0x236   : > { %v1645_v61 = vsel %vm1644_vm1, %v1625_v23, %v1643_v58  ;;  %v1647_v62 = vsel %vm1644_vm1, %v1627_v52, %v1646_v60 }
 0x237   : > { %1662 = vst [vmem:[#allocation4 + $0x1] ss:$8 sm:$0xf] %v1645_v61 }
 0x238   : > { %1663 = vst [vmem:[#allocation4 + $0x1] ss:$8 sm:$0xf0] %v1645_v61  ;;  %1962 = vrot.lane.b32.xlu1 %v6681_v19, %s5667_s8 }
 0x239   : > { %1665 = vst [vmem:[#allocation4 + $0x41] ss:$8 sm:$0xf] %v1647_v62  ;;  %1964 = vrot.lane.b32.xlu2 %v1947_v63, %s5667_s8  ;;  %s8730_s8 = smov 59  }
 0x23a   : > { %2025 = vrot.lane.b32.xlu0 %v6673_v17, %s5646_s18  ;;  %1666 = vst [vmem:[#allocation4 + $0x41] ss:$8 sm:$0xf0] %v1647_v62  ;;  %v1694_v0 = vpop.permute.xlu1 %1693 }
 0x23b   : > { %v1704_v3 = vrot.slane %v1694_v0, 1  ;;  %v6757_v5 = vpop.permute.xlu2 %1761 }
 0x23c   : > { %v6755_v4 = vpop.permute.xlu0 %1954  ;;  %v1771_v23 = vrot.slane %v6757_v5, 1 }
 0x23d   : > { %v1709_v6 = vsel %vm1642_vm14, %v1703_v1, %v1704_v3  ;;  %v1712_v7 = vsel %vm1642_vm14, %v1704_v3, %v1705_v2  ;;  %v1966_v60 = vrot.slane %v6755_v4, 1 }
 0x23e   : > { %v1711_v9 = vsel %vm1710_vm9, %v6696_v29, %v1709_v6  ;;  %v1713_v10 = vsel %vm1710_vm9, %v1694_v0, %v1712_v7 }
 0x23f   : > { %1728 = vst [vmem:[#allocation4 + $0x2] ss:$8 sm:$0xf] %v1711_v9 }
 0x240   : > { %1729 = vst [vmem:[#allocation4 + $0x2] ss:$8 sm:$0xf0] %v1711_v9  ;;  %2027 = vrot.lane.b32.xlu1 %v6681_v19, %s5646_s18 }
 0x241   : > { %1731 = vst [vmem:[#allocation4 + $0x42] ss:$8 sm:$0xf] %v1713_v10  ;;  %2029 = vrot.lane.b32.xlu2 %v2012_v12, %s5646_s18  ;;  %s8731_s18 = smov 90  }
 0x242   : > { %3007 = vrot.lane.b32.xlu0 %v6486_v37, %s8716_s17  ;;  %1732 = vst [vmem:[#allocation4 + $0x42] ss:$8 sm:$0xf0] %v1713_v10  ;;  %v1760_v14 = vpop.permute.xlu1 %1759 }
 0x243   : > { %v1770_v25 = vrot.slane %v1760_v14, 1  ;;  %v6775_v28 = vpop.permute.xlu2 %1827 }
 0x244   : > { %v6773_v26 = vpop.permute.xlu0 %2019  ;;  %v1837_v34 = vrot.slane %v6775_v28, 1 }
 0x245   : > { %v1775_v19 = vsel %vm1642_vm14, %v1769_v22, %v1770_v25  ;;  %v1778_v37 = vsel %vm1642_vm14, %v1770_v25, %v1771_v23  ;;  %v2689_v22 = vrot.slane %v6661_v16, 1 }
 0x246   : > { %v1777_v29 = vsel %vm1776_vm10, %v6710_v38, %v1775_v19  ;;  %v1779_v31 = vsel %vm1776_vm10, %v1760_v14, %v1778_v37 }
 0x247   : > { %1794 = vst [vmem:[#allocation4 + $0x3] ss:$8 sm:$0xf] %v1777_v29 }
 0x248   : > { %1795 = vst [vmem:[#allocation4 + $0x3] ss:$8 sm:$0xf0] %v1777_v29  ;;  %3009 = vrot.lane.b32.xlu1 %v6594_v8, %s8716_s17 }
 0x249   : > { %1797 = vst [vmem:[#allocation4 + $0x43] ss:$8 sm:$0xf] %v1779_v31  ;;  %2087 = vrot.lane.b32.xlu2 %v6600_v11, %s8731_s18 }
 0x24a   : > { %3075 = vrot.lane.b32.xlu0 %v6594_v8, %s5665_s9  ;;  %1798 = vst [vmem:[#allocation4 + $0x43] ss:$8 sm:$0xf0] %v1779_v31  ;;  %v1826_v32 = vpop.permute.xlu1 %1825 }
 0x24b   : > { %v1836_v36 = vrot.slane %v1826_v32, 1  ;;  %v6794_v40 = vpop.permute.xlu2 %1893 }
 0x24c   : > { %v6792_v38 = vpop.permute.xlu0 %2611 }
 0x24d   : > { %v1841_v41 = vsel %vm1642_vm14, %v1835_v33, %v1836_v36  ;;  %v1844_v8 = vsel %vm1642_vm14, %v1836_v36, %v1837_v34 }
 0x24e   : > { %v1843_v11 = vsel %vm1842_vm7, %v6724_v46, %v1841_v41  ;;  %v1845_v42 = vsel %vm1842_vm7, %v1826_v32, %v1844_v8  ;;  %v1903_v46 = vrot.slane %v6794_v40, 1  ;;  %v2623_v41 = vrot.slane %v6792_v38, 1 }
 0x24f   : > { %1860 = vst [vmem:[#allocation4 + $0x4] ss:$8 sm:$0xf] %v1843_v11 }
 0x250   : > { %1861 = vst [vmem:[#allocation4 + $0x4] ss:$8 sm:$0xf0] %v1843_v11  ;;  %2085 = vrot.lane.b32.xlu1 %v6440_v21, %s8731_s18 }
 0x251   : > { %1863 = vst [vmem:[#allocation4 + $0x44] ss:$8 sm:$0xf] %v1845_v42  ;;  %2217 = vrot.lane.b32.xlu2 %v6438_v20, %s8730_s8 }
 0x252   : > { %2151 = vrot.lane.b32.xlu0 %v6438_v20, %s8732_s26  ;;  %1864 = vst [vmem:[#allocation4 + $0x44] ss:$8 sm:$0xf0] %v1845_v42  ;;  %v1892_v43 = vpop.permute.xlu1 %1891 }
 0x253   : > { %v1902_v48 = vrot.slane %v1892_v43, 1  ;;  %v6813_v51 = vpop.permute.xlu2 %1958 }
 0x254   : > { %v6811_v49 = vpop.permute.xlu0 %3138 }
 0x255   : > { %v1907_v21 = vsel %vm1642_vm14, %v1901_v45, %v1902_v48  ;;  %v1909_v52 = vsel %vm1642_vm14, %v1902_v48, %v1903_v46 }
 0x256   : > { %v1908_v53 = vsel %vm1515_vm5, %v6738_v56, %v1907_v21  ;;  %v1910_v55 = vsel %vm1515_vm5, %v1892_v43, %v1909_v52  ;;  %v1968_v56 = vrot.slane %v6813_v51, 1 }
 0x257   : > { %1925 = vst [vmem:[#allocation4 + $0x5] ss:$8 sm:$0xf] %v1908_v53 }
 0x258   : > { %1926 = vst [vmem:[#allocation4 + $0x5] ss:$8 sm:$0xf0] %v1908_v53  ;;  %2153 = vrot.lane.b32.xlu1 %v6649_v15, %s8732_s26 }
 0x259   : > { %1928 = vst [vmem:[#allocation4 + $0x45] ss:$8 sm:$0xf] %v1910_v55  ;;  %2285 = vrot.lane.b32.xlu2 %v6649_v15, %s8724_s13 }
 0x25a   : > { %2219 = vrot.lane.b32.xlu0 %v6649_v15, %s8730_s8  ;;  %1929 = vst [vmem:[#allocation4 + $0x45] ss:$8 sm:$0xf0] %v1910_v55  ;;  %v1957_v58 = vpop.permute.xlu1 %1956  ;;  %v6900_v55 = vld [vmem:[#allocation3 + $0x15] sm:$0xff] }
 0x25b   : > { %v1967_v61 = vrot.slane %v1957_v58, 1  ;;  %v6832_v63 = vpop.permute.xlu2 %2023 }
 0x25c   : > { %v6830_v62 = vpop.permute.xlu0 %2809  ;;  %v2033_v9 = vrot.slane %v6832_v63, 1 }
 0x25d   : > { %v1972_v0 = vsel %vm1642_vm14, %v1966_v60, %v1967_v61  ;;  %v1974_v1 = vsel %vm1642_vm14, %v1967_v61, %v1968_v56 }
 0x25e   : > { %v1973_v3 = vsel %vm1463_vm12, %v6755_v4, %v1972_v0  ;;  %v1975_v6 = vsel %vm1463_vm12, %v1957_v58, %v1974_v1  ;;  %v2031_v4 = vrot.slane %v6773_v26, 1  ;;  %v2887_v0 = vrot.slane %v6679_v18, 1 }
 0x25f   : > { %1990 = vst [vmem:[#allocation4 + $0x6] ss:$8 sm:$0xf] %v1973_v3 }
 0x260   : > { %1991 = vst [vmem:[#allocation4 + $0x6] ss:$8 sm:$0xf0] %v1973_v3  ;;  %2283 = vrot.lane.b32.xlu1 %v6438_v20, %s8724_s13 }
 0x261   : > { %1993 = vst [vmem:[#allocation4 + $0x46] ss:$8 sm:$0xf] %v1975_v6  ;;  %2415 = vrot.lane.b32.xlu2 %v6438_v20, %s8709_s14 }
 0x262   : > { %2349 = vrot.lane.b32.xlu0 %v6438_v20, %s8718_s11  ;;  %1994 = vst [vmem:[#allocation4 + $0x46] ss:$8 sm:$0xf0] %v1975_v6  ;;  %v2022_v7 = vpop.permute.xlu1 %2021 }
 0x263   : > { %v2032_v10 = vrot.slane %v2022_v7, 1  ;;  %v6851_v14 = vpop.permute.xlu2 %3073 }
 0x264   : > { %v6849_v12 = vpop.permute.xlu0 %2679 }
 0x265   : > { %v2690_v25 = vrot.slane %v6849_v12, 1  ;;  %v2037_v19 = vsel %vm1642_vm14, %v2031_v4, %v2032_v10  ;;  %v2040_v37 = vsel %vm1642_vm14, %v2032_v10, %v2033_v9 }
 0x266   : > { %v2039_v29 = vsel %vm2038_vm3, %v6773_v26, %v2037_v19  ;;  %v2041_v31 = vsel %vm2038_vm3, %v2022_v7, %v2040_v37  ;;  %v3215_v26 = vrot.slane %v6669_v59, 1 }
 0x267   : > { %v2695_v32 = vsel %vm1642_vm14, %v2689_v22, %v2690_v25  ;;  %2056 = vst [vmem:[#allocation4 + $0x7] ss:$8 sm:$0xf] %v2039_v29  ;;  %v6935_v22 = vld [vmem:[#allocation3 + $0x12] sm:$0xff] }
 0x268   : > { %2057 = vst [vmem:[#allocation4 + $0x7] ss:$8 sm:$0xf0] %v2039_v29  ;;  %v2697_v33 = vsel %vm8713_vm11, %v6661_v16, %v2695_v32  ;;  %2351 = vrot.lane.b32.xlu1 %v6649_v15, %s8718_s11  ;;  %vm3508_vm11 = vcmask 1042432  }
 0x269   : > { %2059 = vst [vmem:[#allocation4 + $0x47] ss:$8 sm:$0xf] %v2041_v31  ;;  %2483 = vrot.lane.b32.xlu2 %v6649_v15, %s5670_s15 }
 0x26a   : > { %2417 = vrot.lane.b32.xlu0 %v6649_v15, %s8709_s14  ;;  %2060 = vst [vmem:[#allocation4 + $0x47] ss:$8 sm:$0xf0] %v2041_v31  ;;  %v6874_v36 = vpop.permute.xlu1 %2613  ;;  %s8801_s14 = smov 24  }
 0x26b   : > { %2714 = vst [vmem:[#allocation4 + $0x291] ss:$8 sm:$0xf] %v2697_v33  ;;  %v2624_v16 = vrot.slane %v6874_v36, 1  ;;  %v6880_v11 = vpop.permute.xlu2 %1634 }
 0x26c   : > { %v6878_v8 = vpop.permute.xlu0 %3205  ;;  %2715 = vst [vmem:[#allocation4 + $0x291] ss:$8 sm:$0xf0] %v2697_v33  ;;  %v1641_v43 = vrot.slane %v6880_v11, 1 }
 0x26d   : > { %v3216_v42 = vrot.slane %v6878_v8, 1  ;;  %v2629_v45 = vsel %vm1642_vm14, %v2623_v41, %v2624_v16 }
 0x26e   : > { %v2631_v48 = vsel %vm2630_vm13, %v6792_v38, %v2629_v45  ;;  %v1654_v53 = vsel %vm1644_vm1, %v6880_v11, %v1641_v43  ;;  %v3150_v38 = vrot.slane %v6811_v49, 1 }
 0x26f   : > { %v3221_v21 = vsel %vm1642_vm14, %v3215_v26, %v3216_v42  ;;  %2648 = vst [vmem:[#allocation4 + $0x290] ss:$8 sm:$0xf] %v2631_v48 }
 0x270   : > { %v3223_v52 = vsel %vm3222_vm4, %v6669_v59, %v3221_v21  ;;  %2649 = vst [vmem:[#allocation4 + $0x290] ss:$8 sm:$0xf0] %v2631_v48  ;;  %2481 = vrot.lane.b32.xlu1 %v6438_v20, %s5670_s15 }
 0x271   : > { %3240 = vst [vmem:[#allocation4 + $0x3d9] ss:$8 sm:$0xf] %v3223_v52  ;;  %3142 = vrot.lane.b32.xlu2 %v6900_v55, %s5663_s27 }
 0x272   : > { %2546 = vrot.lane.b32.xlu0 %v6438_v20, %s8801_s14  ;;  %3241 = vst [vmem:[#allocation4 + $0x3d9] ss:$8 sm:$0xf0] %v3223_v52  ;;  %v6906_v59 = vpop.permute.xlu1 %3140 }
 0x273   : > { %1677 = vst.msk [vmem:[#allocation4 + $0x141] ss:$8 sm:$0x1] %vm6609_vm15, %v1654_v53  ;;  %v3151_v58 = vrot.slane %v6906_v59, 1  ;;  %v6914_v61 = vpop.permute.xlu2 %1701 }
 0x274   : > { %v6912_v60 = vpop.permute.xlu0 %2877  ;;  %v1708_v1 = vrot.slane %v6914_v61, 1 }
 0x275   : > { %v2888_v20 = vrot.slane %v6912_v60, 1  ;;  %v3156_v3 = vsel %vm1642_vm14, %v3150_v38, %v3151_v58 }
 0x276   : > { %v3157_v6 = vsel %vm1437_vm8, %v6811_v49, %v3156_v3  ;;  %v1720_v10 = vsel %vm1710_vm9, %v6914_v61, %v1708_v1  ;;  %v2821_v49 = vrot.slane %v6830_v62, 1 }
 0x277   : > { %v2893_v7 = vsel %vm1642_vm14, %v2887_v0, %v2888_v20  ;;  %3174 = vst [vmem:[#allocation4 + $0x3d8] ss:$8 sm:$0xf] %v3157_v6 }
 0x278   : > { %v2895_v4 = vsel %vm8712_vm6, %v6679_v18, %v2893_v7  ;;  %3175 = vst [vmem:[#allocation4 + $0x3d8] ss:$8 sm:$0xf0] %v3157_v6  ;;  %2548 = vrot.lane.b32.xlu1 %v6649_v15, %s8801_s14  ;;  %vm8727_vm6 = vcmask 973824  }
 0x279   : > { %2912 = vst [vmem:[#allocation4 + $0x294] ss:$8 sm:$0xf] %v2895_v4  ;;  %2615 = vrot.lane.b32.xlu2 %v6935_v22, %s8720_s19 }
 0x27a   : > { %3207 = vrot.lane.b32.xlu0 %v6900_v55, %s8726_s30  ;;  %2913 = vst [vmem:[#allocation4 + $0x294] ss:$8 sm:$0xf0] %v2895_v4  ;;  %v6941_v18 = vpop.permute.xlu1 %2811 }
 0x27b   : > { %1743 = vst.msk [vmem:[#allocation4 + $0x142] ss:$8 sm:$0x1] %vm6609_vm15, %v1720_v10  ;;  %v2822_v15 = vrot.slane %v6941_v18, 1  ;;  %v6947_v37 = vpop.permute.xlu2 %1767 }
 0x27c   : > { %v1631_v19 = vpop.permute.xlu0 %1630  ;;  %v1774_v31 = vrot.slane %v6947_v37, 1 }
 0x27d   : > { %v1639_v29 = vrot.slane %v1631_v19, 1  ;;  %v2827_v32 = vsel %vm1642_vm14, %v2821_v49, %v2822_v15 }
 0x27e   : > { %v2829_v33 = vsel %vm8727_vm6, %v6830_v62, %v2827_v32  ;;  %v3446_v41 = vld [vmem:[#allocation4 + $0x3d8] sm:$0x7]  ;;  %v3448_v45 = vld [vmem:[#allocation4 + $0x3e8] sm:$0x7]  ;;  %v3449_v48 = vld [vmem:[#allocation4 + $0x3f0] sm:$0x7]  ;;  %v1786_v62 = vsel %vm1776_vm10, %v6947_v37, %v1774_v31 }
 0x27f   : > { %v1648_v26 = vsel %vm1642_vm14, %v1638_v54, %v1639_v29  ;;  %2846 = vst [vmem:[#allocation4 + $0x293] ss:$8 sm:$0xf] %v2829_v33  ;;  %5305 = vmatpush.msk.msra.mxu0 %vm3508_vm11, %v3446_v41  ;;  %5431 = vmatpush.msk.msra.mxu1 %vm3508_vm11, %v3446_v41 }
 0x280   : > { %v1649_v21 = vsel %vm1644_vm1, %v6726_v47, %v1648_v26  ;;  %2847 = vst [vmem:[#allocation4 + $0x293] ss:$8 sm:$0xf0] %v2829_v33  ;;  %5311 = vmatpush.msk.msra.mxu2 %vm3508_vm11, %v3448_v45  ;;  %5314 = vmatpush.msk.msra.mxu3 %vm3508_vm11, %v3449_v48 }
 0x281   : > { %1668 = vst [vmem:[#allocation4 + $0x81] ss:$8 sm:$0xf] %v1649_v21  ;;  %3273 = vrot.lane.b32.xlu1 %v6900_v55, %s8728_s10  ;;  %2813 = vrot.lane.b32.xlu2 %v6900_v55, %s8714_s24  ;;  %s8802_s24 = smov 120  }
 0x282   : > { %2681 = vrot.lane.b32.xlu0 %v6935_v22, %s8722_s29  ;;  %1669 = vst [vmem:[#allocation4 + $0x81] ss:$8 sm:$0xf0] %v1649_v21  ;;  %v1633_v47 = vpop.permute.xlu1 %1632 }
 0x283   : > { %1809 = vst.msk [vmem:[#allocation4 + $0x143] ss:$8 sm:$0x1] %vm6609_vm15, %v1786_v62  ;;  %v1640_v54 = vrot.slane %v1633_v47, 1  ;;  %v6976_v53 = vpop.permute.xlu2 %1833 }
 0x284   : > { %v1698_v52 = vpop.permute.xlu0 %1697  ;;  %v1840_v10 = vrot.slane %v6976_v53, 1 }
 0x285   : > { %v1706_v38 = vrot.slane %v1698_v52, 1  ;;  %v1650_v0 = vsel %vm1642_vm14, %v1639_v29, %v1640_v54  ;;  %v1652_v3 = vsel %vm1642_vm14, %v1640_v54, %v1641_v43 }
 0x286   : > { %v1651_v6 = vsel %vm1644_vm1, %v1631_v19, %v1650_v0  ;;  %v1653_v7 = vsel %vm1644_vm1, %v1633_v47, %v1652_v3  ;;  %vm2170_vm1 = vcmask 490496  }
 0x287   : > { %v1714_v4 = vsel %vm1642_vm14, %v1705_v2, %v1706_v38  ;;  %1671 = vst [vmem:[#allocation4 + $0xc1] ss:$8 sm:$0xf] %v1651_v6  ;;  %v1852_v2 = vsel %vm1842_vm7, %v6976_v53, %v1840_v10 }
 0x288   : > { %1672 = vst [vmem:[#allocation4 + $0xc1] ss:$8 sm:$0xf0] %v1651_v6  ;;  %v1715_v49 = vsel %vm1710_vm9, %v6740_v57, %v1714_v4 }
 0x289   : > { %1674 = vst [vmem:[#allocation4 + $0x101] ss:$8 sm:$0xf] %v1653_v7  ;;  %2747 = vrot.lane.b32.xlu1 %v6900_v55, %s8802_s24  ;;  %3011 = vrot.lane.b32.xlu2 %v6900_v55, %s8716_s17  ;;  %s8803_s17 = smov 102  }
 0x28a   : > { %2879 = vrot.lane.b32.xlu0 %v6900_v55, %s5681_s16  ;;  %1675 = vst [vmem:[#allocation4 + $0x101] ss:$8 sm:$0xf0] %v1653_v7  ;;  %v1700_v11 = vpop.permute.xlu1 %1699 }
 0x28b   : > { %1734 = vst [vmem:[#allocation4 + $0x82] ss:$8 sm:$0xf] %v1715_v49  ;;  %v1707_v43 = vrot.slane %v1700_v11, 1  ;;  %v7000_v19 = vpop.permute.xlu2 %1899 }
 0x28c   : > { %v1764_v57 = vpop.permute.xlu0 %1763  ;;  %1735 = vst [vmem:[#allocation4 + $0x82] ss:$8 sm:$0xf0] %v1715_v49  ;;  %v1906_v48 = vrot.slane %v7000_v19, 1 }
 0x28d   : > { %v1772_v29 = vrot.slane %v1764_v57, 1  ;;  %1875 = vst.msk [vmem:[#allocation4 + $0x144] ss:$8 sm:$0x1] %vm6609_vm15, %v1852_v2  ;;  %v1716_v32 = vsel %vm1642_vm14, %v1706_v38, %v1707_v43  ;;  %v1718_v33 = vsel %vm1642_vm14, %v1707_v43, %v1708_v1 }
 0x28e   : > { %v1717_v26 = vsel %vm1710_vm9, %v1698_v52, %v1716_v32  ;;  %v1719_v41 = vsel %vm1710_vm9, %v1700_v11, %v1718_v33  ;;  %vm2236_vm9 = vcmask 482304  }
 0x28f   : > { %v1780_v45 = vsel %vm1642_vm14, %v1771_v23, %v1772_v29  ;;  %1737 = vst [vmem:[#allocation4 + $0xc2] ss:$8 sm:$0xf] %v1717_v26  ;;  %v1917_v23 = vsel %vm1515_vm5, %v7000_v19, %v1906_v48 }
 0x290   : > { %1738 = vst [vmem:[#allocation4 + $0xc2] ss:$8 sm:$0xf0] %v1717_v26  ;;  %v1781_v21 = vsel %vm1776_vm10, %v6757_v5, %v1780_v45 }
 0x291   : > { %1740 = vst [vmem:[#allocation4 + $0x102] ss:$8 sm:$0xf] %v1719_v41  ;;  %2945 = vrot.lane.b32.xlu1 %v6900_v55, %s8803_s17  ;;  %2155 = vrot.lane.b32.xlu2 %v6935_v22, %s8732_s26 }
 0x292   : > { %3077 = vrot.lane.b32.xlu0 %v6900_v55, %s5665_s9  ;;  %1741 = vst [vmem:[#allocation4 + $0x102] ss:$8 sm:$0xf0] %v1719_v41  ;;  %v1766_v61 = vpop.permute.xlu1 %1765 }
 0x293   : > { %1800 = vst [vmem:[#allocation4 + $0x83] ss:$8 sm:$0xf] %v1781_v21  ;;  %v1773_v1 = vrot.slane %v1766_v61, 1  ;;  %v7026_v62 = vpop.permute.xlu2 %1964 }
 0x294   : > { %v1830_v5 = vpop.permute.xlu0 %1829  ;;  %1801 = vst [vmem:[#allocation4 + $0x83] ss:$8 sm:$0xf0] %v1781_v21  ;;  %v1971_v3 = vrot.slane %v7026_v62, 1 }
 0x295   : > { %v1838_v47 = vrot.slane %v1830_v5, 1  ;;  %1940 = vst.msk [vmem:[#allocation4 + $0x145] ss:$8 sm:$0x1] %vm6609_vm15, %v1917_v23  ;;  %v1782_v55 = vsel %vm1642_vm14, %v1772_v29, %v1773_v1  ;;  %v1784_v54 = vsel %vm1642_vm14, %v1773_v1, %v1774_v31  ;;  %v7091_v1 = vld [vmem:[#allocation3 + $0x1d] sm:$0xff] }
 0x296   : > { %v1783_v52 = vsel %vm1776_vm10, %v1764_v57, %v1782_v55  ;;  %v1785_v38 = vsel %vm1776_vm10, %v1766_v61, %v1784_v54  ;;  %vm8733_vm10 = vcmask 474112  }
 0x297   : > { %v1846_v0 = vsel %vm1642_vm14, %v1837_v34, %v1838_v47  ;;  %1803 = vst [vmem:[#allocation4 + $0xc3] ss:$8 sm:$0xf] %v1783_v52  ;;  %v1982_v34 = vsel %vm1463_vm12, %v7026_v62, %v1971_v3 }
 0x298   : > { %1804 = vst [vmem:[#allocation4 + $0xc3] ss:$8 sm:$0xf0] %v1783_v52  ;;  %v1847_v6 = vsel %vm1842_vm7, %v6775_v28, %v1846_v0  ;;  %v7112_v0 = vld [vmem:[#allocation3 + $0x1a] sm:$0xff] }
 0x299   : > { %1806 = vst [vmem:[#allocation4 + $0x103] ss:$8 sm:$0xf] %v1785_v38  ;;  %2089 = vrot.lane.b32.xlu1 %v6623_v50, %s8731_s18  ;;  %2353 = vrot.lane.b32.xlu2 %v6935_v22, %s8718_s11  ;;  %s8804_s11 = smov 41  }
 0x29a   : > { %2221 = vrot.lane.b32.xlu0 %v6935_v22, %s8730_s8  ;;  %1807 = vst [vmem:[#allocation4 + $0x103] ss:$8 sm:$0xf0] %v1785_v38  ;;  %v1832_v37 = vpop.permute.xlu1 %1831 }
 0x29b   : > { %1866 = vst [vmem:[#allocation4 + $0x84] ss:$8 sm:$0xf] %v1847_v6  ;;  %v1839_v31 = vrot.slane %v1832_v37, 1  ;;  %v7052_v7 = vpop.permute.xlu2 %2029 }
 0x29c   : > { %v1896_v28 = vpop.permute.xlu0 %1895  ;;  %1867 = vst [vmem:[#allocation4 + $0x84] ss:$8 sm:$0xf0] %v1847_v6  ;;  %v2036_v57 = vrot.slane %v7052_v7, 1 }
 0x29d   : > { %v1904_v50 = vrot.slane %v1896_v28, 1  ;;  %2005 = vst.msk [vmem:[#allocation4 + $0x146] ss:$8 sm:$0x1] %vm6609_vm15, %v1982_v34  ;;  %v1848_v4 = vsel %vm1642_vm14, %v1838_v47, %v1839_v31  ;;  %v1850_v49 = vsel %vm1642_vm14, %v1839_v31, %v1840_v10 }
 0x29e   : > { %v1849_v2 = vsel %vm1842_vm7, %v1830_v5, %v1848_v4  ;;  %v1851_v11 = vsel %vm1842_vm7, %v1832_v37, %v1850_v49  ;;  %v2048_v53 = vsel %vm2038_vm3, %v7052_v7, %v2036_v57  ;;  %vm8729_vm7 = vcmask 343040  }
 0x29f   : > { %v1911_v43 = vsel %vm1642_vm14, %v1903_v46, %v1904_v50  ;;  %1869 = vst [vmem:[#allocation4 + $0xc4] ss:$8 sm:$0xf] %v1849_v2 }
 0x2a0   : > { %1870 = vst [vmem:[#allocation4 + $0xc4] ss:$8 sm:$0xf0] %v1849_v2  ;;  %v1912_v29 = vsel %vm1515_vm5, %v6794_v40, %v1911_v43  ;;  %v3085_v2 = vrot.slane %v6851_v14, 1 }
 0x2a1   : > { %1872 = vst [vmem:[#allocation4 + $0x104] ss:$8 sm:$0xf] %v1851_v11  ;;  %2287 = vrot.lane.b32.xlu1 %v6935_v22, %s8724_s13  ;;  %2550 = vrot.lane.b32.xlu2 %v6935_v22, %s8801_s14 }
 0x2a2   : > { %2419 = vrot.lane.b32.xlu0 %v6935_v22, %s8804_s11  ;;  %1873 = vst [vmem:[#allocation4 + $0x104] ss:$8 sm:$0xf0] %v1851_v11  ;;  %v1898_v46 = vpop.permute.xlu1 %1897 }
 0x2a3   : > { %1931 = vst [vmem:[#allocation4 + $0x85] ss:$8 sm:$0xf] %v1912_v29  ;;  %v1905_v10 = vrot.slane %v1898_v46, 1  ;;  %v7076_v33 = vpop.permute.xlu2 %2087 }
 0x2a4   : > { %v1961_v32 = vpop.permute.xlu0 %1960  ;;  %1932 = vst [vmem:[#allocation4 + $0x85] ss:$8 sm:$0xf0] %v1912_v29 }
 0x2a5   : > { %v1969_v40 = vrot.slane %v1961_v32, 1  ;;  %2071 = vst.msk [vmem:[#allocation4 + $0x147] ss:$8 sm:$0x1] %vm6609_vm15, %v2048_v53  ;;  %v1913_v26 = vsel %vm1642_vm14, %v1904_v50, %v1905_v10  ;;  %v1915_v41 = vsel %vm1642_vm14, %v1905_v10, %v1906_v48  ;;  %v2098_v10 = vrot.slane %v7076_v33, 1 }
 0x2a6   : > { %v1914_v45 = vsel %vm1515_vm5, %v1896_v28, %v1913_v26  ;;  %v1916_v21 = vsel %vm1515_vm5, %v1898_v46, %v1915_v41  ;;  %vm2104_vm5 = vcmask 736256  }
 0x2a7   : > { %v1976_v23 = vsel %vm1642_vm14, %v1968_v56, %v1969_v40  ;;  %1934 = vst [vmem:[#allocation4 + $0xc5] ss:$8 sm:$0xf] %v1914_v45 }
 0x2a8   : > { %1935 = vst [vmem:[#allocation4 + $0xc5] ss:$8 sm:$0xf0] %v1914_v45  ;;  %v1977_v61 = vsel %vm1463_vm12, %v6813_v51, %v1976_v23 }
 0x2a9   : > { %1937 = vst [vmem:[#allocation4 + $0x105] ss:$8 sm:$0xf] %v1916_v21  ;;  %2485 = vrot.lane.b32.xlu1 %v6935_v22, %s5670_s15  ;;  %3275 = vrot.lane.b32.xlu2 %v7091_v1, %s8728_s10 }
 0x2aa   : > { %3144 = vrot.lane.b32.xlu0 %v7091_v1, %s5663_s27  ;;  %1938 = vst [vmem:[#allocation4 + $0x105] ss:$8 sm:$0xf0] %v1916_v21  ;;  %v1963_v19 = vpop.permute.xlu1 %1962 }
 0x2ab   : > { %1996 = vst [vmem:[#allocation4 + $0x86] ss:$8 sm:$0xf] %v1977_v61  ;;  %v1970_v56 = vrot.slane %v1963_v19, 1  ;;  %v7099_v5 = vpop.permute.xlu2 %2217 }
 0x2ac   : > { %v2026_v48 = vpop.permute.xlu0 %2025  ;;  %1997 = vst [vmem:[#allocation4 + $0x86] ss:$8 sm:$0xf0] %v1977_v61 }
 0x2ad   : > { %v2034_v51 = vrot.slane %v2026_v48, 1  ;;  %v1978_v47 = vsel %vm1642_vm14, %v1969_v40, %v1970_v56  ;;  %v1980_v22 = vsel %vm1642_vm14, %v1970_v56, %v1971_v3 }
 0x2ae   : > { %v1979_v55 = vsel %vm1463_vm12, %v1961_v32, %v1978_v47  ;;  %v1981_v54 = vsel %vm1463_vm12, %v1963_v19, %v1980_v22  ;;  %vm3026_vm12 = vcmask 826368  }
 0x2af   : > { %v2042_v52 = vsel %vm1642_vm14, %v2033_v9, %v2034_v51  ;;  %1999 = vst [vmem:[#allocation4 + $0xc6] ss:$8 sm:$0xf] %v1979_v55 }
 0x2b0   : > { %2000 = vst [vmem:[#allocation4 + $0xc6] ss:$8 sm:$0xf0] %v1979_v55  ;;  %v2043_v38 = vsel %vm2038_vm3, %v6832_v63, %v2042_v52 }
 0x2b1   : > { %2002 = vst [vmem:[#allocation4 + $0x106] ss:$8 sm:$0xf] %v1981_v54  ;;  %3209 = vrot.lane.b32.xlu1 %v7091_v1, %s8726_s30  ;;  %2749 = vrot.lane.b32.xlu2 %v7091_v1, %s8802_s24 }
 0x2b2   : > { %2617 = vrot.lane.b32.xlu0 %v7112_v0, %s8720_s19  ;;  %2003 = vst [vmem:[#allocation4 + $0x106] ss:$8 sm:$0xf0] %v1981_v54  ;;  %v2028_v62 = vpop.permute.xlu1 %2027  ;;  %s8805_s19 = smov 119  }
 0x2b3   : > { %2062 = vst [vmem:[#allocation4 + $0x87] ss:$8 sm:$0xf] %v2043_v38  ;;  %v2035_v9 = vrot.slane %v2028_v62, 1  ;;  %v7120_v6 = vpop.permute.xlu2 %2285 }
 0x2b4   : > { %v3008_v3 = vpop.permute.xlu0 %3007  ;;  %2063 = vst [vmem:[#allocation4 + $0x87] ss:$8 sm:$0xf0] %v2043_v38 }
 0x2b5   : > { %v2044_v63 = vsel %vm1642_vm14, %v2034_v51, %v2035_v9  ;;  %v2046_v34 = vsel %vm1642_vm14, %v2035_v9, %v2036_v57  ;;  %v3019_v7 = vrot.slane %v3008_v3, 1  ;;  %v2229_v51 = vrot.slane %v7099_v5, 1 }
 0x2b6   : > { %v2045_v37 = vsel %vm2038_vm3, %v2026_v48, %v2044_v63  ;;  %v2047_v31 = vsel %vm2038_vm3, %v2028_v62, %v2046_v34  ;;  %vm2434_vm3 = vcmask 334848  }
 0x2b7   : > { %2065 = vst [vmem:[#allocation4 + $0xc7] ss:$8 sm:$0xf] %v2045_v37 }
 0x2b8   : > { %2066 = vst [vmem:[#allocation4 + $0xc7] ss:$8 sm:$0xf0] %v2045_v37 }
 0x2b9   : > { %2068 = vst [vmem:[#allocation4 + $0x107] ss:$8 sm:$0xf] %v2047_v31  ;;  %2683 = vrot.lane.b32.xlu1 %v7112_v0, %s8722_s29  ;;  %2947 = vrot.lane.b32.xlu2 %v7091_v1, %s8803_s17  ;;  %s8806_s29 = smov 101  }
 0x2ba   : > { %2815 = vrot.lane.b32.xlu0 %v7091_v1, %s8805_s19  ;;  %2069 = vst [vmem:[#allocation4 + $0x107] ss:$8 sm:$0xf0] %v2047_v31  ;;  %v7132_v28 = vpop.permute.xlu1 %3009 }
 0x2bb   : > { %v3020_v50 = vrot.slane %v7132_v28, 1  ;;  %v7137_v49 = vpop.permute.xlu2 %2415 }
 0x2bc   : > { %v7135_v4 = vpop.permute.xlu0 %3075 }
 0x2bd   : > { %v3086_v11 = vrot.slane %v7135_v4, 1  ;;  %v3025_v43 = vsel %vm1642_vm14, %v3019_v7, %v3020_v50 }
 0x2be   : > { %v3027_v57 = vsel %vm3026_vm12, %v3008_v3, %v3025_v43  ;;  %v2296_v3 = vrot.slane %v7120_v6, 1 }
 0x2bf   : > { %v3091_v29 = vsel %vm1642_vm14, %v3085_v2, %v3086_v11  ;;  %3044 = vst [vmem:[#allocation4 + $0x296] ss:$8 sm:$0xf] %v3027_v57 }
 0x2c0   : > { %v3092_v53 = vsel %vm1489_vm2, %v6851_v14, %v3091_v29  ;;  %3045 = vst [vmem:[#allocation4 + $0x296] ss:$8 sm:$0xf0] %v3027_v57  ;;  %v7222_v57 = vld [vmem:[#allocation3 + $0x25] sm:$0xff] }
 0x2c1   : > { %3109 = vst [vmem:[#allocation4 + $0x297] ss:$8 sm:$0xf] %v3092_v53  ;;  %2881 = vrot.lane.b32.xlu1 %v7091_v1, %s5681_s16  ;;  %2091 = vrot.lane.b32.xlu2 %v6673_v17, %s8731_s18 }
 0x2c2   : > { %3013 = vrot.lane.b32.xlu0 %v7091_v1, %s8806_s29  ;;  %3110 = vst [vmem:[#allocation4 + $0x297] ss:$8 sm:$0xf0] %v3092_v53  ;;  %v2086_v46 = vpop.permute.xlu1 %2085 }
 0x2c3   : > { %v2097_v32 = vrot.slane %v2086_v46, 1  ;;  %v7157_v26 = vpop.permute.xlu2 %2483 }
 0x2c4   : > { %v2152_v40 = vpop.permute.xlu0 %2151 }
 0x2c5   : > { %v2103_v14 = vsel %vm1642_vm14, %v2097_v32, %v2098_v10  ;;  %v2163_v61 = vrot.slane %v2152_v40, 1 }
 0x2c6   : > { %v2105_v41 = vsel %vm2104_vm5, %v2086_v46, %v2103_v14 }
 0x2c7   : > { %2122 = vst [vmem:[#allocation4 + $0x148] ss:$8 sm:$0xf] %v2105_v41 }
 0x2c8   : > { %2123 = vst [vmem:[#allocation4 + $0x148] ss:$8 sm:$0xf0] %v2105_v41  ;;  %v3405_v45 = vld [vmem:[#allocation4 + $0x290] sm:$0xff]  ;;  %v3407_v21 = vld [vmem:[#allocation4 + $0x2a0] sm:$0xff]  ;;  %v3408_v23 = vld [vmem:[#allocation4 + $0x2a8] sm:$0xff] }
 0x2c9   : > { %3079 = vrot.lane.b32.xlu1 %v7091_v1, %s5665_s9  ;;  %3645 = vmatpush.msra.mxu0 %v3405_v45 }
 0x2ca   : > { %5432 = vmatpush.msra.mxu1 %v3405_v45  ;;  %3691 = vmatpush.msra.mxu2 %v3407_v21  ;;  %v7165_v17 = vpop.permute.xlu1 %2153 }
 0x2cb   : > { %3714 = vmatpush.msra.mxu3 %v3408_v23  ;;  %2157 = vrot.lane.b32.xlu0 %v7112_v0, %s8732_s26  ;;  %v2164_v19 = vrot.slane %v7165_v17, 1  ;;  %v7172_v48 = vpop.permute.xlu2 %3142 }
 0x2cc   : > { %v7170_v56 = vpop.permute.xlu0 %2219  ;;  %2289 = vrot.lane.b32.xlu2 %v7112_v0, %s8724_s13  ;;  %v3152_v47 = vrot.slane %v7172_v48, 1  ;;  %s8807_s13 = smov 42  }
 0x2cd   : > { %v2230_v1 = vrot.slane %v7170_v56, 1  ;;  %v2169_v22 = vsel %vm1642_vm14, %v2163_v61, %v2164_v19  ;;  %v2494_v61 = vrot.slane %v7157_v26, 1 }
 0x2ce   : > { %v2171_v55 = vsel %vm2170_vm1, %v2152_v40, %v2169_v22  ;;  %v3158_v52 = vsel %vm1642_vm14, %v3151_v58, %v3152_v47 }
 0x2cf   : > { %v2235_v54 = vsel %vm1642_vm14, %v2229_v51, %v2230_v1  ;;  %2188 = vst [vmem:[#allocation4 + $0x149] ss:$8 sm:$0xf] %v2171_v55  ;;  %v3159_v62 = vsel %vm1437_vm8, %v6906_v59, %v3158_v52 }
 0x2d0   : > { %v2237_v38 = vsel %vm2236_vm9, %v7099_v5, %v2235_v54  ;;  %2189 = vst [vmem:[#allocation4 + $0x149] ss:$8 sm:$0xf0] %v2171_v55 }
 0x2d1   : > { %2254 = vst [vmem:[#allocation4 + $0x14a] ss:$8 sm:$0xf] %v2237_v38  ;;  %2223 = vrot.lane.b32.xlu1 %v7112_v0, %s8730_s8 }
 0x2d2   : > { %2255 = vst [vmem:[#allocation4 + $0x14a] ss:$8 sm:$0xf0] %v2237_v38  ;;  %v2284_v9 = vpop.permute.xlu1 %2283 }
 0x2d3   : > { %3177 = vst [vmem:[#allocation4 + $0x418] ss:$8 sm:$0xf] %v3159_v62  ;;  %2355 = vrot.lane.b32.xlu0 %v7112_v0, %s8807_s13  ;;  %v2295_v58 = vrot.slane %v2284_v9, 1  ;;  %v7200_v5 = vpop.permute.xlu2 %2615 }
 0x2d4   : > { %v2350_v63 = vpop.permute.xlu0 %2349  ;;  %3178 = vst [vmem:[#allocation4 + $0x418] ss:$8 sm:$0xf0] %v3159_v62  ;;  %2487 = vrot.lane.b32.xlu2 %v7112_v0, %s5670_s15  ;;  %v2625_v59 = vrot.slane %v7200_v5, 1 }
 0x2d5   : > { %v2301_v34 = vsel %vm1642_vm14, %v2295_v58, %v2296_v3  ;;  %v2361_v43 = vrot.slane %v2350_v63, 1 }
 0x2d6   : > { %v2303_v37 = vsel %vm8733_vm10, %v2284_v9, %v2301_v34  ;;  %v2632_v31 = vsel %vm1642_vm14, %v2624_v16, %v2625_v59 }
 0x2d7   : > { %2320 = vst [vmem:[#allocation4 + $0x14b] ss:$8 sm:$0xf] %v2303_v37  ;;  %v2633_v7 = vsel %vm2630_vm13, %v6874_v36, %v2632_v31  ;;  %v2427_v36 = vrot.slane %v7137_v49, 1 }
 0x2d8   : > { %2321 = vst [vmem:[#allocation4 + $0x14b] ss:$8 sm:$0xf0] %v2303_v37 }
 0x2d9   : > { %2651 = vst [vmem:[#allocation4 + $0x2d0] ss:$8 sm:$0xf] %v2633_v7  ;;  %2421 = vrot.lane.b32.xlu1 %v7112_v0, %s8804_s11 }
 0x2da   : > { %2652 = vst [vmem:[#allocation4 + $0x2d0] ss:$8 sm:$0xf0] %v2633_v7  ;;  %v7218_v2 = vpop.permute.xlu1 %2351 }
 0x2db   : > { %2552 = vrot.lane.b32.xlu0 %v7112_v0, %s8801_s14  ;;  %v2362_v16 = vrot.slane %v7218_v2, 1  ;;  %v7231_v46 = vpop.permute.xlu2 %2813 }
 0x2dc   : > { %v7225_v29 = vpop.permute.xlu0 %2417  ;;  %3211 = vrot.lane.b32.xlu2 %v7222_v57, %s8726_s30  ;;  %v2823_v32 = vrot.slane %v7231_v46, 1  ;;  %s8808_s30 = smov 22  }
 0x2dd   : > { %v2428_v53 = vrot.slane %v7225_v29, 1  ;;  %v2367_v0 = vsel %vm1642_vm14, %v2361_v43, %v2362_v16 }
 0x2de   : > { %v2369_v40 = vsel %vm8729_vm7, %v2350_v63, %v2367_v0  ;;  %v2830_v45 = vsel %vm1642_vm14, %v2822_v15, %v2823_v32 }
 0x2df   : > { %v2433_v14 = vsel %vm1642_vm14, %v2427_v36, %v2428_v53  ;;  %2386 = vst [vmem:[#allocation4 + $0x14c] ss:$8 sm:$0xf] %v2369_v40  ;;  %v2831_v21 = vsel %vm8727_vm6, %v6941_v18, %v2830_v45  ;;  %vm8809_vm6 = vcmask 326656  }
 0x2e0   : > { %v2435_v41 = vsel %vm2434_vm3, %v7137_v49, %v2433_v14  ;;  %2387 = vst [vmem:[#allocation4 + $0x14c] ss:$8 sm:$0xf0] %v2369_v40  ;;  %v7255_v49 = vld [vmem:[#allocation3 + $0x22] sm:$0xff] }
 0x2e1   : > { %2452 = vst [vmem:[#allocation4 + $0x14d] ss:$8 sm:$0xf] %v2435_v41  ;;  %3146 = vrot.lane.b32.xlu1 %v7222_v57, %s5663_s27 }
 0x2e2   : > { %2453 = vst [vmem:[#allocation4 + $0x14d] ss:$8 sm:$0xf0] %v2435_v41  ;;  %v2482_v23 = vpop.permute.xlu1 %2481 }
 0x2e3   : > { %2849 = vst [vmem:[#allocation4 + $0x2d3] ss:$8 sm:$0xf] %v2831_v21  ;;  %3277 = vrot.lane.b32.xlu0 %v7222_v57, %s8728_s10  ;;  %v2493_v51 = vrot.slane %v2482_v23, 1  ;;  %v7259_v18 = vpop.permute.xlu2 %3011  ;;  %s8810_s10 = smov 23  }
 0x2e4   : > { %v2547_v15 = vpop.permute.xlu0 %2546  ;;  %2850 = vst [vmem:[#allocation4 + $0x2d3] ss:$8 sm:$0xf0] %v2831_v21  ;;  %2685 = vrot.lane.b32.xlu2 %v7255_v49, %s8808_s30  ;;  %v3021_v55 = vrot.slane %v7259_v18, 1 }
 0x2e5   : > { %v2499_v22 = vsel %vm1642_vm14, %v2493_v51, %v2494_v61  ;;  %v2558_v9 = vrot.slane %v2547_v15, 1 }
 0x2e6   : > { %v2500_v54 = vsel %vm8809_vm6, %v2482_v23, %v2499_v22  ;;  %v3028_v52 = vsel %vm1642_vm14, %v3020_v50, %v3021_v55  ;;  %vm8811_vm6 = vcmask 195584  }
 0x2e7   : > { %2517 = vst [vmem:[#allocation4 + $0x14e] ss:$8 sm:$0xf] %v2500_v54  ;;  %v3029_v38 = vsel %vm3026_vm12, %v7132_v28, %v3028_v52  ;;  %v3447_v52 = vld [vmem:[#allocation4 + $0x3e0] sm:$0x7] }
 0x2e8   : > { %2518 = vst [vmem:[#allocation4 + $0x14e] ss:$8 sm:$0xf0] %v2500_v54  ;;  %v3323_v54 = vld [vmem:[#allocation4] sm:$0xff] }
 0x2e9   : > { %3047 = vst [vmem:[#allocation4 + $0x2d6] ss:$8 sm:$0xf] %v3029_v38  ;;  %2619 = vrot.lane.b32.xlu1 %v7255_v49, %s8810_s10 }
 0x2ea   : > { %3048 = vst [vmem:[#allocation4 + $0x2d6] ss:$8 sm:$0xf0] %v3029_v38  ;;  %v7275_v62 = vpop.permute.xlu1 %2548  ;;  %v3450_v38 = vld [vmem:[#allocation4 + $0x3f8] sm:$0x7] }
 0x2eb   : > { %2751 = vrot.lane.b32.xlu0 %v7222_v57, %s8802_s24  ;;  %v2559_v58 = vrot.slane %v7275_v62, 1  ;;  %v7285_v50 = vpop.permute.xlu2 %2155 }
 0x2ec   : > { %v7280_v63 = vpop.permute.xlu0 %3207  ;;  %2883 = vrot.lane.b32.xlu2 %v7222_v57, %s5681_s16  ;;  %v2165_v37 = vrot.slane %v7285_v50, 1 }
 0x2ed   : > { %v3217_v28 = vrot.slane %v7280_v63, 1  ;;  %v2564_v34 = vsel %vm1642_vm14, %v2558_v9, %v2559_v58  ;;  %v3452_v9 = vld [vmem:[#allocation4 + $0x408] sm:$0x7] }
 0x2ee   : > { %v2565_v31 = vsel %vm8811_vm6, %v2547_v15, %v2564_v34  ;;  %v2172_v36 = vsel %vm1642_vm14, %v2164_v19, %v2165_v37  ;;  %vm8812_vm6 = vcmask 179200  }
 0x2ef   : > { %v3224_v7 = vsel %vm1642_vm14, %v3216_v42, %v3217_v28  ;;  %2582 = vst [vmem:[#allocation4 + $0x14f] ss:$8 sm:$0xf] %v2565_v31  ;;  %v2173_v0 = vsel %vm2170_vm1, %v7165_v17, %v2172_v36 }
 0x2f0   : > { %v3225_v43 = vsel %vm3222_vm4, %v6878_v8, %v3224_v7  ;;  %2583 = vst [vmem:[#allocation4 + $0x14f] ss:$8 sm:$0xf0] %v2565_v31  ;;  %v3453_v31 = vld [vmem:[#allocation4 + $0x410] sm:$0x7] }
 0x2f1   : > { %3243 = vst [vmem:[#allocation4 + $0x419] ss:$8 sm:$0xf] %v3225_v43  ;;  %2817 = vrot.lane.b32.xlu1 %v7222_v57, %s8805_s19 }
 0x2f2   : > { %3244 = vst [vmem:[#allocation4 + $0x419] ss:$8 sm:$0xf0] %v3225_v43 }
 0x2f3   : > { %2191 = vst [vmem:[#allocation4 + $0x189] ss:$8 sm:$0xf] %v2173_v0  ;;  %2949 = vrot.lane.b32.xlu0 %v7222_v57, %s8803_s17  ;;  %v7310_v8 = vpop.permute.xlu1 %3273  ;;  %v7318_v40 = vpop.permute.xlu2 %2353 }
 0x2f4   : > { %v7312_v42 = vpop.permute.xlu0 %2681  ;;  %2192 = vst [vmem:[#allocation4 + $0x189] ss:$8 sm:$0xf0] %v2173_v0  ;;  %3081 = vrot.lane.b32.xlu2 %v7222_v57, %s5665_s9  ;;  %v3283_v19 = vrot.slane %v7310_v8, 1  ;;  %v2363_v14 = vrot.slane %v7318_v40, 1  ;;  %v3406_v0 = vld [vmem:[#allocation4 + $0x298] sm:$0xff] }
 0x2f5   : > { %v2691_v17 = vrot.slane %v7312_v42, 1 }
 0x2f6   : > { %v3290_v41 = vsel %vm1642_vm14, %v3282_v27, %v3283_v19  ;;  %v3364_v21 = vld [vmem:[#allocation4 + $0x148] sm:$0xff]  ;;  %v3366_v23 = vld [vmem:[#allocation4 + $0x158] sm:$0xff]  ;;  %v3367_v51 = vld [vmem:[#allocation4 + $0x160] sm:$0xff]  ;;  %v2370_v27 = vsel %vm1642_vm14, %v2362_v16, %v2363_v14 }
 0x2f7   : > { %v2698_v45 = vsel %vm1642_vm14, %v2690_v25, %v2691_v17  ;;  %v3291_v15 = vsel %vm3288_vm0, %v6688_v24, %v3290_v41  ;;  %3646 = vmatpush.msra.mxu0 %v3364_v21  ;;  %5433 = vmatpush.msra.mxu1 %v3364_v21  ;;  %v2077_v25 = vld [vmem:[#allocation3 + $0x20] sm:$0xff]  ;;  %v2371_v24 = vsel %vm8729_vm7, %v7218_v2, %v2370_v27  ;;  %vm8814_vm7 = vcmask 965632  }
 0x2f8   : > { %v2699_v22 = vsel %vm8812_vm6, %v6849_v12, %v2698_v45  ;;  %3309 = vst [vmem:[#allocation4 + $0x41a] ss:$8 sm:$0xf] %v3291_v15  ;;  %3692 = vmatpush.msra.mxu2 %v3366_v23  ;;  %3715 = vmatpush.msra.mxu3 %v3367_v51  ;;  %v3325_v12 = vld [vmem:[#allocation4 + $0x10] sm:$0xff]  ;;  %v3326_v16 = vld [vmem:[#allocation4 + $0x18] sm:$0xff]  ;;  %v3411_v23 = vld [vmem:[#allocation4 + $0x2c0] sm:$0xff] }
 0x2f9   : > { %3310 = vst [vmem:[#allocation4 + $0x41a] ss:$8 sm:$0xf0] %v3291_v15  ;;  %3015 = vrot.lane.b32.xlu1 %v7222_v57, %s8806_s29  ;;  %3647 = vmatpush.msra.mxu0 %v3323_v54  ;;  %v3409_v21 = vld [vmem:[#allocation4 + $0x2b0] sm:$0xff]  ;;  %vm8813_vm6 = vcmask 982016  }
 0x2fa   : > { %2717 = vst [vmem:[#allocation4 + $0x2d1] ss:$8 sm:$0xf] %v2699_v22  ;;  %5434 = vmatpush.msra.mxu1 %v3323_v54  ;;  %3693 = vmatpush.msra.mxu2 %v3325_v12  ;;  %v3365_v27 = vld [vmem:[#allocation4 + $0x150] sm:$0xff]  ;;  %v3327_v54 = vld [vmem:[#allocation4 + $0x20] sm:$0xff] }
 0x2fb   : > { %2718 = vst [vmem:[#allocation4 + $0x2d1] ss:$8 sm:$0xf0] %v2699_v22  ;;  %2093 = vrot.lane.b32.xlu0 %v2077_v25, %s8731_s18  ;;  %3716 = vmatpush.msra.mxu3 %v3326_v16  ;;  %v7345_v34 = vpop.permute.xlu1 %2747  ;;  %v7354_v43 = vpop.permute.xlu2 %2550  ;;  %v3412_v22 = vld [vmem:[#allocation4 + $0x2c8] sm:$0xff]  ;;  %v3329_v12 = vld [vmem:[#allocation4 + $0x30] sm:$0xff] }
 0x2fc   : > { %v7347_v2 = vpop.permute.xlu0 %2879  ;;  %2389 = vst [vmem:[#allocation4 + $0x18c] ss:$8 sm:$0xf] %v2371_v24  ;;  %2225 = vrot.lane.b32.xlu2 %v7255_v49, %s8730_s8  ;;  %v2757_v57 = vrot.slane %v7345_v34, 1  ;;  %5308 = vmatpush.msk.msrb.mxu1 %vm3508_vm11, %v3447_v52  ;;  %v2560_v36 = vrot.slane %v7354_v43, 1  ;;  %s5592_s8 = scalar_lea.hbm %s8696_s5, 82 }
 0x2fd   : > { %v2889_v7 = vrot.slane %v7347_v2, 1  ;;  %2390 = vst [vmem:[#allocation4 + $0x18c] ss:$8 sm:$0xf0] %v2371_v24  ;;  %5317 = vmatpush.msk.msrb.mxu0 %vm3508_vm11, %v3450_v38  ;;  %5323 = vmatpush.msk.msrb.mxu2 %vm3508_vm11, %v3452_v9  ;;  %v3324_v24 = vld [vmem:[#allocation4 + $0x8] sm:$0xff]  ;;  %v3330_v38 = vld [vmem:[#allocation4 + $0x38] sm:$0xff] }
 0x2fe   : > { %v2764_v41 = vsel %vm1642_vm14, %v2756_v35, %v2757_v57  ;;  %5326 = vmatpush.msk.msrb.mxu3 %vm3508_vm11, %v3453_v31  ;;  %3668 = vmatpush.msrb.mxu1 %v3406_v0  ;;  %v2566_v35 = vsel %vm1642_vm14, %v2559_v58, %v2560_v36  ;;  %v3371_v58 = vld [vmem:[#allocation4 + $0x180] sm:$0xff] }
 0x2ff   : > { %v2896_v45 = vsel %vm1642_vm14, %v2888_v20, %v2889_v7  ;;  %v2765_v51 = vsel %vm8813_vm6, %v6698_v30, %v2764_v41  ;;  %3737 = vmatpush.msrb.mxu0 %v3409_v21  ;;  %3783 = vmatpush.msrb.mxu2 %v3411_v23  ;;  %v7382_v20 = vld [vmem:[%s8692_s1 + $0x8] sm:$0xff]  ;;  %vm8815_vm6 = vcmask 195584   ;;  %v3451_v23 = vld [vmem:[#allocation4 + $0x400] sm:$0x7] }
 0x300   : > { %v2897_v15 = vsel %vm8814_vm7, %v6912_v60, %v2896_v45  ;;  %2783 = vst [vmem:[#allocation4 + $0x2d2] ss:$8 sm:$0xf] %v2765_v51  ;;  %3806 = vmatpush.msrb.mxu3 %v3412_v22  ;;  %3669 = vmatpush.msrb.mxu1 %v3365_v27  ;;  %v3368_v30 = vld [vmem:[#allocation4 + $0x168] sm:$0xff]  ;;  %v3370_v60 = vld [vmem:[#allocation4 + $0x178] sm:$0xff]  ;;  %vm3501_vm7 = vcmask 220160   ;;  %v2567_v25 = vsel %vm8815_vm6, %v7275_v62, %v2566_v35 }
 0x301   : > { %2784 = vst [vmem:[#allocation4 + $0x2d2] ss:$8 sm:$0xf0] %v2765_v51  ;;  %3738 = vmatpush.msrb.mxu0 %v3368_v30  ;;  %3784 = vmatpush.msrb.mxu2 %v3370_v60  ;;  %v7393_v62 = vld [vmem:[%s8692_s1] sm:$0xff]  ;;  %v3454_v51 = vld [vmem:[#allocation4 + $0x418] sm:$0x7] }
 0x302   : > { %2915 = vst [vmem:[#allocation4 + $0x2d4] ss:$8 sm:$0xf] %v2897_v15  ;;  %3807 = vmatpush.msrb.mxu3 %v3371_v58  ;;  %2159 = vrot.lane.b32.xlu1 %v7255_v49, %s8732_s26  ;;  %s8816_s26 = smov 58   ;;  %vm8817_vm6 = vcmask 834560  }
 0x303   : > { %2916 = vst [vmem:[#allocation4 + $0x2d4] ss:$8 sm:$0xf0] %v2897_v15  ;;  %5307 = vmatmul.msk.f32.vlgmr.msra.gmra.mxu1 %vm3501_vm7, %v7382_v20  ;;  %3739 = vmatpush.msrb.mxu0 %v3327_v54  ;;  %v7395_v52 = vpop.permute.xlu1 %2945  ;;  %v7401_v0 = vpop.permute.xlu2 %3275  ;;  %v3456_v15 = vld [vmem:[#allocation4 + $0x428] sm:$0x7] }
 0x304   : > { %v7397_v16 = vpop.permute.xlu0 %3077  ;;  %2585 = vst [vmem:[#allocation4 + $0x18f] ss:$8 sm:$0xf] %v2567_v25  ;;  %3670 = vmatpush.msrb.mxu1 %v3324_v24  ;;  %3785 = vmatpush.msrb.mxu2 %v3329_v12  ;;  %v2955_v9 = vrot.slane %v7395_v52, 1  ;;  %v3284_v41 = vrot.slane %v7401_v0, 1  ;;  %v3328_v54 = vld [vmem:[#allocation4 + $0x28] sm:$0xff] }
 0x305   : > { %v3087_v31 = vrot.slane %v7397_v16, 1  ;;  %2586 = vst [vmem:[#allocation4 + $0x18f] ss:$8 sm:$0xf0] %v2567_v25  ;;  %3808 = vmatpush.msrb.mxu3 %v3330_v38  ;;  %2291 = vrot.lane.b32.xlu0 %v7255_v49, %s8816_s26  ;;  %v3457_v22 = vld [vmem:[#allocation4 + $0x430] sm:$0x7] }
 0x306   : > { %2423 = vrot.lane.b32.xlu2 %v7255_v49, %s8804_s11  ;;  %5306 = vmatmul.msk.f32.vlgmr.msra.gmra.mxu0 %vm3501_vm7, %v7393_v62  ;;  %v2962_v45 = vsel %vm1642_vm14, %v2954_v44, %v2955_v9  ;;  %v3131_v27 = vld [vmem:[#allocation3 + $0x2d] sm:$0x3]  ;;  %v3455_v12 = vld [vmem:[#allocation4 + $0x420] sm:$0x7] }
 0x307   : > { %v3093_v21 = vsel %vm1642_vm14, %v3086_v11, %v3087_v31  ;;  %5312 = vmatmul.msk.f32.vlgmr.msra.gmra.mxu2 %vm3501_vm7, %v7393_v62  ;;  %5315 = vmatmul.msk.f32.vlgmr.msra.gmra.mxu3 %vm3501_vm7, %v7393_v62  ;;  %v2963_v35 = vsel %vm8817_vm6, %v6712_v39, %v2962_v45  ;;  %v3292_v11 = vsel %vm1642_vm14, %v3283_v19, %v3284_v41  ;;  %v3410_v39 = vld [vmem:[#allocation4 + $0x2b8] sm:$0xff]  ;;  %v3369_v19 = vld [vmem:[#allocation4 + $0x170] sm:$0xff]  ;;  %vm8818_vm6 = vcmask 982016  }
 0x308   : > { %v3094_v44 = vsel %vm1489_vm2, %v7135_v4, %v3093_v21  ;;  %5320 = vmatpush.msk.msra.mxu1 %vm3508_vm11, %v3451_v23  ;;  %5329 = vmatpush.msk.msra.mxu0 %vm3508_vm11, %v3454_v51  ;;  %2981 = vst [vmem:[#allocation4 + $0x2d5] ss:$8 sm:$0xf] %v2963_v35  ;;  %v3293_v4 = vsel %vm3288_vm0, %v7310_v8, %v3292_v11 }
 0x309   : > { %5335 = vmatpush.msk.msra.mxu2 %vm3508_vm11, %v3456_v15  ;;  %5338 = vmatpush.msk.msra.mxu3 %vm3508_vm11, %v3457_v22  ;;  %2982 = vst [vmem:[#allocation4 + $0x2d5] ss:$8 sm:$0xf0] %v2963_v35  ;;  %v3196_v15 = vld [vmem:[#allocation3 + $0x2d] sm:$0x3] }
 0x30a   : > { %3112 = vst [vmem:[#allocation4 + $0x2d7] ss:$8 sm:$0xf] %v3094_v44  ;;  %3760 = vmatpush.msra.mxu1 %v3410_v39  ;;  %2357 = vrot.lane.b32.xlu1 %v7255_v49, %s8807_s13 }
 0x30b   : > { %3113 = vst [vmem:[#allocation4 + $0x2d7] ss:$8 sm:$0xf0] %v3094_v44  ;;  %5309 = vmatmul.msk.f32.vlgmr.msrb.gmra.mxu1 %vm3501_vm7, %v7393_v62  ;;  %v7443_v30 = vpop.permute.xlu1 %2089  ;;  %v7449_v58 = vpop.permute.xlu2 %2749 }
 0x30c   : > { %v7445_v60 = vpop.permute.xlu0 %2221  ;;  %3312 = vst [vmem:[#allocation4 + $0x45a] ss:$8 sm:$0xf] %v3293_v4  ;;  %3761 = vmatpush.msra.mxu1 %v3369_v19  ;;  %v2099_v25 = vrot.slane %v7443_v30, 1  ;;  %v2758_v24 = vrot.slane %v7449_v58, 1 }
 0x30d   : > { %v2231_v8 = vrot.slane %v7445_v60, 1  ;;  %3313 = vst [vmem:[#allocation4 + $0x45a] ss:$8 sm:$0xf0] %v3293_v4  ;;  %2489 = vrot.lane.b32.xlu0 %v7255_v49, %s5670_s15 }
 0x30e   : > { %3762 = vmatpush.msra.mxu1 %v3328_v54  ;;  %3148 = vrot.lane.b32.xlu2 %v3131_v27, %s5663_s27  ;;  %v2106_v38 = vsel %vm1642_vm14, %v2098_v10, %v2099_v25  ;;  %v2766_v10 = vsel %vm1642_vm14, %v2757_v57, %v2758_v24  ;;  %s8819_s27 = smov 83  }
 0x30f   : > { %v2238_v45 = vsel %vm1642_vm14, %v2230_v1, %v2231_v8  ;;  %v2107_v21 = vsel %vm2104_vm5, %v7076_v33, %v2106_v38  ;;  %5313 = vmatmul.msk.f32.gmra.mxu2 %vm3501_vm7, %v7382_v20  ;;  %5316 = vmatmul.msk.f32.gmra.mxu3 %vm3501_vm7, %v7382_v20  ;;  %v2767_v33 = vsel %vm8818_vm6, %v7345_v34, %v2766_v10  ;;  %v3262_v38 = vld [vmem:[#allocation3 + $0x2d] sm:$0x3]  ;;  %vm8820_vm6 = vcmask 834560  }
 0x310   : > { %5332 = vmatpush.msk.msrb.mxu1 %vm3508_vm11, %v3455_v12  ;;  %v2239_v23 = vsel %vm2236_vm9, %v7170_v56, %v2238_v45  ;;  %2125 = vst [vmem:[#allocation4 + $0x188] ss:$8 sm:$0xf] %v2107_v21  ;;  %5318 = vmatmul.msk.f32.vlgmr.msrb.gmra.mxu0 %vm3501_vm7, %v7393_v62 }
 0x311   : > { %2126 = vst [vmem:[#allocation4 + $0x188] ss:$8 sm:$0xf0] %v2107_v21  ;;  %v3413_v56 = vld [vmem:[#allocation4 + $0x2d0] sm:$0xff]  ;;  %v3414_v1 = vld [vmem:[#allocation4 + $0x2d8] sm:$0xff]  ;;  %v3415_v51 = vld [vmem:[#allocation4 + $0x2e0] sm:$0xff] }
 0x312   : > { %2257 = vst [vmem:[#allocation4 + $0x18a] ss:$8 sm:$0xf] %v2239_v23  ;;  %2554 = vrot.lane.b32.xlu1 %v7255_v49, %s8801_s14  ;;  %3829 = vmatpush.msra.mxu0 %v3413_v56  ;;  %v3416_v57 = vld [vmem:[#allocation4 + $0x2e8] sm:$0xff]  ;;  %v2604_v49 = vld [vmem:[#allocation3 + $0x2a] sm:$0x3] }
 0x313   : > { %2258 = vst [vmem:[#allocation4 + $0x18a] ss:$8 sm:$0xf0] %v2239_v23  ;;  %3852 = vmatpush.msrb.mxu1 %v3414_v1  ;;  %3875 = vmatpush.msra.mxu2 %v3415_v51  ;;  %v7485_v35 = vpop.permute.xlu1 %2287  ;;  %v7491_v22 = vpop.permute.xlu2 %2947 }
 0x314   : > { %v7487_v44 = vpop.permute.xlu0 %2419  ;;  %2786 = vst [vmem:[#allocation4 + $0x312] ss:$8 sm:$0xf] %v2767_v33  ;;  %3898 = vmatpush.msra.mxu3 %v3416_v57  ;;  %v2297_v34 = vrot.slane %v7485_v35, 1  ;;  %5310 = vmatmul.msk.f32.gmra.mxu1 %vm3501_vm7, %v7382_v20  ;;  %v2956_v39 = vrot.slane %v7491_v22, 1 }
 0x315   : > { %v2429_v11 = vrot.slane %v7487_v44, 1  ;;  %2787 = vst [vmem:[#allocation4 + $0x312] ss:$8 sm:$0xf0] %v2767_v33  ;;  %3213 = vrot.lane.b32.xlu0 %v3196_v15, %s8819_s27  ;;  %v2736_v57 = vld [vmem:[#allocation3 + $0x2d] sm:$0x3] }
 0x316   : > { %2621 = vrot.lane.b32.xlu2 %v2604_v49, %s8810_s10  ;;  %v2304_v4 = vsel %vm1642_vm14, %v2296_v3, %v2297_v34  ;;  %v2964_v12 = vsel %vm1642_vm14, %v2955_v9, %v2956_v39  ;;  %s8821_s10 = smov 82   ;;  %v2670_v3 = vld [vmem:[#allocation3 + $0x2a] sm:$0x3] }
 0x317   : > { %v2436_v19 = vsel %vm1642_vm14, %v2428_v53, %v2429_v11  ;;  %v2305_v27 = vsel %vm8733_vm10, %v7120_v6, %v2304_v4  ;;  %5324 = vmatmul.msk.f32.vlgmr.msrb.gmra.mxu2 %vm3501_vm7, %v7393_v62  ;;  %5327 = vmatmul.msk.f32.vlgmr.msrb.gmra.mxu3 %vm3501_vm7, %v7393_v62  ;;  %v2965_v6 = vsel %vm8820_vm6, %v7395_v52, %v2964_v12  ;;  %vm8822_vm6 = vcmask 326656  }
 0x318   : > { %v2437_v54 = vsel %vm2434_vm3, %v7225_v29, %v2436_v19  ;;  %2323 = vst [vmem:[#allocation4 + $0x18b] ss:$8 sm:$0xf] %v2305_v27  ;;  %5319 = vmatmul.msk.f32.gmra.mxu0 %vm3501_vm7, %v7382_v20  ;;  %v2802_v29 = vld [vmem:[#allocation3 + $0x2d] sm:$0x3] }
 0x319   : > { %2324 = vst [vmem:[#allocation4 + $0x18b] ss:$8 sm:$0xf0] %v2305_v27  ;;  %v2934_v27 = vld [vmem:[#allocation3 + $0x2d] sm:$0x3] }
 0x31a   : > { %2455 = vst [vmem:[#allocation4 + $0x18d] ss:$8 sm:$0xf] %v2437_v54  ;;  %3279 = vrot.lane.b32.xlu1 %v3262_v38, %s8821_s10  ;;  %s5435_s10 = smul.u32 41, %s5812_s12 }
 0x31b   : > { %2456 = vst [vmem:[#allocation4 + $0x18d] ss:$8 sm:$0xf0] %v2437_v54  ;;  %v7526_v53 = vpop.permute.xlu1 %2485  ;;  %v7532_v23 = vpop.permute.xlu2 %2091 }
 0x31c   : > { %v7528_v9 = vpop.permute.xlu0 %3144  ;;  %2984 = vst [vmem:[#allocation4 + $0x315] ss:$8 sm:$0xf] %v2965_v6  ;;  %v2495_v45 = vrot.slane %v7526_v53, 1  ;;  %5321 = vmatmul.msk.f32.vlgmr.msra.gmra.mxu1 %vm3501_vm7, %v7393_v62  ;;  %v2100_v52 = vrot.slane %v7532_v23, 1 }
 0x31d   : > { %v3153_v21 = vrot.slane %v7528_v9, 1  ;;  %2985 = vst [vmem:[#allocation4 + $0x315] ss:$8 sm:$0xf0] %v2965_v6  ;;  %2687 = vrot.lane.b32.xlu0 %v2670_v3, %s8808_s30  ;;  %s5436_s30 = smul.u32 41, %s5747_s4 }
 0x31e   : > { %2819 = vrot.lane.b32.xlu2 %v2802_v29, %s8805_s19  ;;  %v2501_v10 = vsel %vm1642_vm14, %v2494_v61, %v2495_v45  ;;  %v2108_v51 = vsel %vm1642_vm14, %v2099_v25, %v2100_v52 }
 0x31f   : > { %v3160_v33 = vsel %vm1642_vm14, %v3152_v47, %v3153_v21  ;;  %v2502_v56 = vsel %vm8822_vm6, %v7157_v26, %v2501_v10  ;;  %5325 = vmatmul.msk.f32.gmra.mxu2 %vm3501_vm7, %v7382_v20  ;;  %5328 = vmatmul.msk.f32.gmra.mxu3 %vm3501_vm7, %v7382_v20  ;;  %v2109_v26 = vsel %vm2104_vm5, %v7443_v30, %v2108_v51  ;;  %v3000_v47 = vld [vmem:[#allocation3 + $0x2d] sm:$0x3]  ;;  %v3331_v10 = vld [vmem:[#allocation4 + $0x40] sm:$0xff]  ;;  %v2144_v51 = vld [vmem:[#allocation3 + $0x2a] sm:$0x3]  ;;  %vm8824_vm6 = vcmask 179200   ;;  %s5222_s4 = scalar_lea.hbm %s8696_s5, %s5436_s30 }
 0x320   : > { %v3161_v1 = vsel %vm1437_vm8, %v7172_v48, %v3160_v33  ;;  %2520 = vst [vmem:[#allocation4 + $0x18e] ss:$8 sm:$0xf] %v2502_v56  ;;  %v2868_v48 = vld [vmem:[#allocation3 + $0x2d] sm:$0x3] }
 0x321   : > { %2521 = vst [vmem:[#allocation4 + $0x18e] ss:$8 sm:$0xf0] %v2502_v56  ;;  %v3066_v56 = vld [vmem:[#allocation3 + $0x2d] sm:$0x3] }
 0x322   : > { %3180 = vst [vmem:[#allocation4 + $0x458] ss:$8 sm:$0xf] %v3161_v1  ;;  %2753 = vrot.lane.b32.xlu1 %v2736_v57, %s8802_s24  ;;  %v3334_v57 = vld [vmem:[#allocation4 + $0x58] sm:$0xff]  ;;  %s8823_s24 = smov 60  }
 0x323   : > { %3181 = vst [vmem:[#allocation4 + $0x458] ss:$8 sm:$0xf0] %v3161_v1  ;;  %v7565_v61 = vpop.permute.xlu1 %3209  ;;  %v3333_v1 = vld [vmem:[#allocation4 + $0x50] sm:$0xff] }
 0x324   : > { %v7567_v25 = vpop.permute.xlu0 %2617  ;;  %2128 = vst [vmem:[#allocation4 + $0x1c8] ss:$8 sm:$0xf] %v2109_v26  ;;  %v3218_v15 = vrot.slane %v7565_v61, 1  ;;  %5322 = vmatmul.msk.f32.gmra.mxu1 %vm3501_vm7, %v7382_v20 }
 0x325   : > { %v2626_v49 = vrot.slane %v7567_v25, 1  ;;  %2129 = vst [vmem:[#allocation4 + $0x1c8] ss:$8 sm:$0xf0] %v2109_v26  ;;  %2885 = vrot.lane.b32.xlu0 %v2868_v48, %s5681_s16 }
 0x326   : > { %3017 = vrot.lane.b32.xlu2 %v3000_v47, %s8806_s29  ;;  %v3226_v30 = vsel %vm1642_vm14, %v3217_v28, %v3218_v15  ;;  %v7585_v19 = vpop.permute.xlu2 %2289  ;;  %s8828_s29 = smov 59  }
 0x327   : > { %v2634_v4 = vsel %vm1642_vm14, %v2625_v59, %v2626_v49  ;;  %v3227_v54 = vsel %vm3222_vm4, %v7280_v63, %v3226_v30  ;;  %v2298_v38 = vrot.slane %v7585_v19, 1  ;;  %v3372_v6 = vld [vmem:[#allocation4 + $0x188] sm:$0xff]  ;;  %v3373_v3 = vld [vmem:[#allocation4 + $0x190] sm:$0xff]  ;;  %v3374_v28 = vld [vmem:[#allocation4 + $0x198] sm:$0xff] }
 0x328   : > { %v2635_v12 = vsel %vm2630_vm13, %v7200_v5, %v2634_v4  ;;  %3246 = vst [vmem:[#allocation4 + $0x459] ss:$8 sm:$0xf] %v3227_v54  ;;  %3830 = vmatpush.msra.mxu0 %v3372_v6  ;;  %3853 = vmatpush.msrb.mxu1 %v3373_v3  ;;  %v3375_v29 = vld [vmem:[#allocation4 + $0x1a0] sm:$0xff]  ;;  %v3332_v5 = vld [vmem:[#allocation4 + $0x48] sm:$0xff]  ;;  %v3417_v6 = vld [vmem:[#allocation4 + $0x2f0] sm:$0xff] }
 0x329   : > { %3247 = vst [vmem:[#allocation4 + $0x459] ss:$8 sm:$0xf0] %v3227_v54  ;;  %v2306_v59 = vsel %vm1642_vm14, %v2297_v34, %v2298_v38  ;;  %3876 = vmatpush.msra.mxu2 %v3374_v28  ;;  %3899 = vmatpush.msra.mxu3 %v3375_v29  ;;  %v3458_v63 = vld [vmem:[#allocation4 + $0x438] sm:$0x7] }
 0x32a   : > { %2654 = vst [vmem:[#allocation4 + $0x310] ss:$8 sm:$0xf] %v2635_v12  ;;  %v2307_v33 = vsel %vm8733_vm10, %v7485_v35, %v2306_v59  ;;  %2951 = vrot.lane.b32.xlu1 %v2934_v27, %s8803_s17  ;;  %3831 = vmatpush.msra.mxu0 %v3331_v10  ;;  %v3459_v34 = vld [vmem:[#allocation4 + $0x440] sm:$0x7]  ;;  %vm8825_vm10 = vcmask 973824  }
 0x32b   : > { %2655 = vst [vmem:[#allocation4 + $0x310] ss:$8 sm:$0xf0] %v2635_v12  ;;  %3854 = vmatpush.msrb.mxu1 %v3332_v5  ;;  %3877 = vmatpush.msra.mxu2 %v3333_v1  ;;  %v7600_v26 = vpop.permute.xlu1 %2683  ;;  %v3460_v30 = vld [vmem:[#allocation4 + $0x448] sm:$0x7]  ;;  %v3418_v29 = vld [vmem:[#allocation4 + $0x2f8] sm:$0xff] }
 0x32c   : > { %v7602_v48 = vpop.permute.xlu0 %2815  ;;  %2326 = vst [vmem:[#allocation4 + $0x1cb] ss:$8 sm:$0xf] %v2307_v33  ;;  %3900 = vmatpush.msra.mxu3 %v3334_v57  ;;  %v2692_v47 = vrot.slane %v7600_v26, 1  ;;  %5341 = vmatpush.msk.msrb.mxu0 %vm3508_vm11, %v3458_v63  ;;  %v3461_v27 = vld [vmem:[#allocation4 + $0x450] sm:$0x7] }
 0x32d   : > { %v2824_v35 = vrot.slane %v7602_v48, 1  ;;  %2327 = vst [vmem:[#allocation4 + $0x1cb] ss:$8 sm:$0xf0] %v2307_v33  ;;  %3083 = vrot.lane.b32.xlu0 %v3066_v56, %s5665_s9  ;;  %5344 = vmatpush.msk.msra.mxu1 %vm3508_vm11, %v3459_v34  ;;  %v3419_v10 = vld [vmem:[#allocation4 + $0x300] sm:$0xff]  ;;  %v3376_v59 = vld [vmem:[#allocation4 + $0x1a8] sm:$0xff] }
 0x32e   : > { %2161 = vrot.lane.b32.xlu2 %v2144_v51, %s8823_s24  ;;  %v2700_v4 = vsel %vm1642_vm14, %v2691_v17, %v2692_v47  ;;  %5347 = vmatpush.msk.msrb.mxu2 %vm3508_vm11, %v3460_v30  ;;  %v7621_v12 = vpop.permute.xlu2 %2487  ;;  %v3378_v5 = vld [vmem:[#allocation4 + $0x1b8] sm:$0xff]  ;;  %v3379_v33 = vld [vmem:[#allocation4 + $0x1c0] sm:$0xff]  ;;  %s8827_s9 = smov 90   ;;  %v3336_v51 = vld [vmem:[#allocation4 + $0x68] sm:$0xff]  ;;  %s5226_s17 = sshll.u32 %s5222_s4, 4  ;;  %s5227_s17 = int_to_ptr.hbm [resolvable:$true] %s5226_s17 }
 0x32f   : > { %v2832_v54 = vsel %vm1642_vm14, %v2823_v32, %v2824_v35  ;;  %v2701_v3 = vsel %vm8824_vm6, %v7312_v42, %v2700_v4  ;;  %5350 = vmatpush.msk.msrb.mxu3 %vm3508_vm11, %v3461_v27  ;;  %v2496_v28 = vrot.slane %v7621_v12, 1  ;;  %3921 = vmatpush.msrb.mxu0 %v3417_v6  ;;  %v3420_v32 = vld [vmem:[#allocation4 + $0x308] sm:$0xff]  ;;  %v2078_v56 = vld [vmem:[#allocation3 + $0x28] sm:$0x3]  ;;  %v3335_v1 = vld [vmem:[#allocation4 + $0x60] sm:$0xff]  ;;  %vm8829_vm6 = vcmask 965632  }
 0x330   : > { %v2833_v17 = vsel %vm8825_vm10, %v7231_v46, %v2832_v54  ;;  %2720 = vst [vmem:[#allocation4 + $0x311] ss:$8 sm:$0xf] %v2701_v3  ;;  %3944 = vmatpush.msra.mxu1 %v3418_v29  ;;  %3967 = vmatpush.msrb.mxu2 %v3419_v10  ;;  %v3377_v46 = vld [vmem:[#allocation4 + $0x1b0] sm:$0xff]  ;;  %vm8826_vm10 = vcmask 326656  }
 0x331   : > { %2721 = vst [vmem:[#allocation4 + $0x311] ss:$8 sm:$0xf0] %v2701_v3  ;;  %v2503_v42 = vsel %vm1642_vm14, %v2495_v45, %v2496_v28  ;;  %3990 = vmatpush.msrb.mxu3 %v3420_v32  ;;  %3922 = vmatpush.msrb.mxu0 %v3376_v59  ;;  %v3337_v57 = vld [vmem:[#allocation4 + $0x70] sm:$0xff]  ;;  %v2210_v45 = vld [vmem:[#allocation3 + $0x2a] sm:$0x3] }
 0x332   : > { %2852 = vst [vmem:[#allocation4 + $0x313] ss:$8 sm:$0xf] %v2833_v17  ;;  %v2504_v63 = vsel %vm8826_vm10, %v7526_v53, %v2503_v42  ;;  %3945 = vmatpush.msra.mxu1 %v3377_v46  ;;  %3968 = vmatpush.msrb.mxu2 %v3378_v5  ;;  %v3338_v53 = vld [vmem:[#allocation4 + $0x78] sm:$0xff]  ;;  %v3463_v10 = vld [vmem:[#allocation4 + $0x460] sm:$0x7] }
 0x333   : > { %2853 = vst [vmem:[#allocation4 + $0x313] ss:$8 sm:$0xf0] %v2833_v17  ;;  %3991 = vmatpush.msrb.mxu3 %v3379_v33  ;;  %2095 = vrot.lane.b32.xlu1 %v2078_v56, %s8827_s9  ;;  %v7637_v34 = vpop.permute.xlu1 %2881  ;;  %v2342_v54 = vld [vmem:[#allocation3 + $0x2a] sm:$0x3]  ;;  %vm8830_vm10 = vcmask 179200  }
 0x334   : > { %v7639_v30 = vpop.permute.xlu0 %3013  ;;  %2523 = vst [vmem:[#allocation4 + $0x1ce] ss:$8 sm:$0xf] %v2504_v63  ;;  %3923 = vmatpush.msrb.mxu0 %v3335_v1  ;;  %3946 = vmatpush.msra.mxu1 %v3336_v51  ;;  %v2890_v4 = vrot.slane %v7637_v34, 1  ;;  %v3462_v29 = vld [vmem:[#allocation4 + $0x458] sm:$0x7] }
 0x335   : > { %v3022_v27 = vrot.slane %v7639_v30, 1  ;;  %2524 = vst [vmem:[#allocation4 + $0x1ce] ss:$8 sm:$0xf0] %v2504_v63  ;;  %3969 = vmatpush.msrb.mxu2 %v3337_v57  ;;  %3992 = vmatpush.msrb.mxu3 %v3338_v53  ;;  %v3465_v42 = vld [vmem:[#allocation4 + $0x470] sm:$0x7] }
 0x336   : > { %2227 = vrot.lane.b32.xlu0 %v2210_v45, %s8828_s29  ;;  %2359 = vrot.lane.b32.xlu2 %v2342_v54, %s8807_s13  ;;  %v2898_v6 = vsel %vm1642_vm14, %v2889_v7, %v2890_v4  ;;  %v7655_v17 = vpop.permute.xlu2 %3211  ;;  %v2276_v46 = vld [vmem:[#allocation3 + $0x2a] sm:$0x3]  ;;  %v5692_v63 = vmov 0   ;;  %s8486_s29 = scalar_lea.vmem [#allocation9], %s5435_s10  ;;  %s5586_s13 = sshra.s32 %s5227_s17, 4  ;;  %s5587_s13 = int_to_ptr.hbm [resolvable:$true] %s5586_s13 }
 0x337   : > { %v3030_v3 = vsel %vm1642_vm14, %v3021_v55, %v3022_v27  ;;  %5330 = vmatmul.msk.f32.vlgmr.msra.gmra.mxu0 %vm3501_vm7, %v7393_v62  ;;  %5333 = vmatmul.msk.f32.vlgmr.msrb.gmra.mxu1 %vm3501_vm7, %v7393_v62  ;;  %v2899_v32 = vsel %vm8829_vm6, %v7347_v2, %v2898_v6  ;;  %v3219_v59 = vrot.slane %v7655_v17, 1  ;;  %v3464_v55 = vld [vmem:[#allocation4 + $0x468] sm:$0x7]  ;;  %v2408_v33 = vld [vmem:[#allocation3 + $0x2a] sm:$0x3]  ;;  %vm8831_vm6 = vcmask 343040   ;;  %p5593_p0 = scmp.lt.s32.totalorder %s5587_s13, %s8696_s5 }
 0x338   : > { %v3031_v7 = vsel %vm3026_vm12, %v7259_v18, %v3030_v3  ;;  %5336 = vmatmul.msk.f32.vlgmr.msra.gmra.mxu2 %vm3501_vm7, %v7393_v62  ;;  %5339 = vmatmul.msk.f32.vlgmr.msra.gmra.mxu3 %vm3501_vm7, %v7393_v62  ;;  %2918 = vst [vmem:[#allocation4 + $0x314] ss:$8 sm:$0xf] %v2899_v32  ;;  %v2539_v56 = vld [vmem:[#allocation3 + $0x2a] sm:$0x3]  ;;  %s5224_s16 = sshll.u32 %s8486_s29, 4  ;;  %s5225_s16 = int_to_ptr.vmem [resolvable:$true] %s5224_s16 }
 0x339   : > { %5353 = vmatpush.msk.msra.mxu0 %vm3508_vm11, %v3462_v29  ;;  %5356 = vmatpush.msk.msrb.mxu1 %vm3508_vm11, %v3463_v10  ;;  %2919 = vst [vmem:[#allocation4 + $0x314] ss:$8 sm:$0xf0] %v2899_v32  ;;  %v3228_v18 = vsel %vm1642_vm14, %v3218_v15, %v3219_v59  ;;  %v2474_v6 = vld [vmem:[#allocation3 + $0x2a] sm:$0x3] }
 0x33a   : > { %5359 = vmatpush.msk.msra.mxu2 %vm3508_vm11, %v3464_v55  ;;  %5362 = vmatpush.msk.msra.mxu3 %vm3508_vm11, %v3465_v42  ;;  %3050 = vst [vmem:[#allocation4 + $0x316] ss:$8 sm:$0xf] %v3031_v7  ;;  %v3229_v2 = vsel %vm3222_vm4, %v7565_v61, %v3228_v18 }
 0x33b   : > { %3051 = vst [vmem:[#allocation4 + $0x316] ss:$8 sm:$0xf0] %v3031_v7  ;;  %2293 = vrot.lane.b32.xlu1 %v2276_v46, %s8816_s26  ;;  %v7682_v5 = vpop.permute.xlu1 %3079  ;;  %5536 = vset.pattern.permute.xlu0 %v5692_v63  ;;  %v3490_v46 = vld [vmem:[%s8693_s2 + $0x8] sm:$0xff]  ;;  %s5212_s26 = scalar_lea.sflag [#allocation8], %s5812_s12 }
 0x33c   : > { %3249 = vst [vmem:[#allocation4 + $0x499] ss:$8 sm:$0xf] %v3229_v2  ;;  %v3088_v15 = vrot.slane %v7682_v5, 1  ;;  %5537 = vset.pattern.permute.xlu1 %v5692_v63  ;;  %5538 = vset.pattern.permute.xlu2 %v5692_v63 }
 0x33d   : > { %3250 = vst [vmem:[#allocation4 + $0x499] ss:$8 sm:$0xf0] %v3229_v2  ;;  %v7685_v1 = vpop.permute.xlu0 %2157 }
 0x33e   : > { %2425 = vrot.lane.b32.xlu0 %v2408_v33, %s8804_s11  ;;  %2556 = vrot.lane.b32.xlu2 %v2539_v56, %s8801_s14  ;;  %v3095_v61 = vsel %vm1642_vm14, %v3087_v31, %v3088_v15  ;;  %v2166_v51 = vrot.slane %v7685_v1, 1  ;;  %v7695_v57 = vpop.permute.xlu2 %2685  ;;  %s5588_s11 = scalar_lea.hbm %s5587_s13, 41 }
 0x33f   : > { %v3096_v45 = vsel %vm1489_vm2, %v7397_v16, %v3095_v61  ;;  %v2693_v53 = vrot.slane %v7695_v57, 1  ;;  %5331 = vmatmul.msk.f32.gmra.mxu0 %vm3501_vm7, %v7382_v20  ;;  %5334 = vmatmul.msk.f32.gmra.mxu1 %vm3501_vm7, %v7382_v20  ;;  %p5589_p6 = scmp.ne.s32.totalorder %s5587_s13, %s5588_s11  ;;  %p5594_p1 = scmp.lt.s32.totalorder %s5592_s8, %s5588_s11 }
 0x340   : > { %3115 = vst [vmem:[#allocation4 + $0x317] ss:$8 sm:$0xf] %v3096_v45  ;;  %v2174_v31 = vsel %vm1642_vm14, %v2165_v37, %v2166_v51  ;;  %5337 = vmatmul.msk.f32.gmra.mxu2 %vm3501_vm7, %v7382_v20  ;;  %5340 = vmatmul.msk.f32.gmra.mxu3 %vm3501_vm7, %v7382_v20 }
 0x341   : > { %3116 = vst [vmem:[#allocation4 + $0x317] ss:$8 sm:$0xf0] %v3096_v45  ;;  %v2175_v16 = vsel %vm2170_vm1, %v7285_v50, %v2174_v31  ;;  %v2702_v54 = vsel %vm1642_vm14, %v2692_v47, %v2693_v53  ;;  %v3489_v50 = vld [vmem:[%s8693_s2] sm:$0xff]  ;;  %p5590_p9 = pnand %p5589_p6, %p5776_p11  ;;  %p5595_p3 = por %p5594_p1, %p5593_p0 }
 0x342   : > { %2194 = vst [vmem:[#allocation4 + $0x1c9] ss:$8 sm:$0xf] %v2175_v16  ;;  %v2703_v37 = vsel %vm8830_vm10, %v7600_v26, %v2702_v54  ;;  %vm8832_vm10 = vcmask 965632   ;;  %v4657_v31 = vld [vmem:[%s8694_s3] sm:$0xff] }
 0x343   : > { %2195 = vst [vmem:[#allocation4 + $0x1c9] ss:$8 sm:$0xf0] %v2175_v16  ;;  %2491 = vrot.lane.b32.xlu1 %v2474_v6, %s5670_s15  ;;  %v7723_v3 = vpop.permute.xlu1 %2223  ;;  %p5591_p13 = pneg %p5590_p9 }
 0x344   : > { %2723 = vst [vmem:[#allocation4 + $0x351] ss:$8 sm:$0xf] %v2703_v37  ;;  %v2232_v29 = vrot.slane %v7723_v3, 1 }
 0x345   : > { %2724 = vst [vmem:[#allocation4 + $0x351] ss:$8 sm:$0xf0] %v2703_v37  ;;  %v7729_v10 = vpop.permute.xlu0 %2355  ;;  %v4658_v37 = vld [vmem:[%s8694_s3 + $0x8] sm:$0xff]  ;;  %p5596_p4 = pnand %p5595_p3, %p5591_p13 }
 0x346   : > { %v2240_v26 = vsel %vm1642_vm14, %v2231_v8, %v2232_v29  ;;  %v2364_v47 = vrot.slane %v7729_v10, 1  ;;  %v7737_v32 = vpop.permute.xlu2 %2883  ;;  %3493 = vperm.xlu0 %5536, %v3489_v50   ;;  %4661 = vperm.xlu2 %5538, %v4657_v31   ;;  %v3342_v31 = vld [vmem:[#allocation4 + $0x98] sm:$0xff] }
 0x347   : > { %v2241_v7 = vsel %vm2236_vm9, %v7445_v60, %v2240_v26  ;;  %v2891_v55 = vrot.slane %v7737_v32, 1  ;;  %v3421_v42 = vld [vmem:[#allocation4 + $0x310] sm:$0xff]  ;;  %v3422_v18 = vld [vmem:[#allocation4 + $0x318] sm:$0xff]  ;;  %v3423_v2 = vld [vmem:[#allocation4 + $0x320] sm:$0xff]  ;;  %5342 = vmatmul.msk.f32.vlgmr.msrb.gmra.mxu0 %vm3501_vm7, %v7393_v62  ;;  %5345 = vmatmul.msk.f32.vlgmr.msra.gmra.mxu1 %vm3501_vm7, %v7393_v62 }
 0x348   : > { %2260 = vst [vmem:[#allocation4 + $0x1ca] ss:$8 sm:$0xf] %v2241_v7  ;;  %v2372_v8 = vsel %vm1642_vm14, %v2363_v14, %v2364_v47  ;;  %4013 = vmatpush.msra.mxu0 %v3421_v42  ;;  %4036 = vmatpush.msrb.mxu1 %v3422_v18  ;;  %v3424_v60 = vld [vmem:[#allocation4 + $0x328] sm:$0xff] }
 0x349   : > { %2261 = vst [vmem:[#allocation4 + $0x1ca] ss:$8 sm:$0xf0] %v2241_v7  ;;  %v2373_v63 = vsel %vm8831_vm6, %v7318_v40, %v2372_v8  ;;  %v2900_v33 = vsel %vm1642_vm14, %v2890_v4, %v2891_v55  ;;  %4059 = vmatpush.msra.mxu2 %v3423_v2  ;;  %4082 = vmatpush.msra.mxu3 %v3424_v60  ;;  %vm8833_vm6 = vcmask 195584  }
 0x34a   : > { %2392 = vst [vmem:[#allocation4 + $0x1cc] ss:$8 sm:$0xf] %v2373_v63  ;;  %v2901_v14 = vsel %vm8832_vm10, %v7637_v34, %v2900_v33  ;;  %5348 = vmatmul.msk.f32.vlgmr.msrb.gmra.mxu2 %vm3501_vm7, %v7393_v62  ;;  %5351 = vmatmul.msk.f32.vlgmr.msrb.gmra.mxu3 %vm3501_vm7, %v7393_v62  ;;  %v3339_v33 = vld [vmem:[#allocation4 + $0x80] sm:$0xff]  ;;  %vm8834_vm10 = vcmask 982016  }
 0x34b   : > { %2393 = vst [vmem:[#allocation4 + $0x1cc] ss:$8 sm:$0xf0] %v2373_v63  ;;  %3498 = vperm.xlu1 %5537, %v3490_v46   ;;  %v7767_v40 = vpop.permute.xlu1 %2421 }
 0x34c   : > { %2921 = vst [vmem:[#allocation4 + $0x354] ss:$8 sm:$0xf] %v2901_v14  ;;  %v2430_v56 = vrot.slane %v7767_v40, 1 }
 0x34d   : > { %2922 = vst [vmem:[#allocation4 + $0x354] ss:$8 sm:$0xf0] %v2901_v14  ;;  %v7770_v4 = vpop.permute.xlu0 %2552  ;;  %v3340_v14 = vld [vmem:[#allocation4 + $0x88] sm:$0xff] }
 0x34e   : > { %v2438_v34 = vsel %vm1642_vm14, %v2429_v11, %v2430_v56  ;;  %v2561_v61 = vrot.slane %v7770_v4, 1  ;;  %v7778_v45 = vpop.permute.xlu2 %3081 }
 0x34f   : > { %v2439_v16 = vsel %vm2434_vm3, %v7487_v44, %v2438_v34  ;;  %v3089_v54 = vrot.slane %v7778_v45, 1  ;;  %5343 = vmatmul.msk.f32.gmra.mxu0 %vm3501_vm7, %v7382_v20  ;;  %5346 = vmatmul.msk.f32.gmra.mxu1 %vm3501_vm7, %v7382_v20  ;;  %v3341_v34 = vld [vmem:[#allocation4 + $0x90] sm:$0xff] }
 0x350   : > { %2458 = vst [vmem:[#allocation4 + $0x1cd] ss:$8 sm:$0xf] %v2439_v16  ;;  %v2568_v11 = vsel %vm1642_vm14, %v2560_v36, %v2561_v61 }
 0x351   : > { %2459 = vst [vmem:[#allocation4 + $0x1cd] ss:$8 sm:$0xf0] %v2439_v16  ;;  %v2569_v44 = vsel %vm8833_vm6, %v7354_v43, %v2568_v11  ;;  %v3097_v6 = vsel %vm1642_vm14, %v3088_v15, %v3089_v54  ;;  %v3466_v16 = vld [vmem:[#allocation4 + $0x478] sm:$0x7]  ;;  %vm8835_vm6 = vcmask 973824  }
 0x352   : > { %2588 = vst [vmem:[#allocation4 + $0x1cf] ss:$8 sm:$0xf] %v2569_v44  ;;  %v3098_v50 = vsel %vm1489_vm2, %v7682_v5, %v3097_v6  ;;  %5349 = vmatmul.msk.f32.gmra.mxu2 %vm3501_vm7, %v7382_v20  ;;  %5352 = vmatmul.msk.f32.gmra.mxu3 %vm3501_vm7, %v7382_v20  ;;  %v3467_v11 = vld [vmem:[#allocation4 + $0x480] sm:$0x7] }
 0x353   : > { %2589 = vst [vmem:[#allocation4 + $0x1cf] ss:$8 sm:$0xf0] %v2569_v44  ;;  %4666 = vperm.xlu1 %5537, %v4658_v37   ;;  %v7811_v36 = vpop.permute.xlu1 %3146  ;;  %v3468_v6 = vld [vmem:[#allocation4 + $0x488] sm:$0x7] }
 0x354   : > { %3118 = vst [vmem:[#allocation4 + $0x357] ss:$8 sm:$0xf] %v3098_v50  ;;  %v3154_v43 = vrot.slane %v7811_v36, 1 }
 0x355   : > { %3119 = vst [vmem:[#allocation4 + $0x357] ss:$8 sm:$0xf0] %v3098_v50  ;;  %v7814_v26 = vpop.permute.xlu0 %3277  ;;  %v3469_v50 = vld [vmem:[#allocation4 + $0x490] sm:$0x7] }
 0x356   : > { %v3162_v5 = vsel %vm1642_vm14, %v3153_v21, %v3154_v43  ;;  %v3285_v15 = vrot.slane %v7814_v26, 1  ;;  %v7822_v7 = vpop.permute.xlu2 %2225 }
 0x357   : > { %v3163_v42 = vsel %vm1437_vm8, %v7528_v9, %v3162_v5  ;;  %v2233_v18 = vrot.slane %v7822_v7, 1 }
 0x358   : > { %3183 = vst [vmem:[#allocation4 + $0x498] ss:$8 sm:$0xf] %v3163_v42  ;;  %v3294_v2 = vsel %vm1642_vm14, %v3284_v41, %v3285_v15 }
 0x359   : > { %3184 = vst [vmem:[#allocation4 + $0x498] ss:$8 sm:$0xf0] %v3163_v42  ;;  %v3295_v21 = vsel %vm3288_vm0, %v7401_v0, %v3294_v2  ;;  %v2242_v8 = vsel %vm1642_vm14, %v2232_v29, %v2233_v18  ;;  %v3380_v9 = vld [vmem:[#allocation4 + $0x1c8] sm:$0xff]  ;;  %v3381_v60 = vld [vmem:[#allocation4 + $0x1d0] sm:$0xff]  ;;  %v3382_v46 = vld [vmem:[#allocation4 + $0x1d8] sm:$0xff] }
 0x35a   : > { %3315 = vst [vmem:[#allocation4 + $0x49a] ss:$8 sm:$0xf] %v3295_v21  ;;  %v2243_v63 = vsel %vm2236_vm9, %v7723_v3, %v2242_v8  ;;  %4014 = vmatpush.msra.mxu0 %v3380_v9  ;;  %4037 = vmatpush.msrb.mxu1 %v3381_v60  ;;  %v3383_v41 = vld [vmem:[#allocation4 + $0x1e0] sm:$0xff]  ;;  %v3425_v42 = vld [vmem:[#allocation4 + $0x330] sm:$0xff]  ;;  %v3426_v2 = vld [vmem:[#allocation4 + $0x338] sm:$0xff] }
 0x35b   : > { %3316 = vst [vmem:[#allocation4 + $0x49a] ss:$8 sm:$0xf0] %v3295_v21  ;;  %4060 = vmatpush.msra.mxu2 %v3382_v46  ;;  %4083 = vmatpush.msra.mxu3 %v3383_v41  ;;  %v7841_v0 = vpop.permute.xlu1 %2619  ;;  %v3427_v8 = vld [vmem:[#allocation4 + $0x340] sm:$0xff]  ;;  %v3428_v9 = vld [vmem:[#allocation4 + $0x348] sm:$0xff] }
 0x35c   : > { %2263 = vst [vmem:[#allocation4 + $0x20a] ss:$8 sm:$0xf] %v2243_v63  ;;  %v2627_v29 = vrot.slane %v7841_v0, 1  ;;  %4015 = vmatpush.msra.mxu0 %v3339_v33  ;;  %4038 = vmatpush.msrb.mxu1 %v3340_v14  ;;  %v3384_v46 = vld [vmem:[#allocation4 + $0x1e8] sm:$0xff]  ;;  %v3387_v41 = vld [vmem:[#allocation4 + $0x200] sm:$0xff] }
 0x35d   : > { %2264 = vst [vmem:[#allocation4 + $0x20a] ss:$8 sm:$0xf0] %v2243_v63  ;;  %4061 = vmatpush.msra.mxu2 %v3341_v34  ;;  %4084 = vmatpush.msra.mxu3 %v3342_v31  ;;  %v7844_v3 = vpop.permute.xlu0 %2751  ;;  %v3385_v63 = vld [vmem:[#allocation4 + $0x1f0] sm:$0xff]  ;;  %v3343_v34 = vld [vmem:[#allocation4 + $0xa0] sm:$0xff]  ;;  %v3344_v31 = vld [vmem:[#allocation4 + $0xa8] sm:$0xff] }
 0x35e   : > { %v2636_v37 = vsel %vm1642_vm14, %v2626_v49, %v2627_v29  ;;  %v2759_v44 = vrot.slane %v7844_v3, 1  ;;  %5365 = vmatpush.msk.msrb.mxu0 %vm3508_vm11, %v3466_v16  ;;  %5368 = vmatpush.msk.msra.mxu1 %vm3508_vm11, %v3467_v11  ;;  %v3346_v11 = vld [vmem:[#allocation4 + $0xb8] sm:$0xff] }
 0x35f   : > { %v2637_v5 = vsel %vm2630_vm13, %v7567_v25, %v2636_v37  ;;  %5371 = vmatpush.msk.msrb.mxu2 %vm3508_vm11, %v3468_v6  ;;  %5374 = vmatpush.msk.msrb.mxu3 %vm3508_vm11, %v3469_v50  ;;  %v5038_v50 = vld [vmem:[#allocation5] sm:$0x1] }
 0x360   : > { %2657 = vst [vmem:[#allocation4 + $0x350] ss:$8 sm:$0xf] %v2637_v5  ;;  %v2768_v49 = vsel %vm1642_vm14, %v2758_v24, %v2759_v44  ;;  %v7863_v21 = vpop.permute.xlu2 %2423  ;;  %4105 = vmatpush.msrb.mxu0 %v3425_v42  ;;  %4128 = vmatpush.msra.mxu1 %v3426_v2  ;;  %v3386_v24 = vld [vmem:[#allocation4 + $0x1f8] sm:$0xff] }
 0x361   : > { %2658 = vst [vmem:[#allocation4 + $0x350] ss:$8 sm:$0xf0] %v2637_v5  ;;  %v2769_v25 = vsel %vm8834_vm10, %v7449_v58, %v2768_v49  ;;  %v2431_v60 = vrot.slane %v7863_v21, 1  ;;  %4151 = vmatpush.msrb.mxu2 %v3427_v8  ;;  %4174 = vmatpush.msrb.mxu3 %v3428_v9  ;;  %v3470_v42 = vld [vmem:[#allocation4 + $0x498] sm:$0x7] }
 0x362   : > { %2789 = vst [vmem:[#allocation4 + $0x352] ss:$8 sm:$0xf] %v2769_v25  ;;  %4106 = vmatpush.msrb.mxu0 %v3384_v46  ;;  %4129 = vmatpush.msra.mxu1 %v3385_v63  ;;  %v3471_v2 = vld [vmem:[#allocation4 + $0x4a0] sm:$0x7]  ;;  %vm8836_vm10 = vcmask 834560  }
 0x363   : > { %2790 = vst [vmem:[#allocation4 + $0x352] ss:$8 sm:$0xf0] %v2769_v25  ;;  %v2440_v33 = vsel %vm1642_vm14, %v2430_v56, %v2431_v60  ;;  %4152 = vmatpush.msrb.mxu2 %v3386_v24  ;;  %4175 = vmatpush.msrb.mxu3 %v3387_v41  ;;  %v7873_v58 = vpop.permute.xlu1 %2817  ;;  %v3345_v56 = vld [vmem:[#allocation4 + $0xb0] sm:$0xff]  ;;  %v3472_v49 = vld [vmem:[#allocation4 + $0x4a8] sm:$0x7] }
 0x364   : > { %v2441_v14 = vsel %vm2434_vm3, %v7767_v40, %v2440_v33  ;;  %5360 = vmatmul.msk.f32.vlgmr.msra.gmra.mxu2 %vm3501_vm7, %v7393_v62  ;;  %5363 = vmatmul.msk.f32.vlgmr.msra.gmra.mxu3 %vm3501_vm7, %v7393_v62  ;;  %v2825_v16 = vrot.slane %v7873_v58, 1 }
 0x365   : > { %2461 = vst [vmem:[#allocation4 + $0x20d] ss:$8 sm:$0xf] %v2441_v14  ;;  %4107 = vmatpush.msrb.mxu0 %v3343_v34  ;;  %4130 = vmatpush.msra.mxu1 %v3344_v31  ;;  %v7882_v37 = vpop.permute.xlu0 %2949 }
 0x366   : > { %2462 = vst [vmem:[#allocation4 + $0x20d] ss:$8 sm:$0xf0] %v2441_v14  ;;  %4153 = vmatpush.msrb.mxu2 %v3345_v56  ;;  %4176 = vmatpush.msrb.mxu3 %v3346_v11  ;;  %v2834_v40 = vsel %vm1642_vm14, %v2824_v35, %v2825_v16  ;;  %v2957_v6 = vrot.slane %v7882_v37, 1  ;;  %v3473_v35 = vld [vmem:[#allocation4 + $0x4b0] sm:$0x7] }
 0x367   : > { %v2835_v5 = vsel %vm8835_vm6, %v7602_v48, %v2834_v40  ;;  %5354 = vmatmul.msk.f32.vlgmr.msra.gmra.mxu0 %vm3501_vm7, %v7393_v62  ;;  %5357 = vmatmul.msk.f32.vlgmr.msrb.gmra.mxu1 %vm3501_vm7, %v7393_v62 }
 0x368   : > { %2855 = vst [vmem:[#allocation4 + $0x353] ss:$8 sm:$0xf] %v2835_v5  ;;  %5377 = vmatpush.msk.msra.mxu0 %vm3508_vm11, %v3470_v42  ;;  %5380 = vmatpush.msk.msrb.mxu1 %vm3508_vm11, %v3471_v2  ;;  %v2966_v48 = vsel %vm1642_vm14, %v2956_v39, %v2957_v6  ;;  %v3149_v8 = vpop.permute.xlu2 %3148 }
 0x369   : > { %2856 = vst [vmem:[#allocation4 + $0x353] ss:$8 sm:$0xf0] %v2835_v5  ;;  %5383 = vmatpush.msk.msra.mxu2 %vm3508_vm11, %v3472_v49  ;;  %5386 = vmatpush.msk.msra.mxu3 %vm3508_vm11, %v3473_v35  ;;  %v2967_v9 = vsel %vm8836_vm10, %v7491_v22, %v2966_v48  ;;  %v3155_v25 = vrot.slane %v3149_v8, 1  ;;  %vm8839_vm10 = vcmask 343040  }
 0x36a   : > { %2987 = vst [vmem:[#allocation4 + $0x355] ss:$8 sm:$0xf] %v2967_v9  ;;  %5041 = vperm.xlu2 %5538, %v5038_v50  }
 0x36b   : > { %2988 = vst [vmem:[#allocation4 + $0x355] ss:$8 sm:$0xf0] %v2967_v9  ;;  %v3164_v46 = vsel %vm1642_vm14, %v3154_v43, %v3155_v25  ;;  %v3166_v63 = vsel %vm1437_vm8, %v3149_v8, %v3155_v25  ;;  %v7911_v39 = vpop.permute.xlu1 %3015  ;;  %v7987_v8 = vld [vmem:[%s8692_s1 + $0x8] sm:$0xff] }
 0x36c   : > { %v3165_v24 = vsel %vm1437_vm8, %v7811_v36, %v3164_v46  ;;  %3189 = vst.msk [vmem:[#allocation4 + $0x518] ss:$8 sm:$0x1] %vm6609_vm15, %v3166_v63  ;;  %5361 = vmatmul.msk.f32.gmra.mxu2 %vm3501_vm7, %v7382_v20  ;;  %5364 = vmatmul.msk.f32.gmra.mxu3 %vm3501_vm7, %v7382_v20  ;;  %v3023_v22 = vrot.slane %v7911_v39, 1  ;;  %vm8837_vm8 = vcmask 474112  }
 0x36d   : > { %3186 = vst [vmem:[#allocation4 + $0x4d8] ss:$8 sm:$0xf] %v3165_v24  ;;  %v7922_v43 = vpop.permute.xlu0 %2093 }
 0x36e   : > { %3187 = vst [vmem:[#allocation4 + $0x4d8] ss:$8 sm:$0xf0] %v3165_v24  ;;  %v3032_v36 = vsel %vm1642_vm14, %v3022_v27, %v3023_v22  ;;  %v2101_v41 = vrot.slane %v7922_v43, 1 }
 0x36f   : > { %v3033_v33 = vsel %vm3026_vm12, %v7639_v30, %v3032_v36  ;;  %5355 = vmatmul.msk.f32.gmra.mxu0 %vm3501_vm7, %v7382_v20  ;;  %5358 = vmatmul.msk.f32.gmra.mxu1 %vm3501_vm7, %v7382_v20 }
 0x370   : > { %3053 = vst [vmem:[#allocation4 + $0x356] ss:$8 sm:$0xf] %v3033_v33  ;;  %v2110_v14 = vsel %vm1642_vm14, %v2100_v52, %v2101_v41  ;;  %v2622_v34 = vpop.permute.xlu2 %2621 }
 0x371   : > { %3054 = vst [vmem:[#allocation4 + $0x356] ss:$8 sm:$0xf0] %v3033_v33  ;;  %v2111_v27 = vsel %vm2104_vm5, %v7532_v23, %v2110_v14  ;;  %v2628_v31 = vrot.slane %v2622_v34, 1 }
 0x372   : > { %2131 = vst [vmem:[#allocation4 + $0x208] ss:$8 sm:$0xf] %v2111_v27 }
 0x373   : > { %2132 = vst [vmem:[#allocation4 + $0x208] ss:$8 sm:$0xf0] %v2111_v27  ;;  %v2638_v30 = vsel %vm1642_vm14, %v2627_v29, %v2628_v31  ;;  %v2640_v20 = vsel %vm2630_vm13, %v2622_v34, %v2628_v31 }
 0x374   : > { %v2639_v56 = vsel %vm2630_vm13, %v7841_v0, %v2638_v30  ;;  %2663 = vst.msk [vmem:[#allocation4 + $0x3d0] ss:$8 sm:$0x1] %vm6609_vm15, %v2640_v20  ;;  %5372 = vmatmul.msk.f32.vlgmr.msrb.gmra.mxu2 %vm3501_vm7, %v7393_v62  ;;  %5375 = vmatmul.msk.f32.vlgmr.msrb.gmra.mxu3 %vm3501_vm7, %v7393_v62  ;;  %v7955_v23 = vpop.permute.xlu1 %2159  ;;  %vm8838_vm13 = vmmov %vm8835_vm6 }
 0x375   : > { %2660 = vst [vmem:[#allocation4 + $0x390] ss:$8 sm:$0xf] %v2639_v56  ;;  %v2167_v52 = vrot.slane %v7955_v23, 1 }
 0x376   : > { %2661 = vst [vmem:[#allocation4 + $0x390] ss:$8 sm:$0xf0] %v2639_v56 }
 0x377   : > { %v2176_v0 = vsel %vm1642_vm14, %v2166_v51, %v2167_v52  ;;  %v7963_v29 = vpop.permute.xlu0 %2291  ;;  %5366 = vmatmul.msk.f32.vlgmr.msrb.gmra.mxu0 %vm3501_vm7, %v7393_v62  ;;  %5369 = vmatmul.msk.f32.vlgmr.msra.gmra.mxu1 %vm3501_vm7, %v7393_v62  ;;  %v3429_v11 = vld [vmem:[#allocation4 + $0x350] sm:$0xff]  ;;  %v3430_v40 = vld [vmem:[#allocation4 + $0x358] sm:$0xff]  ;;  %v3431_v50 = vld [vmem:[#allocation4 + $0x360] sm:$0xff] }
 0x378   : > { %v2177_v5 = vsel %vm2170_vm1, %v7685_v1, %v2176_v0  ;;  %v2299_v42 = vrot.slane %v7963_v29, 1  ;;  %v2820_v2 = vpop.permute.xlu2 %2819  ;;  %4197 = vmatpush.msra.mxu0 %v3429_v11  ;;  %4220 = vmatpush.msrb.mxu1 %v3430_v40  ;;  %v3432_v51 = vld [vmem:[#allocation4 + $0x368] sm:$0xff] }
 0x379   : > { %2197 = vst [vmem:[#allocation4 + $0x209] ss:$8 sm:$0xf] %v2177_v5  ;;  %v2826_v49 = vrot.slane %v2820_v2, 1  ;;  %4243 = vmatpush.msra.mxu2 %v3431_v50  ;;  %4266 = vmatpush.msra.mxu3 %v3432_v51 }
 0x37a   : > { %2198 = vst [vmem:[#allocation4 + $0x209] ss:$8 sm:$0xf0] %v2177_v5  ;;  %v2308_v62 = vsel %vm1642_vm14, %v2298_v38, %v2299_v42 }
 0x37b   : > { %v2309_v1 = vsel %vm8837_vm8, %v7585_v19, %v2308_v62  ;;  %v2836_v35 = vsel %vm1642_vm14, %v2825_v16, %v2826_v49  ;;  %v2838_v38 = vsel %vm8835_vm6, %v2820_v2, %v2826_v49  ;;  %vm8840_vm8 = vcmask 326656  }
 0x37c   : > { %2329 = vst [vmem:[#allocation4 + $0x20b] ss:$8 sm:$0xf] %v2309_v1  ;;  %v2837_v48 = vsel %vm8838_vm13, %v7873_v58, %v2836_v35  ;;  %5373 = vmatmul.msk.f32.gmra.mxu2 %vm3501_vm7, %v7987_v8  ;;  %5376 = vmatmul.msk.f32.gmra.mxu3 %vm3501_vm7, %v7987_v8  ;;  %v7993_v19 = vpop.permute.xlu1 %2357  ;;  %vm8841_vm13 = vcmask 195584   ;;  %vm8846_vm6 = vcmask 982016  }
 0x37d   : > { %2330 = vst [vmem:[#allocation4 + $0x20b] ss:$8 sm:$0xf0] %v2309_v1  ;;  %v2365_v16 = vrot.slane %v7993_v19, 1 }
 0x37e   : > { %2858 = vst [vmem:[#allocation4 + $0x393] ss:$8 sm:$0xf] %v2837_v48 }
 0x37f   : > { %2859 = vst [vmem:[#allocation4 + $0x393] ss:$8 sm:$0xf0] %v2837_v48  ;;  %v2374_v58 = vsel %vm1642_vm14, %v2364_v47, %v2365_v16  ;;  %v8002_v9 = vpop.permute.xlu0 %2489  ;;  %5367 = vmatmul.msk.f32.gmra.mxu0 %vm3501_vm7, %v7987_v8  ;;  %5370 = vmatmul.msk.f32.gmra.mxu1 %vm3501_vm7, %v7987_v8 }
 0x380   : > { %2861 = vst.msk [vmem:[#allocation4 + $0x3d3] ss:$8 sm:$0x1] %vm6609_vm15, %v2838_v38  ;;  %v2375_v25 = vsel %vm8839_vm10, %v7729_v10, %v2374_v58  ;;  %v2497_v46 = vrot.slane %v8002_v9, 1  ;;  %v3018_v63 = vpop.permute.xlu2 %3017  ;;  %v8018_v36 = vpop.f32.mrf.mxu1  ;;  %v3348_v58 = vld [vmem:[#allocation4 + $0xc8] sm:$0xff] }
 0x381   : > { %2395 = vst [vmem:[#allocation4 + $0x20c] ss:$8 sm:$0xf] %v2375_v25  ;;  %v3024_v24 = vrot.slane %v3018_v63, 1 }
 0x382   : > { %2396 = vst [vmem:[#allocation4 + $0x20c] ss:$8 sm:$0xf0] %v2375_v25  ;;  %v2505_v47 = vsel %vm1642_vm14, %v2496_v28, %v2497_v46  ;;  %v3349_v25 = vld [vmem:[#allocation4 + $0xd0] sm:$0xff] }
 0x383   : > { %v2506_v33 = vsel %vm8840_vm8, %v7621_v12, %v2505_v47  ;;  %v3034_v10 = vsel %vm1642_vm14, %v3023_v22, %v3024_v24  ;;  %v3036_v27 = vsel %vm3026_vm12, %v3018_v63, %v3024_v24  ;;  %vm8848_vm8 = vcmask 965632  }
 0x384   : > { %2526 = vst [vmem:[#allocation4 + $0x20e] ss:$8 sm:$0xf] %v2506_v33  ;;  %v3035_v14 = vsel %vm3026_vm12, %v7911_v39, %v3034_v10  ;;  %v8027_v34 = vpop.permute.xlu1 %2554  ;;  %vm8844_vm12 = vmmov %vm8839_vm10 }
 0x385   : > { %2527 = vst [vmem:[#allocation4 + $0x20e] ss:$8 sm:$0xf0] %v2506_v33  ;;  %v2562_v28 = vrot.slane %v8027_v34, 1  ;;  %v3474_v33 = vld [vmem:[#allocation4 + $0x4b8] sm:$0x7] }
 0x386   : > { %3056 = vst [vmem:[#allocation4 + $0x396] ss:$8 sm:$0xf] %v3035_v14 }
 0x387   : > { %3057 = vst [vmem:[#allocation4 + $0x396] ss:$8 sm:$0xf0] %v3035_v14  ;;  %v2570_v12 = vsel %vm1642_vm14, %v2561_v61, %v2562_v28  ;;  %v3214_v22 = vpop.permute.xlu0 %3213 }
 0x388   : > { %3059 = vst.msk [vmem:[#allocation4 + $0x3d6] ss:$8 sm:$0x1] %vm6609_vm15, %v3036_v27  ;;  %v2571_v39 = vsel %vm8841_vm13, %v7770_v4, %v2570_v12  ;;  %v3220_v31 = vrot.slane %v3214_v22, 1  ;;  %v2162_v30 = vpop.permute.xlu2 %2161  ;;  %v8053_v50 = vpop.f32.mrf.mxu1  ;;  %v3475_v12 = vld [vmem:[#allocation4 + $0x4c0] sm:$0x7]  ;;  %vm8849_vm13 = vmmov %vm8848_vm8 }
 0x389   : > { %2591 = vst [vmem:[#allocation4 + $0x20f] ss:$8 sm:$0xf] %v2571_v39  ;;  %v2168_v20 = vrot.slane %v2162_v30, 1 }
 0x38a   : > { %2592 = vst [vmem:[#allocation4 + $0x20f] ss:$8 sm:$0xf0] %v2571_v39  ;;  %v3230_v56 = vsel %vm1642_vm14, %v3219_v59, %v3220_v31  ;;  %v3232_v0 = vsel %vm3222_vm4, %v3214_v22, %v3220_v31  ;;  %v8075_v10 = vpop.f32.mrf.mxu2  ;;  %v8077_v14 = vpop.f32.mrf.mxu3  ;;  %v3476_v39 = vld [vmem:[#allocation4 + $0x4c8] sm:$0x7] }
 0x38b   : > { %v3231_v61 = vsel %vm3222_vm4, %v7655_v17, %v3230_v56  ;;  %3255 = vst.msk [vmem:[#allocation4 + $0x519] ss:$8 sm:$0x1] %vm6609_vm15, %v3232_v0  ;;  %v2178_v4 = vsel %vm1642_vm14, %v2167_v52, %v2168_v20  ;;  %v2180_v59 = vsel %vm2170_vm1, %v2162_v30, %v2168_v20  ;;  %v3477_v31 = vld [vmem:[#allocation4 + $0x4d0] sm:$0x7]  ;;  %v8095_v30 = vpop.f32.mrf.mxu0 }
 0x38c   : > { %3252 = vst [vmem:[#allocation4 + $0x4d9] ss:$8 sm:$0xf] %v3231_v61  ;;  %v2179_v11 = vsel %vm2170_vm1, %v7955_v23, %v2178_v4  ;;  %v3280_v40 = vpop.permute.xlu1 %3279  ;;  %vm8845_vm1 = vmmov %vm8839_vm10  ;;  %v3434_v4 = vld [vmem:[#allocation4 + $0x378] sm:$0xff] }
 0x38d   : > { %3253 = vst [vmem:[#allocation4 + $0x4d9] ss:$8 sm:$0xf0] %v3231_v61  ;;  %v3286_v5 = vrot.slane %v3280_v40, 1  ;;  %v3433_v61 = vld [vmem:[#allocation4 + $0x370] sm:$0xff]  ;;  %vm8847_vm10 = vmmov %vm8846_vm6 }
 0x38e   : > { %2200 = vst [vmem:[#allocation4 + $0x249] ss:$8 sm:$0xf] %v2179_v11 }
 0x38f   : > { %2201 = vst [vmem:[#allocation4 + $0x249] ss:$8 sm:$0xf0] %v2179_v11  ;;  %v3296_v17 = vsel %vm1642_vm14, %v3285_v15, %v3286_v5  ;;  %v2688_v2 = vpop.permute.xlu0 %2687  ;;  %v3298_v52 = vsel %vm3288_vm0, %v3280_v40, %v3286_v5  ;;  %v3435_v5 = vld [vmem:[#allocation4 + $0x380] sm:$0xff] }
 0x390   : > { %2203 = vst.msk [vmem:[#allocation4 + $0x289] ss:$8 sm:$0x1] %vm6609_vm15, %v2180_v59  ;;  %v3297_v23 = vsel %vm3288_vm0, %v7814_v26, %v3296_v17  ;;  %v2694_v51 = vrot.slane %v2688_v2, 1  ;;  %v2360_v49 = vpop.permute.xlu2 %2359  ;;  %v3388_v62 = vld [vmem:[#allocation4 + $0x208] sm:$0xff]  ;;  %v3389_v1 = vld [vmem:[#allocation4 + $0x210] sm:$0xff] }
 0x391   : > { %3318 = vst [vmem:[#allocation4 + $0x4da] ss:$8 sm:$0xf] %v3297_v23  ;;  %v2366_v35 = vrot.slane %v2360_v49, 1  ;;  %4198 = vmatpush.msra.mxu0 %v3388_v62  ;;  %4221 = vmatpush.msrb.mxu1 %v3389_v1  ;;  %v3390_v48 = vld [vmem:[#allocation4 + $0x218] sm:$0xff]  ;;  %v3391_v38 = vld [vmem:[#allocation4 + $0x220] sm:$0xff]  ;;  %v8097_v20 = vpop.f32.mrf.mxu1 }
 0x392   : > { %3319 = vst [vmem:[#allocation4 + $0x4da] ss:$8 sm:$0xf0] %v3297_v23  ;;  %v2704_v15 = vsel %vm1642_vm14, %v2693_v53, %v2694_v51  ;;  %4244 = vmatpush.msra.mxu2 %v3390_v48  ;;  %4267 = vmatpush.msra.mxu3 %v3391_v38  ;;  %v3347_v26 = vld [vmem:[#allocation4 + $0xc0] sm:$0xff]  ;;  %vm8842_vm0 = vcmask 179200   ;;  %v3350_v53 = vld [vmem:[#allocation4 + $0xd8] sm:$0xff] }
 0x393   : > { %3321 = vst.msk [vmem:[#allocation4 + $0x51a] ss:$8 sm:$0x1] %vm6609_vm15, %v3298_v52  ;;  %v2705_v63 = vsel %vm8842_vm0, %v7695_v57, %v2704_v15  ;;  %vm8843_vm4 = vmmov %vm8842_vm0  ;;  %v2376_v47 = vsel %vm1642_vm14, %v2365_v16, %v2366_v35  ;;  %4199 = vmatpush.msra.mxu0 %v3347_v26  ;;  %4222 = vmatpush.msrb.mxu1 %v3348_v58  ;;  %v8084_v16 = vld [vmem:[%s8692_s1] sm:$0xff]  ;;  %v3393_v52 = vld [vmem:[#allocation4 + $0x230] sm:$0xff]  ;;  %vm8850_vm0 = vcmask 195584  }
 0x394   : > { %v2706_v24 = vsel %vm8843_vm4, %v2688_v2, %v2694_v51  ;;  %2726 = vst [vmem:[#allocation4 + $0x391] ss:$8 sm:$0xf] %v2705_v63  ;;  %v2377_v27 = vsel %vm8844_vm12, %v7993_v19, %v2376_v47  ;;  %4245 = vmatpush.msra.mxu2 %v3349_v25  ;;  %4268 = vmatpush.msra.mxu3 %v3350_v53  ;;  %v2754_v57 = vpop.permute.xlu1 %2753  ;;  %v3436_v17 = vld [vmem:[#allocation4 + $0x388] sm:$0xff]  ;;  %v3394_v51 = vld [vmem:[#allocation4 + $0x238] sm:$0xff]  ;;  %v3353_v38 = vld [vmem:[#allocation4 + $0xf0] sm:$0xff] }
 0x395   : > { %2727 = vst [vmem:[#allocation4 + $0x391] ss:$8 sm:$0xf0] %v2705_v63  ;;  %v2760_v22 = vrot.slane %v2754_v57, 1  ;;  %5384 = vmatmul.msk.f32.vlgmr.msra.gmra.mxu2 %vm3501_vm7, %v8084_v16  ;;  %5387 = vmatmul.msk.f32.vlgmr.msra.gmra.mxu3 %vm3501_vm7, %v8084_v16  ;;  %v2378_v19 = vsel %vm8845_vm1, %v2360_v49, %v2366_v35  ;;  %v3392_v23 = vld [vmem:[#allocation4 + $0x228] sm:$0xff]  ;;  %v3395_v49 = vld [vmem:[#allocation4 + $0x240] sm:$0xff]  ;;  %v8126_v63 = vpop.f32.mrf.mxu2  ;;  %vm8851_vm4 = vmmov %vm8850_vm0 }
 0x396   : > { %2729 = vst.msk [vmem:[#allocation4 + $0x3d1] ss:$8 sm:$0x1] %vm6609_vm15, %v2706_v24  ;;  %5389 = vmatpush.msk.msrb.mxu0 %vm3508_vm11, %v3474_v33  ;;  %5392 = vmatpush.msk.msra.mxu1 %vm3508_vm11, %v3475_v12  ;;  %v3351_v35 = vld [vmem:[#allocation4 + $0xe0] sm:$0xff]  ;;  %v3352_v48 = vld [vmem:[#allocation4 + $0xe8] sm:$0xff]  ;;  %v8128_v24 = vpop.f32.mrf.mxu3  ;;  %vm8852_vm12 = vcmask 834560  }
 0x397   : > { %2398 = vst [vmem:[#allocation4 + $0x24c] ss:$8 sm:$0xf] %v2377_v27  ;;  %v2770_v56 = vsel %vm1642_vm14, %v2759_v44, %v2760_v22  ;;  %5395 = vmatpush.msk.msrb.mxu2 %vm3508_vm11, %v3476_v39  ;;  %5398 = vmatpush.msk.msrb.mxu3 %vm3508_vm11, %v3477_v31  ;;  %v2886_v0 = vpop.permute.xlu0 %2885  ;;  %v2772_v44 = vsel %vm8847_vm10, %v2754_v57, %v2760_v22  ;;  %v8142_v22 = vpop.f32.mrf.mxu0  ;;  %vm8853_vm1 = vmmov %vm8852_vm12  ;;  %vm5168_vm10 = vcmask 1045508  }
 0x398   : > { %2399 = vst [vmem:[#allocation4 + $0x24c] ss:$8 sm:$0xf0] %v2377_v27  ;;  %v2771_v11 = vsel %vm8846_vm6, %v7844_v3, %v2770_v56  ;;  %v2892_v40 = vrot.slane %v2886_v0, 1  ;;  %v2557_v59 = vpop.permute.xlu2 %2556  ;;  %4289 = vmatpush.msrb.mxu0 %v3433_v61  ;;  %4312 = vmatpush.msra.mxu1 %v3434_v4  ;;  %v3478_v15 = vld [vmem:[#allocation4 + $0x4d8] sm:$0x7] }
 0x399   : > { %2401 = vst.msk [vmem:[#allocation4 + $0x28c] ss:$8 sm:$0x1] %vm6609_vm15, %v2378_v19  ;;  %v2563_v2 = vrot.slane %v2557_v59, 1  ;;  %4335 = vmatpush.msrb.mxu2 %v3435_v5  ;;  %4358 = vmatpush.msrb.mxu3 %v3436_v17  ;;  %v3479_v58 = vld [vmem:[#allocation4 + $0x4e0] sm:$0x7]  ;;  %v8144_v39 = vpop.f32.mrf.mxu1 }
 0x39a   : > { %2792 = vst [vmem:[#allocation4 + $0x392] ss:$8 sm:$0xf] %v2771_v11  ;;  %v2902_v3 = vsel %vm1642_vm14, %v2891_v55, %v2892_v40  ;;  %4290 = vmatpush.msrb.mxu0 %v3392_v23  ;;  %4313 = vmatpush.msra.mxu1 %v3393_v52  ;;  %v2904_v55 = vsel %vm8849_vm13, %v2886_v0, %v2892_v40  ;;  %v3480_v47 = vld [vmem:[#allocation4 + $0x4e8] sm:$0x7]  ;;  %vm8858_vm6 = vcmask 1042434  }
 0x39b   : > { %2793 = vst [vmem:[#allocation4 + $0x392] ss:$8 sm:$0xf0] %v2771_v11  ;;  %v2903_v62 = vsel %vm8848_vm8, %v7737_v32, %v2902_v3  ;;  %v2572_v1 = vsel %vm1642_vm14, %v2562_v28, %v2563_v2  ;;  %4336 = vmatpush.msrb.mxu2 %v3394_v51  ;;  %4359 = vmatpush.msrb.mxu3 %v3395_v49  ;;  %v3354_v32 = vld [vmem:[#allocation4 + $0xf8] sm:$0xff]  ;;  %vm5170_vm8 = vcmask 1043456   ;;  %vm8859_vm13 = vcmask 1044484  }
 0x39c   : > { %2795 = vst.msk [vmem:[#allocation4 + $0x3d2] ss:$8 sm:$0x1] %vm6609_vm15, %v2772_v44  ;;  %5381 = vmatmul.msk.f32.vlgmr.msrb.gmra.mxu1 %vm3501_vm7, %v8084_v16  ;;  %5378 = vmatmul.msk.f32.vlgmr.msra.gmra.mxu0 %vm3501_vm7, %v8084_v16  ;;  %v2952_v26 = vpop.permute.xlu1 %2951  ;;  %v2573_v28 = vsel %vm8850_vm0, %v8027_v34, %v2572_v1  ;;  %v2574_v53 = vsel %vm8851_vm4, %v2557_v59, %v2563_v2  ;;  %v3481_v34 = vld [vmem:[#allocation4 + $0x4f0] sm:$0x7]  ;;  %vm8860_vm0 = vcmask 1046534   ;;  %vm8862_vm4 = vmmov %vm8858_vm6 }
 0x39d   : > { %2924 = vst [vmem:[#allocation4 + $0x394] ss:$8 sm:$0xf] %v2903_v62  ;;  %4291 = vmatpush.msrb.mxu0 %v3351_v35  ;;  %4314 = vmatpush.msra.mxu1 %v3352_v48  ;;  %v2958_v25 = vrot.slane %v2952_v26, 1 }
 0x39e   : > { %2925 = vst [vmem:[#allocation4 + $0x394] ss:$8 sm:$0xf0] %v2903_v62  ;;  %4337 = vmatpush.msrb.mxu2 %v3353_v38  ;;  %4360 = vmatpush.msrb.mxu3 %v3354_v32  ;;  %v8167_v61 = vpop.f32.mrf.mxu3 }
 0x39f   : > { %2927 = vst.msk [vmem:[#allocation4 + $0x3d4] ss:$8 sm:$0x1] %vm6609_vm15, %v2904_v55  ;;  %5401 = vmatpush.msk.msra.mxu0 %vm3508_vm11, %v3478_v15  ;;  %5404 = vmatpush.msk.msrb.mxu1 %vm3508_vm11, %v3479_v58  ;;  %v2968_v33 = vsel %vm1642_vm14, %v2957_v6, %v2958_v25  ;;  %v3084_v27 = vpop.permute.xlu0 %3083  ;;  %v2970_v6 = vsel %vm8853_vm1, %v2952_v26, %v2958_v25  ;;  %v8183_v5 = vpop.f32.mrf.mxu0 }
 0x3a0   : > { %2594 = vst [vmem:[#allocation4 + $0x24f] ss:$8 sm:$0xf] %v2573_v28  ;;  %5407 = vmatpush.msk.msra.mxu2 %vm3508_vm11, %v3480_v47  ;;  %5410 = vmatpush.msk.msra.mxu3 %vm3508_vm11, %v3481_v34  ;;  %v2969_v57 = vsel %vm8852_vm12, %v7882_v37, %v2968_v33  ;;  %v3090_v12 = vrot.slane %v3084_v27, 1  ;;  %v8237_v33 = vpop.permute.xlu2 %4661  ;;  %vm8863_vm12 = vmmov %vm8859_vm13 }
 0x3a1   : > { %2595 = vst [vmem:[#allocation4 + $0x24f] ss:$8 sm:$0xf0] %v2573_v28  ;;  %5385 = vmatmul.msk.f32.gmra.mxu2 %vm3501_vm7, %v7987_v8  ;;  %5388 = vmatmul.msk.f32.gmra.mxu3 %vm3501_vm7, %v7987_v8  ;;  %vm8864_vm1 = vmmov %vm8863_vm12 }
 0x3a2   : > { %2597 = vst.msk [vmem:[#allocation4 + $0x28f] ss:$8 sm:$0x1] %vm6609_vm15, %v2574_v53  ;;  %v3099_v37 = vsel %vm1642_vm14, %v3089_v54, %v3090_v12  ;;  %v3101_v31 = vsel %vm1489_vm2, %v3084_v27, %v3090_v12  ;;  %v8165_v54 = vpop.f32.mrf.mxu2 }
 0x3a3   : > { %2990 = vst [vmem:[#allocation4 + $0x395] ss:$8 sm:$0xf] %v2969_v57  ;;  %v3100_v19 = vsel %vm1489_vm2, %v7778_v45, %v3099_v37  ;;  %vm8854_vm2 = vcmask 474112  }
 0x3a4   : > { %2991 = vst [vmem:[#allocation4 + $0x395] ss:$8 sm:$0xf0] %v2969_v57  ;;  %5382 = vmatmul.msk.f32.gmra.mxu1 %vm3501_vm7, %v7987_v8  ;;  %5379 = vmatmul.msk.f32.gmra.mxu0 %vm3501_vm7, %v7987_v8 }
 0x3a5   : > { %2993 = vst.msk [vmem:[#allocation4 + $0x3d5] ss:$8 sm:$0x1] %vm6609_vm15, %v2970_v6  ;;  %v2096_v56 = vpop.permute.xlu1 %2095 }
 0x3a6   : > { %3121 = vst [vmem:[#allocation4 + $0x397] ss:$8 sm:$0xf] %v3100_v19  ;;  %v2102_v0 = vrot.slane %v2096_v56, 1  ;;  %v3813_v38 = vpop.f32.mrf.mxu3 }
 0x3a7   : > { %3122 = vst [vmem:[#allocation4 + $0x397] ss:$8 sm:$0xf0] %v3100_v19 }
 0x3a8   : > { %3124 = vst.msk [vmem:[#allocation4 + $0x3d7] ss:$8 sm:$0x1] %vm6609_vm15, %v3101_v31  ;;  %v2112_v45 = vsel %vm1642_vm14, %v2101_v41, %v2102_v0  ;;  %v2114_v4 = vsel %vm2104_vm5, %v2096_v56, %v2102_v0  ;;  %v2228_v11 = vpop.permute.xlu0 %2227  ;;  %v8185_v41 = vpop.f32.mrf.mxu1 }
 0x3a9   : > { %v2113_v40 = vsel %vm2104_vm5, %v7922_v43, %v2112_v45  ;;  %2137 = vst.msk [vmem:[#allocation4 + $0x288] ss:$8 sm:$0x1] %vm6609_vm15, %v2114_v4  ;;  %5396 = vmatmul.msk.f32.vlgmr.msrb.gmra.mxu2 %vm3501_vm7, %v8084_v16  ;;  %5399 = vmatmul.msk.f32.vlgmr.msrb.gmra.mxu3 %vm3501_vm7, %v8084_v16  ;;  %v2234_v59 = vrot.slane %v2228_v11, 1  ;;  %vm8855_vm5 = vmmov %vm8854_vm2 }
 0x3aa   : > { %2134 = vst [vmem:[#allocation4 + $0x248] ss:$8 sm:$0xf] %v2113_v40  ;;  %v3790_v48 = vpop.f32.mrf.mxu2 }
 0x3ab   : > { %2135 = vst [vmem:[#allocation4 + $0x248] ss:$8 sm:$0xf0] %v2113_v40  ;;  %v2244_v43 = vsel %vm1642_vm14, %v2233_v18, %v2234_v59  ;;  %v2246_v17 = vsel %vm2236_vm9, %v2228_v11, %v2234_v59 }
 0x3ac   : > { %v2245_v44 = vsel %vm2236_vm9, %v7822_v7, %v2244_v43  ;;  %2269 = vst.msk [vmem:[#allocation4 + $0x28a] ss:$8 sm:$0x1] %vm6609_vm15, %v2246_v17  ;;  %5390 = vmatmul.msk.f32.vlgmr.msrb.gmra.mxu0 %vm3501_vm7, %v8084_v16  ;;  %5393 = vmatmul.msk.f32.vlgmr.msra.gmra.mxu1 %vm3501_vm7, %v8084_v16  ;;  %vm8856_vm9 = vcmask 326656  }
 0x3ad   : > { %2266 = vst [vmem:[#allocation4 + $0x24a] ss:$8 sm:$0xf] %v2245_v44  ;;  %v3437_v2 = vld [vmem:[#allocation4 + $0x390] sm:$0xff]  ;;  %v3438_v23 = vld [vmem:[#allocation4 + $0x398] sm:$0xff]  ;;  %v3439_v52 = vld [vmem:[#allocation4 + $0x3a0] sm:$0xff]  ;;  %v2294_v3 = vpop.permute.xlu1 %2293 }
 0x3ae   : > { %2267 = vst [vmem:[#allocation4 + $0x24a] ss:$8 sm:$0xf0] %v2245_v44  ;;  %4381 = vmatpush.msra.mxu0 %v3437_v2  ;;  %4404 = vmatpush.msrb.mxu1 %v3438_v23  ;;  %v3440_v18 = vld [vmem:[#allocation4 + $0x3a8] sm:$0xff]  ;;  %v2300_v51 = vrot.slane %v2294_v3, 1 }
 0x3af   : > { %4427 = vmatpush.msra.mxu2 %v3439_v52  ;;  %4450 = vmatpush.msra.mxu3 %v3440_v18 }
 0x3b0   : > { %v2310_v7 = vsel %vm1642_vm14, %v2299_v42, %v2300_v51  ;;  %v2312_v49 = vsel %vm8854_vm2, %v2294_v3, %v2300_v51  ;;  %v2426_v62 = vpop.permute.xlu0 %2425  ;;  %vm8865_vm2 = vmmov %vm8860_vm0 }
 0x3b1   : > { %v2311_v1 = vsel %vm8855_vm5, %v7963_v29, %v2310_v7  ;;  %2335 = vst.msk [vmem:[#allocation4 + $0x28b] ss:$8 sm:$0x1] %vm6609_vm15, %v2312_v49  ;;  %5397 = vmatmul.msk.f32.gmra.mxu2 %vm3501_vm7, %v7987_v8  ;;  %5400 = vmatmul.msk.f32.gmra.mxu3 %vm3501_vm7, %v7987_v8  ;;  %v2432_v35 = vrot.slane %v2426_v62, 1  ;;  %vm8866_vm5 = vmmov %vm8860_vm0 }
 0x3b2   : > { %2332 = vst [vmem:[#allocation4 + $0x24b] ss:$8 sm:$0xf] %v2311_v1 }
 0x3b3   : > { %2333 = vst [vmem:[#allocation4 + $0x24b] ss:$8 sm:$0xf0] %v2311_v1  ;;  %v2442_v42 = vsel %vm1642_vm14, %v2431_v60, %v2432_v35  ;;  %v2444_v29 = vsel %vm2434_vm3, %v2426_v62, %v2432_v35 }
 0x3b4   : > { %v2443_v55 = vsel %vm2434_vm3, %v7863_v21, %v2442_v42  ;;  %2467 = vst.msk [vmem:[#allocation4 + $0x28d] ss:$8 sm:$0x1] %vm6609_vm15, %v2444_v29  ;;  %5391 = vmatmul.msk.f32.gmra.mxu0 %vm3501_vm7, %v7987_v8  ;;  %5394 = vmatmul.msk.f32.gmra.mxu1 %vm3501_vm7, %v7987_v8  ;;  %v3833_v32 = vpop.f32.mrf.mxu0  ;;  %v3856_v15 = vpop.f32.mrf.mxu1  ;;  %vm8857_vm3 = vmmov %vm8856_vm9  ;;  %v3356_v42 = vld [vmem:[#allocation4 + $0x108] sm:$0xff] }
 0x3b5   : > { %2464 = vst [vmem:[#allocation4 + $0x24d] ss:$8 sm:$0xf] %v2443_v55  ;;  %v2492_v26 = vpop.permute.xlu1 %2491 }
 0x3b6   : > { %2465 = vst [vmem:[#allocation4 + $0x24d] ss:$8 sm:$0xf0] %v2443_v55  ;;  %v2498_v60 = vrot.slane %v2492_v26, 1 }
 0x3b8   : > { %v2507_v28 = vsel %vm1642_vm14, %v2497_v46, %v2498_v60  ;;  %v2509_v21 = vsel %vm8856_vm9, %v2492_v26, %v2498_v60  ;;  %v8227_v58 = vpop.permute.xlu0 %3493  ;;  %v3357_v60 = vld [vmem:[#allocation4 + $0x110] sm:$0xff]  ;;  %vm5161_vm14 = vcmask 1040384   ;;  %vm8867_vm9 = vmmov %vm8862_vm4 }
 0x3b9   : > { %v2508_v25 = vsel %vm8857_vm3, %v8002_v9, %v2507_v28  ;;  %2532 = vst.msk [vmem:[#allocation4 + $0x28e] ss:$8 sm:$0x1] %vm6609_vm15, %v2509_v21  ;;  %v3834_v47 = vadd.f32 %v3833_v32, %v8227_v58  ;;  %v3857_v53 = vadd.f32 %v3856_v15, %v8227_v58  ;;  %v3650_v34 = vadd.f32 %v8095_v30, %v8227_v58  ;;  %v3358_v28 = vld [vmem:[#allocation4 + $0x118] sm:$0xff]  ;;  %vm8868_vm3 = vmmov %vm8864_vm1 }
 0x3ba   : > { %2529 = vst [vmem:[#allocation4 + $0x24e] ss:$8 sm:$0xf] %v2508_v25  ;;  %v3673_v46 = vadd.f32 %v8053_v50, %v8227_v58  ;;  %v8243_v12 = vadd.f32 %v8075_v10, %v8227_v58  ;;  %v8247_v6 = vadd.f32 %v8077_v14, %v8227_v58  ;;  %v8251_v30 = vadd.f32 %v8142_v22, %v8227_v58 }
 0x3bb   : > { %2530 = vst [vmem:[#allocation4 + $0x24e] ss:$8 sm:$0xf0] %v2508_v25  ;;  %v4583_v27 = vmax.f32 %v3834_v47, 0.0  ;;  %v3879_v57 = vpop.f32.mrf.mxu2  ;;  %v3902_v9 = vpop.f32.mrf.mxu3  ;;  %v4584_v37 = vmax.f32 %v3857_v53, 0.0  ;;  %v4575_v0 = vmax.f32 %v3650_v34, 0.0  ;;  %v8262_v14 = vadd.f32 %v8144_v39, %v8227_v58 }
 0x3bc   : > { %v3880_v19 = vadd.f32 %v3879_v57, %v8227_v58  ;;  %v3903_v50 = vadd.f32 %v3902_v9, %v8227_v58  ;;  %v3836_v31 = vpop.f32.mrf.mxu0  ;;  %v3859_v56 = vpop.f32.mrf.mxu1  ;;  %v4576_v4 = vmax.f32 %v3673_v46, 0.0  ;;  %v8266_v22 = vadd.f32 %v8165_v54, %v8227_v58 }
 0x3bd   : > { %v8255_v45 = vpop.permute.xlu1 %3498  ;;  %v8258_v10 = vmul.f32 %v8237_v33, %v4583_v27  ;;  %v8287_v2 = vmul.f32 %v8237_v33, %v4584_v37  ;;  %v8294_v23 = vadd.f32 %v8167_v61, %v8227_v58  ;;  %v4577_v9 = vmax.f32 %v8243_v12, 0.0 }
 0x3be   : > { %v8270_v11 = vadd.f32 %v8183_v5, %v8255_v45  ;;  %v8274_v40 = vadd.f32 %v8185_v41, %v8255_v45  ;;  %v8277_v59 = vadd.f32 %v3790_v48, %v8255_v45  ;;  %v8280_v43 = vadd.f32 %v3813_v38, %v8255_v45  ;;  %v3355_v38 = vld [vmem:[#allocation4 + $0x100] sm:$0xff] }
 0x3bf   : > { %v4585_v39 = vmax.f32 %v3880_v19, 0.0  ;;  %v4586_v17 = vmax.f32 %v3903_v50, 0.0  ;;  %v3837_v44 = vadd.f32 %v3836_v31, %v8255_v45  ;;  %v3653_v54 = vadd.f32 %v8018_v36, %v8255_v45 }
 0x3c0   : > { %v4620_v5 = vmax.f32 %v8270_v11, 0.0  ;;  %v8290_v41 = vmul.f32 %v8237_v33, %v4575_v0  ;;  %v4621_v52 = vmax.f32 %v8274_v40, 0.0  ;;  %v4622_v3 = vmax.f32 %v8277_v59, 0.0  ;;  %v3482_v0 = vld [vmem:[#allocation4 + $0x4f8] sm:$0x7] }
 0x3c1   : > { %v4623_v18 = vmax.f32 %v8280_v43, 0.0  ;;  %v3396_v51 = vld [vmem:[#allocation4 + $0x248] sm:$0xff]  ;;  %v3397_v36 = vld [vmem:[#allocation4 + $0x250] sm:$0xff]  ;;  %v3398_v7 = vld [vmem:[#allocation4 + $0x258] sm:$0xff]  ;;  %v3676_v49 = vadd.f32 %v8097_v20, %v8255_v45  ;;  %v8302_v1 = vmul.f32 %v8237_v33, %v4585_v39  ;;  %v4624_v61 = vmax.f32 %v3837_v44, 0.0 }
 0x3c2   : > { %4382 = vmatpush.msra.mxu0 %v3396_v51  ;;  %4405 = vmatpush.msrb.mxu1 %v3397_v36  ;;  %v3399_v62 = vld [vmem:[#allocation4 + $0x260] sm:$0xff]  ;;  %v3860_v35 = vadd.f32 %v3859_v56, %v8255_v45  ;;  %v4616_v48 = vmax.f32 %v3653_v54, 0.0  ;;  %v8306_v29 = vmul.f32 %v8237_v33, %v4586_v17  ;;  %v4670_v20 = vmul.f32 %v8237_v33, %v4576_v4  ;;  %v3484_v51 = vld [vmem:[#allocation4 + $0x508] sm:$0x7]  ;;  %v3485_v36 = vld [vmem:[#allocation4 + $0x510] sm:$0x7] }
 0x3c3   : > { %4428 = vmatpush.msra.mxu2 %v3398_v7  ;;  %4451 = vmatpush.msra.mxu3 %v3399_v62  ;;  %v4617_v55 = vmax.f32 %v3676_v49, 0.0  ;;  %v3882_v32 = vpop.f32.mrf.mxu2  ;;  %v3905_v15 = vpop.f32.mrf.mxu3  ;;  %v8311_v26 = vadd.f32 %v8126_v63, %v8255_v45  ;;  %v8317_v46 = vadd.f32 %v8128_v24, %v8255_v45  ;;  %v4578_v37 = vmax.f32 %v8247_v6, 0.0  ;;  %v3483_v4 = vld [vmem:[#allocation4 + $0x500] sm:$0x7] }
 0x3c4   : > { %4383 = vmatpush.msra.mxu0 %v3355_v38  ;;  %4406 = vmatpush.msrb.mxu1 %v3356_v42  ;;  %v4625_v21 = vmax.f32 %v3860_v35, 0.0  ;;  %v3883_v25 = vadd.f32 %v3882_v32, %v8255_v45  ;;  %v3906_v47 = vadd.f32 %v3905_v15, %v8255_v45  ;;  %v5042_v53 = vpop.permute.xlu2 %5041  ;;  %v3925_v34 = vpop.f32.mrf.mxu0  ;;  %v3441_v35 = vld [vmem:[#allocation4 + $0x3b0] sm:$0xff] }
 0x3c5   : > { %4429 = vmatpush.msra.mxu2 %v3357_v60  ;;  %4452 = vmatpush.msra.mxu3 %v3358_v28  ;;  %v8319_v27 = vpop.permute.xlu1 %4666  ;;  %v8321_v63 = vperm.slane %v5042_v53, 0  ;;  %v3926_v57 = vadd.f32 %v3925_v34, %v8227_v58  ;;  %v3948_v56 = vpop.f32.mrf.mxu1 }
 0x3c6   : > { %5402 = vmatmul.msk.f32.vlgmr.msra.gmra.mxu0 %vm3501_vm7, %v8084_v16  ;;  %5405 = vmatmul.msk.f32.vlgmr.msrb.gmra.mxu1 %vm3501_vm7, %v8084_v16  ;;  %v4718_v24 = vmul.f32 %v8319_v27, %v4624_v61  ;;  %v4710_v19 = vmul.f32 %v8319_v27, %v4616_v48  ;;  %v4711_v50 = vmul.f32 %v8319_v27, %v4617_v55  ;;  %v4626_v31 = vmax.f32 %v3883_v25, 0.0  ;;  %v3442_v48 = vld [vmem:[#allocation4 + $0x3b8] sm:$0xff]  ;;  %v3401_v25 = vld [vmem:[#allocation4 + $0x270] sm:$0xff] }
 0x3c7   : > { %5408 = vmatmul.msk.f32.vlgmr.msra.gmra.mxu2 %vm3501_vm7, %v8084_v16  ;;  %5411 = vmatmul.msk.f32.vlgmr.msra.gmra.mxu3 %vm3501_vm7, %v8084_v16  ;;  %v4719_v39 = vmul.f32 %v8319_v27, %v4625_v21  ;;  %v4627_v17 = vmax.f32 %v3906_v47, 0.0  ;;  %v4587_v44 = vmax.f32 %v3926_v57, 0.0  ;;  %v3949_v54 = vadd.f32 %v3948_v56, %v8227_v58  ;;  %v3400_v21 = vld [vmem:[#allocation4 + $0x268] sm:$0xff]  ;;  %v3402_v57 = vld [vmem:[#allocation4 + $0x278] sm:$0xff] }
 0x3c8   : > { %5413 = vmatpush.msk.msrb.mxu0 %vm3508_vm11, %v3482_v0  ;;  %5416 = vmatpush.msk.msra.mxu1 %vm3508_vm11, %v3483_v4  ;;  %v4807_v7 = vadd.f32 %v4718_v24, %v8258_v10  ;;  %v4751_v49 = vadd.f32 %v4710_v19, %v8290_v41  ;;  %v4758_v62 = vadd.f32 %v4711_v50, %v4670_v20  ;;  %v4579_v61 = vmax.f32 %v8251_v30, 0.0  ;;  %v3443_v10 = vld [vmem:[#allocation4 + $0x3c0] sm:$0xff]  ;;  %v3444_v41 = vld [vmem:[#allocation4 + $0x3c8] sm:$0xff] }
 0x3c9   : > { %5419 = vmatpush.msk.msrb.mxu2 %vm3508_vm11, %v3484_v51  ;;  %5422 = vmatpush.msk.msrb.mxu3 %vm3508_vm11, %v3485_v36  ;;  %v4814_v38 = vadd.f32 %v4719_v39, %v8287_v2  ;;  %v4720_v42 = vmul.f32 %v8319_v27, %v4626_v31  ;;  %v4721_v55 = vmul.f32 %v8319_v27, %v4627_v17  ;;  %v4588_v32 = vmax.f32 %v3949_v54, 0.0  ;;  %v3403_v24 = vld [vmem:[#allocation4 + $0x280] sm:$0xff]  ;;  %v3360_v39 = vld [vmem:[#allocation4 + $0x128] sm:$0xff]  ;;  %v3361_v36 = vld [vmem:[#allocation4 + $0x130] sm:$0xff] }
 0x3ca   : > { %4473 = vmatpush.msrb.mxu0 %v3441_v35  ;;  %4496 = vmatpush.msra.mxu1 %v3442_v48  ;;  %v4808_v20 = vrot.slane %v4807_v7, 4  ;;  %v4752_v15 = vrot.slane %v4751_v49, 4  ;;  %v4759_v60 = vrot.slane %v4758_v62, 4  ;;  %v8350_v28 = vmul.f32 %v8237_v33, %v4587_v44  ;;  %v3359_v4 = vld [vmem:[#allocation4 + $0x120] sm:$0xff] }
 0x3cb   : > { %4519 = vmatpush.msrb.mxu2 %v3443_v10  ;;  %4542 = vmatpush.msrb.mxu3 %v3444_v41  ;;  %v4815_v2 = vrot.slane %v4814_v38, 4  ;;  %v4821_v47 = vadd.f32 %v4720_v42, %v8302_v1  ;;  %v4828_v53 = vadd.f32 %v4721_v55, %v8306_v29  ;;  %v8355_v34 = vmul.f32 %v8237_v33, %v4588_v32  ;;  %v3486_v42 = vld [vmem:[#allocation4 + $0x518] sm:$0x7] }
 0x3cc   : > { %4474 = vmatpush.msrb.mxu0 %v3400_v21  ;;  %4497 = vmatpush.msra.mxu1 %v3401_v25  ;;  %v4809_v19 = vadd.f32 %v4808_v20, %v4807_v7  ;;  %v4753_v50 = vadd.f32 %v4752_v15, %v4751_v49  ;;  %v4760_v31 = vadd.f32 %v4759_v60, %v4758_v62  ;;  %v3928_v56 = vpop.f32.mrf.mxu0  ;;  %v4580_v0 = vmax.f32 %v8262_v14, 0.0  ;;  %v3362_v7 = vld [vmem:[#allocation4 + $0x138] sm:$0xff]  ;;  %v3445_v21 = vld [vmem:[#allocation4 + $0x3d0] sm:$0xff] }
 0x3cd   : > { %4520 = vmatpush.msrb.mxu2 %v3402_v57  ;;  %4543 = vmatpush.msrb.mxu3 %v3403_v24  ;;  %v4816_v1 = vadd.f32 %v4815_v2, %v4814_v38  ;;  %v4822_v17 = vrot.slane %v4821_v47, 4  ;;  %v4829_v29 = vrot.slane %v4828_v53, 4  ;;  %v3971_v44 = vpop.f32.mrf.mxu2  ;;  %v3994_v54 = vpop.f32.mrf.mxu3  ;;  %v3929_v51 = vadd.f32 %v3928_v56, %v8255_v45 }
 0x3ce   : > { %4475 = vmatpush.msrb.mxu0 %v3359_v4  ;;  %4498 = vmatpush.msra.mxu1 %v3360_v39  ;;  %v4810_v49 = vrot.slane %v4809_v19, 2  ;;  %v4754_v62 = vrot.slane %v4753_v50, 2  ;;  %v4761_v35 = vrot.slane %v4760_v31, 2  ;;  %v3972_v48 = vadd.f32 %v3971_v44, %v8227_v58 }
 0x3cf   : > { %4521 = vmatpush.msrb.mxu2 %v3361_v36  ;;  %4544 = vmatpush.msrb.mxu3 %v3362_v7  ;;  %v4817_v55 = vrot.slane %v4816_v1, 2  ;;  %v4823_v38 = vadd.f32 %v4822_v17, %v4821_v47  ;;  %v4830_v32 = vadd.f32 %v4829_v29, %v4828_v53  ;;  %v3995_v10 = vadd.f32 %v3994_v54, %v8227_v58  ;;  %v3404_v17 = vld [vmem:[#allocation4 + $0x288] sm:$0xff] }
 0x3d0   : > { %5425 = vmatpush.msk.msra.mxu0 %vm3508_vm11, %v3486_v42  ;;  %5406 = vmatmul.msk.f32.gmra.mxu1 %vm3501_vm7, %v7987_v8  ;;  %v4811_v41 = vadd.f32 %v4810_v49, %v4809_v19  ;;  %v4755_v20 = vadd.f32 %v4754_v62, %v4753_v50  ;;  %v4762_v15 = vadd.f32 %v4761_v35, %v4760_v31  ;;  %v4589_v60 = vmax.f32 %v3972_v48, 0.0  ;;  %v3951_v31 = vpop.f32.mrf.mxu1  ;;  %v3363_v35 = vld [vmem:[#allocation4 + $0x140] sm:$0xff] }
 0x3d1   : > { %5403 = vmatmul.msk.f32.gmra.mxu0 %vm3501_vm7, %v7987_v8  ;;  %5409 = vmatmul.msk.f32.gmra.mxu2 %vm3501_vm7, %v7987_v8  ;;  %v4818_v25 = vadd.f32 %v4817_v55, %v4816_v1  ;;  %v4824_v2 = vrot.slane %v4823_v38, 2  ;;  %v4831_v47 = vrot.slane %v4830_v32, 2  ;;  %v4590_v53 = vmax.f32 %v3995_v10, 0.0 }
 0x3d2   : > { %5412 = vmatmul.msk.f32.gmra.mxu3 %vm3501_vm7, %v7987_v8  ;;  %4565 = vmatpush.msra.mxu0 %v3445_v21  ;;  %v4812_v57 = vrot.slane %v4811_v41, 1  ;;  %v4756_v24 = vrot.slane %v4755_v20, 1  ;;  %v4763_v19 = vrot.slane %v4762_v15, 1  ;;  %v4683_v50 = vmul.f32 %v8237_v33, %v4589_v60 }
 0x3d3   : > { %v4819_v56 = vrot.slane %v4818_v25, 1  ;;  %v4825_v4 = vadd.f32 %v4824_v2, %v4823_v38  ;;  %v4832_v39 = vadd.f32 %v4831_v47, %v4830_v32  ;;  %v4684_v29 = vmul.f32 %v8237_v33, %v4590_v53 }
 0x3d4   : > { %v4813_v1 = vadd.f32 %v4812_v57, %v4811_v41  ;;  %v4757_v44 = vadd.f32 %v4756_v24, %v4755_v20  ;;  %v4764_v54 = vadd.f32 %v4763_v19, %v4762_v15  ;;  %4566 = vmatpush.msra.mxu0 %v3404_v17  ;;  %v4628_v36 = vmax.f32 %v3929_v51, 0.0 }
 0x3d5   : > { %v4820_v7 = vadd.f32 %v4819_v56, %v4818_v25  ;;  %v4826_v49 = vrot.slane %v4825_v4, 1  ;;  %v4833_v62 = vrot.slane %v4832_v39, 1  ;;  %v3952_v48 = vadd.f32 %v3951_v31, %v8255_v45  ;;  %v3974_v42 = vpop.f32.mrf.mxu2  ;;  %v3997_v55 = vpop.f32.mrf.mxu3 }
 0x3d6   : > { %vm5164_vm11 = vcmask 1041408   ;;  %4567 = vmatpush.msra.mxu0 %v3363_v35  ;;  %v5045_v38 = vadd.f32 %v8321_v63, %v4757_v44  ;;  %v5046_v32 = vadd.f32 %v8321_v63, %v4764_v54  ;;  %v5053_v10 = vadd.f32 %v8321_v63, %v4813_v1 }
 0x3d7   : > { %v4722_v41 = vmul.f32 %v8319_v27, %v4628_v36  ;;  %v4827_v20 = vadd.f32 %v4826_v49, %v4825_v4  ;;  %v4834_v51 = vadd.f32 %v4833_v62, %v4832_v39  ;;  %v5054_v15 = vadd.f32 %v8321_v63, %v4820_v7 }
 0x3d8   : > { %v4629_v60 = vmax.f32 %v3952_v48, 0.0  ;;  %v5126_v21 = vrot.slane %v5046_v32, 7  ;;  %5417 = vmatmul.msk.f32.vlgmr.msra.gmra.mxu1 %vm3501_vm7, %v8084_v16  ;;  %v3975_v2 = vadd.f32 %v3974_v42, %v8255_v45  ;;  %v3998_v47 = vadd.f32 %v3997_v55, %v8255_v45 }
 0x3d9   : > { %v4835_v25 = vadd.f32 %v4722_v41, %v8350_v28  ;;  %v5055_v53 = vadd.f32 %v8321_v63, %v4827_v20  ;;  %v5056_v57 = vadd.f32 %v8321_v63, %v4834_v51  ;;  %5414 = vmatmul.msk.f32.vlgmr.msrb.gmra.mxu0 %vm3501_vm7, %v8084_v16  ;;  %v5133_v24 = vrot.slane %v5054_v15, 7  ;;  %5420 = vmatmul.msk.f32.vlgmr.msrb.gmra.mxu2 %vm3501_vm7, %v8084_v16 }
 0x3da   : > { %v4723_v19 = vmul.f32 %v8319_v27, %v4629_v60  ;;  %v8391_v31 = vsel %vm5161_vm14, %v5045_v38, %v5126_v21  ;;  %5423 = vmatmul.msk.f32.vlgmr.msrb.gmra.mxu3 %vm3501_vm7, %v8084_v16  ;;  %v4630_v56 = vmax.f32 %v3975_v2, 0.0  ;;  %v4631_v4 = vmax.f32 %v3998_v47, 0.0 }
 0x3db   : > { %v4836_v28 = vrot.slane %v4835_v25, 4  ;;  %v5134_v39 = vrot.slane %v5055_v53, 6  ;;  %v5135_v17 = vrot.slane %v5056_v57, 5  ;;  %v4581_v44 = vmax.f32 %v8266_v22, 0.0 }
 0x3dc   : > { %v4842_v1 = vadd.f32 %v4723_v19, %v8355_v34  ;;  %v5172_v54 = vsel %vm5161_vm14, %v5053_v10, %v5133_v24  ;;  %v4724_v7 = vmul.f32 %v8319_v27, %v4630_v56  ;;  %v4725_v49 = vmul.f32 %v8319_v27, %v4631_v4 }
 0x3dd   : > { %v4837_v36 = vadd.f32 %v4836_v28, %v4835_v25  ;;  %v5173_v62 = vsel %vm8858_vm6, %v5134_v39, %v5135_v17  ;;  %v4582_v48 = vmax.f32 %v8294_v23, 0.0  ;;  %v4618_v42 = vmax.f32 %v8311_v26, 0.0 }
 0x3de   : > { %v4843_v35 = vrot.slane %v4842_v1, 4  ;;  %v4849_v38 = vadd.f32 %v4724_v7, %v4683_v50  ;;  %v4856_v32 = vadd.f32 %v4725_v49, %v4684_v29  ;;  %v4619_v34 = vmax.f32 %v8317_v46, 0.0 }
 0x3df   : > { %v4838_v55 = vrot.slane %v4837_v36, 2  ;;  %v8405_v22 = vsel %vm5164_vm11, %v5172_v54, %v5173_v62  ;;  %v4671_v41 = vmul.f32 %v8237_v33, %v4577_v9  ;;  %v4672_v20 = vmul.f32 %v8237_v33, %v4578_v37 }
 0x3e0   : > { %v4844_v10 = vadd.f32 %v4843_v35, %v4842_v1  ;;  %5418 = vmatmul.msk.f32.gmra.mxu1 %vm3501_vm7, %v7987_v8  ;;  %v4850_v26 = vrot.slane %v4849_v38, 4  ;;  %v4857_v50 = vrot.slane %v4856_v32, 4  ;;  %v4673_v46 = vmul.f32 %v8237_v33, %v4579_v61 }
 0x3e1   : > { %v4839_v23 = vadd.f32 %v4838_v55, %v4837_v36  ;;  %5415 = vmatmul.msk.f32.gmra.mxu0 %vm3501_vm7, %v7987_v8  ;;  %5421 = vmatmul.msk.f32.gmra.mxu2 %vm3501_vm7, %v7987_v8  ;;  %v8425_v6 = vmul.f32 %v8237_v33, %v4580_v0  ;;  %v8428_v9 = vmul.f32 %v8237_v33, %v4581_v44 }
 0x3e2   : > { %v4845_v12 = vrot.slane %v4844_v10, 2  ;;  %v4712_v37 = vmul.f32 %v8319_v27, %v4618_v42  ;;  %5424 = vmatmul.msk.f32.gmra.mxu3 %vm3501_vm7, %v7987_v8  ;;  %v4851_v61 = vadd.f32 %v4850_v26, %v4849_v38  ;;  %v4858_v29 = vadd.f32 %v4857_v50, %v4856_v32 }
 0x3e3   : > { %v4840_v30 = vrot.slane %v4839_v23, 1  ;;  %v4713_v51 = vmul.f32 %v8319_v27, %v4619_v34  ;;  %v8435_v60 = vmul.f32 %v8237_v33, %v4582_v48  ;;  %v4714_v14 = vmul.f32 %v8319_v27, %v4620_v5 }
 0x3e4   : > { %v4846_v15 = vadd.f32 %v4845_v12, %v4844_v10  ;;  %v4715_v0 = vmul.f32 %v8319_v27, %v4621_v52  ;;  %v4852_v25 = vrot.slane %v4851_v61, 2  ;;  %v4859_v8 = vrot.slane %v4858_v29, 2  ;;  %v4017_v2 = vpop.f32.mrf.mxu0  ;;  %v4040_v47 = vpop.f32.mrf.mxu1 }
 0x3e5   : > { %v4841_v21 = vadd.f32 %v4840_v30, %v4839_v23  ;;  %v8446_v53 = vmul.f32 %v8319_v27, %v4622_v3  ;;  %v4018_v24 = vadd.f32 %v4017_v2, %v8227_v58  ;;  %v4041_v11 = vadd.f32 %v4040_v47, %v8227_v58 }
 0x3e6   : > { %v4847_v57 = vrot.slane %v4846_v15, 1  ;;  %v4765_v5 = vadd.f32 %v4712_v37, %v4671_v41  ;;  %v4853_v19 = vadd.f32 %v4852_v25, %v4851_v61  ;;  %v4860_v52 = vadd.f32 %v4859_v8, %v4858_v29 }
 0x3e7   : > { %v5057_v40 = vadd.f32 %v8321_v63, %v4841_v21  ;;  %v4772_v28 = vadd.f32 %v4713_v51, %v4672_v20  ;;  %v4591_v4 = vmax.f32 %v4018_v24, 0.0  ;;  %v4592_v39 = vmax.f32 %v4041_v11, 0.0  ;;  %v4063_v17 = vpop.f32.mrf.mxu2  ;;  %v4086_v1 = vpop.f32.mrf.mxu3 }
 0x3e8   : > { %v4848_v56 = vadd.f32 %v4847_v57, %v4846_v15  ;;  %v4766_v59 = vrot.slane %v4765_v5, 4  ;;  %v4854_v44 = vrot.slane %v4853_v19, 1  ;;  %v4861_v3 = vrot.slane %v4860_v52, 1 }
 0x3e9   : > { %v4064_v54 = vadd.f32 %v4063_v17, %v8227_v58  ;;  %v8455_v36 = vmul.f32 %v8319_v27, %v4623_v18  ;;  %v5136_v7 = vrot.slane %v5057_v40, 4  ;;  %5426 = vmatmul.msk.f32.vlgmr.msra.gmra.mxu0 %vm3501_vm7, %v8084_v16  ;;  %v4685_v62 = vmul.f32 %v8237_v33, %v4591_v4  ;;  %v5541_v40 = vld [vmem:[%s8692_s1 + $0x8] sm:$0xff] }
 0x3ea   : > { %v5058_v49 = vadd.f32 %v8321_v63, %v4848_v56  ;;  %v4087_v35 = vadd.f32 %v4086_v1, %v8227_v58  ;;  %v4855_v48 = vadd.f32 %v4854_v44, %v4853_v19  ;;  %v4862_v42 = vadd.f32 %v4861_v3, %v4860_v52 }
 0x3eb   : > { %v4593_v55 = vmax.f32 %v4064_v54, 0.0  ;;  %v4767_v38 = vadd.f32 %v4766_v59, %v4765_v5  ;;  %v4686_v43 = vmul.f32 %v8237_v33, %v4592_v39  ;;  %v4773_v18 = vrot.slane %v4772_v28, 4 }
 0x3ec   : > { %v5137_v32 = vrot.slane %v5058_v49, 3  ;;  %v4779_v34 = vadd.f32 %v4714_v14, %v4673_v46  ;;  %v5059_v10 = vadd.f32 %v8321_v63, %v4855_v48  ;;  %v5060_v41 = vadd.f32 %v8321_v63, %v4862_v42  ;;  %v4020_v16 = vpop.f32.mrf.mxu0  ;;  %v4043_v23 = vpop.f32.mrf.mxu1 }
 0x3ed   : > { %v4594_v20 = vmax.f32 %v4087_v35, 0.0  ;;  %v4768_v26 = vrot.slane %v4767_v38, 2  ;;  %v4687_v12 = vmul.f32 %v8237_v33, %v4593_v55  ;;  %v4021_v37 = vadd.f32 %v4020_v16, %v8255_v45 }
 0x3ee   : > { %v5175_v50 = vsel %vm8859_vm13, %v5136_v7, %v5137_v32  ;;  %v4044_v30 = vadd.f32 %v4043_v23, %v8255_v45  ;;  %v5138_v61 = vrot.slane %v5059_v10, 2  ;;  %v5139_v29 = vrot.slane %v5060_v41, 1  ;;  %vm8870_vm13 = vmmov %vm8862_vm4 }
 0x3ef   : > { %v4769_v46 = vadd.f32 %v4768_v26, %v4767_v38  ;;  %v4774_v51 = vadd.f32 %v4773_v18, %v4772_v28  ;;  %v4632_v15 = vmax.f32 %v4021_v37, 0.0  ;;  %v4066_v21 = vpop.f32.mrf.mxu2  ;;  %v4089_v25 = vpop.f32.mrf.mxu3  ;;  %v4780_v8 = vrot.slane %v4779_v34, 4 }
 0x3f0   : > { %v4633_v14 = vmax.f32 %v4044_v30, 0.0  ;;  %v8471_v2 = vadd.f32 %v4715_v0, %v8425_v6  ;;  %v5176_v47 = vsel %vm8860_vm0, %v5138_v61, %v5139_v29  ;;  %v4067_v57 = vadd.f32 %v4066_v21, %v8255_v45 }
 0x3f1   : > { %v4090_v24 = vadd.f32 %v4089_v25, %v8255_v45  ;;  %v4770_v11 = vrot.slane %v4769_v46, 1  ;;  %v5177_v5 = vsel %vm5168_vm10, %v5175_v50, %v5176_v47  ;;  %5427 = vmatmul.msk.f32.gmra.mxu0 %vm3501_vm7, %v5541_v40  ;;  %v4726_v19 = vmul.f32 %v8319_v27, %v4632_v15  ;;  %vm8861_vm7 = vmmov %vm8858_vm6 }
 0x3f2   : > { %v4727_v6 = vmul.f32 %v8319_v27, %v4633_v14  ;;  %v4775_v0 = vrot.slane %v4774_v51, 2  ;;  %v5178_v52 = vsel %vm5170_vm8, %v8405_v22, %v5177_v5  ;;  %v4688_v28 = vmul.f32 %v8237_v33, %v4594_v20  ;;  %vm8869_vm6 = vmmov %vm8860_vm0 }
 0x3f3   : > { %v4634_v56 = vmax.f32 %v4067_v57, 0.0  ;;  %v4635_v4 = vmax.f32 %v4090_v24, 0.0  ;;  %v4863_v39 = vadd.f32 %v4726_v19, %v4685_v62  ;;  %5206 = vst [vmem:[%s8486_s29 + $0x8] sm:$0xff] %v5178_v52  ;;  %v4781_v59 = vadd.f32 %v4780_v8, %v4779_v34  ;;  %vm8871_vm0 = vmmov %vm8864_vm1 }
 0x3f4   : > { %v4870_v17 = vadd.f32 %v4727_v6, %v4686_v43  ;;  %v4776_v1 = vadd.f32 %v4775_v0, %v4774_v51  ;;  %v4109_v54 = vpop.f32.mrf.mxu0  ;;  %v4132_v7 = vpop.f32.mrf.mxu1  ;;  %v8491_v49 = vadd.f32 %v4770_v11, %v4769_v46  ;;  %v8495_v22 = vadd.f32 %v8446_v53, %v8428_v9 }
 0x3f5   : > { %v4728_v44 = vmul.f32 %v8319_v27, %v4634_v56  ;;  %v4729_v3 = vmul.f32 %v8319_v27, %v4635_v4  ;;  %v4864_v62 = vrot.slane %v4863_v39, 4  ;;  %v4110_v48 = vadd.f32 %v4109_v54, %v8227_v58 }
 0x3f6   : > { %v4871_v35 = vrot.slane %v4870_v17, 4  ;;  %v4133_v42 = vadd.f32 %v4132_v7, %v8227_v58  ;;  %v4777_v32 = vrot.slane %v4776_v1, 1  ;;  %v4782_v43 = vrot.slane %v4781_v59, 2 }
 0x3f7   : > { %v4877_v55 = vadd.f32 %v4728_v44, %v4687_v12  ;;  %v4884_v38 = vadd.f32 %v4729_v3, %v4688_v28  ;;  %v4865_v18 = vadd.f32 %v4864_v62, %v4863_v39  ;;  %v4595_v10 = vmax.f32 %v4110_v48, 0.0  ;;  %v4155_v20 = vpop.f32.mrf.mxu2  ;;  %v4178_v16 = vpop.f32.mrf.mxu3 }
 0x3f8   : > { %v4872_v34 = vadd.f32 %v4871_v35, %v4870_v17  ;;  %v4596_v41 = vmax.f32 %v4133_v42, 0.0  ;;  %v4156_v9 = vadd.f32 %v4155_v20, %v8227_v58  ;;  %v4179_v53 = vadd.f32 %v4178_v16, %v8227_v58 }
 0x3f9   : > { %v4878_v23 = vrot.slane %v4877_v55, 4  ;;  %v4885_v26 = vrot.slane %v4884_v38, 4  ;;  %v4866_v50 = vrot.slane %v4865_v18, 2  ;;  %v4689_v30 = vmul.f32 %v8237_v33, %v4595_v10 }
 0x3fa   : > { %v4873_v37 = vrot.slane %v4872_v34, 2  ;;  %v4787_v12 = vrot.slane %v8471_v2, 4  ;;  %v4597_v46 = vmax.f32 %v4156_v9, 0.0  ;;  %v4598_v51 = vmax.f32 %v4179_v53, 0.0 }
 0x3fb   : > { %v4879_v61 = vadd.f32 %v4878_v23, %v4877_v55  ;;  %v4886_v29 = vadd.f32 %v4885_v26, %v4884_v38  ;;  %v4867_v15 = vadd.f32 %v4866_v50, %v4865_v18  ;;  %v4690_v21 = vmul.f32 %v8237_v33, %v4596_v41 }
 0x3fc   : > { %v4874_v14 = vadd.f32 %v4873_v37, %v4872_v34  ;;  %v4783_v25 = vadd.f32 %v4782_v43, %v4781_v59  ;;  %v4691_v57 = vmul.f32 %v8237_v33, %v4597_v46  ;;  %v4112_v24 = vpop.f32.mrf.mxu0  ;;  %v4135_v11 = vpop.f32.mrf.mxu1  ;;  %v8505_v5 = vadd.f32 %v4777_v32, %v4776_v1 }
 0x3fd   : > { %v4880_v8 = vrot.slane %v4879_v61, 2  ;;  %v4887_v47 = vrot.slane %v4886_v29, 2  ;;  %v4868_v40 = vrot.slane %v4867_v15, 1  ;;  %v4113_v6 = vadd.f32 %v4112_v24, %v8255_v45 }
 0x3fe   : > { %v4875_v19 = vrot.slane %v4874_v14, 1  ;;  %v4136_v0 = vadd.f32 %v4135_v11, %v8255_v45  ;;  %v4692_v56 = vmul.f32 %v8237_v33, %v4598_v51  ;;  %v4784_v4 = vrot.slane %v4783_v25, 1 }
 0x3ff   : > { %v4881_v52 = vadd.f32 %v4880_v8, %v4879_v61  ;;  %v4888_v28 = vadd.f32 %v4887_v47, %v4886_v29  ;;  %v4869_v39 = vadd.f32 %v4868_v40, %v4867_v15  ;;  %v4636_v59 = vmax.f32 %v4113_v6, 0.0  ;;  %v4158_v3 = vpop.f32.mrf.mxu2  ;;  %v4181_v54 = vpop.f32.mrf.mxu3 }
 0x400   : > { %v4876_v17 = vadd.f32 %v4875_v19, %v4874_v14  ;;  %v4637_v44 = vmax.f32 %v4136_v0, 0.0  ;;  %v4159_v62 = vadd.f32 %v4158_v3, %v8255_v45  ;;  %v4182_v35 = vadd.f32 %v4181_v54, %v8255_v45 }
 0x401   : > { %v4882_v7 = vrot.slane %v4881_v52, 1  ;;  %v4889_v1 = vrot.slane %v4888_v28, 1  ;;  %v4730_v42 = vmul.f32 %v8319_v27, %v4636_v59  ;;  %v4788_v38 = vadd.f32 %v4787_v12, %v8471_v2 }
 0x402   : > { %v5062_v48 = vadd.f32 %v8321_v63, %v4876_v17  ;;  %v4731_v55 = vmul.f32 %v8319_v27, %v4637_v44  ;;  %v4638_v18 = vmax.f32 %v4159_v62, 0.0  ;;  %v4639_v34 = vmax.f32 %v4182_v35, 0.0 }
 0x403   : > { %v4883_v32 = vadd.f32 %v4882_v7, %v4881_v52  ;;  %v4890_v43 = vadd.f32 %v4889_v1, %v4888_v28  ;;  %v5061_v10 = vadd.f32 %v8321_v63, %v4869_v39  ;;  %v4891_v20 = vadd.f32 %v4730_v42, %v4689_v30 }
 0x404   : > { %v5140_v41 = vrot.slane %v5062_v48, 7  ;;  %v4898_v16 = vadd.f32 %v4731_v55, %v4690_v21  ;;  %v4732_v9 = vmul.f32 %v8319_v27, %v4638_v18  ;;  %v4733_v53 = vmul.f32 %v8319_v27, %v4639_v34 }
 0x405   : > { %v5063_v23 = vadd.f32 %v8321_v63, %v4883_v32  ;;  %v5064_v26 = vadd.f32 %v8321_v63, %v4890_v43  ;;  %v4892_v50 = vrot.slane %v4891_v20, 4  ;;  %v4785_v2 = vadd.f32 %v4784_v4, %v4783_v25 }
 0x406   : > { %v4899_v37 = vrot.slane %v4898_v16, 4  ;;  %v4789_v12 = vrot.slane %v4788_v38, 2  ;;  %v4905_v46 = vadd.f32 %v4732_v9, %v4691_v57  ;;  %v4912_v51 = vadd.f32 %v4733_v53, %v4692_v56 }
 0x407   : > { %v5141_v61 = vrot.slane %v5063_v23, 6  ;;  %v5142_v29 = vrot.slane %v5064_v26, 5  ;;  %v4893_v15 = vadd.f32 %v4892_v50, %v4891_v20  ;;  %v4794_v21 = vrot.slane %v8495_v22, 4 }
 0x408   : > { %v4900_v14 = vadd.f32 %v4899_v37, %v4898_v16  ;;  %v4790_v30 = vadd.f32 %v4789_v12, %v4788_v38  ;;  %v5179_v8 = vsel %vm5161_vm14, %v5061_v10, %v5140_v41  ;;  %v4906_v47 = vrot.slane %v4905_v46, 4 }
 0x409   : > { %v4913_v24 = vrot.slane %v4912_v51, 4  ;;  %v4800_v11 = vadd.f32 %v8455_v36, %v8435_v60  ;;  %v5180_v40 = vsel %vm8861_vm7, %v5141_v61, %v5142_v29  ;;  %v4894_v25 = vrot.slane %v4893_v15, 2  ;;  %vm8872_vm7 = vmmov %vm8865_vm2 }
 0x40a   : > { %v4901_v19 = vrot.slane %v4900_v14, 2  ;;  %v4791_v6 = vrot.slane %v4790_v30, 1  ;;  %v4907_v0 = vadd.f32 %v4906_v47, %v4905_v46  ;;  %v4795_v52 = vadd.f32 %v4794_v21, %v8495_v22 }
 0x40b   : > { %v4914_v57 = vadd.f32 %v4913_v24, %v4912_v51  ;;  %v4801_v28 = vrot.slane %v4800_v11, 4  ;;  %v4895_v56 = vadd.f32 %v4894_v25, %v4893_v15  ;;  %v5047_v17 = vadd.f32 %v8321_v63, %v8491_v49 }
 0x40c   : > { %v4902_v4 = vadd.f32 %v4901_v19, %v4900_v14  ;;  %v4792_v39 = vadd.f32 %v4791_v6, %v4790_v30  ;;  %v4908_v59 = vrot.slane %v4907_v0, 2  ;;  %v4796_v3 = vrot.slane %v4795_v52, 2 }
 0x40d   : > { %v4915_v44 = vrot.slane %v4914_v57, 2  ;;  %v4802_v60 = vadd.f32 %v4801_v28, %v4800_v11  ;;  %v4896_v36 = vrot.slane %v4895_v56, 1  ;;  %v5048_v7 = vadd.f32 %v8321_v63, %v8505_v5 }
 0x40e   : > { %v4903_v54 = vrot.slane %v4902_v4, 1  ;;  %v5049_v1 = vadd.f32 %v8321_v63, %v4785_v2  ;;  %v4909_v62 = vadd.f32 %v4908_v59, %v4907_v0  ;;  %v4797_v35 = vadd.f32 %v4796_v3, %v4795_v52 }
 0x40f   : > { %v4916_v22 = vadd.f32 %v4915_v44, %v4914_v57  ;;  %v4803_v48 = vrot.slane %v4802_v60, 2  ;;  %v4897_v42 = vadd.f32 %v4896_v36, %v4895_v56  ;;  %v5050_v38 = vadd.f32 %v8321_v63, %v4792_v39 }
 0x410   : > { %v4904_v55 = vadd.f32 %v4903_v54, %v4902_v4  ;;  %v5127_v49 = vrot.slane %v5047_v17, 6  ;;  %v4910_v32 = vrot.slane %v4909_v62, 1  ;;  %v4798_v18 = vrot.slane %v4797_v35, 1 }
 0x411   : > { %v4917_v43 = vrot.slane %v4916_v22, 1  ;;  %v4804_v34 = vadd.f32 %v4803_v48, %v4802_v60  ;;  %v5065_v10 = vadd.f32 %v8321_v63, %v4897_v42  ;;  %v5128_v5 = vrot.slane %v5048_v7, 5 }
 0x412   : > { %v5066_v41 = vadd.f32 %v8321_v63, %v4904_v55  ;;  %v5129_v20 = vrot.slane %v5049_v1, 4  ;;  %v4911_v16 = vadd.f32 %v4910_v32, %v4909_v62  ;;  %v4799_v26 = vadd.f32 %v4798_v18, %v4797_v35 }
 0x413   : > { %v4918_v23 = vadd.f32 %v4917_v43, %v4916_v22  ;;  %v4805_v9 = vrot.slane %v4804_v34, 1  ;;  %v5143_v53 = vrot.slane %v5065_v10, 4  ;;  %v5130_v37 = vrot.slane %v5050_v38, 3 }
 0x414   : > { %v5144_v50 = vrot.slane %v5066_v41, 3  ;;  %v5163_v2 = vsel %vm8862_vm4, %v5127_v49, %v5128_v5  ;;  %v5067_v12 = vadd.f32 %v8321_v63, %v4911_v16  ;;  %v5051_v46 = vadd.f32 %v8321_v63, %v4799_v26 }
 0x415   : > { %v5068_v61 = vadd.f32 %v8321_v63, %v4918_v23  ;;  %v4806_v29 = vadd.f32 %v4805_v9, %v4804_v34  ;;  %v5165_v15 = vsel %vm5164_vm11, %v8391_v31, %v5163_v2  ;;  %v5166_v14 = vsel %vm8864_vm1, %v5129_v20, %v5130_v37 }
 0x416   : > { %v5182_v51 = vsel %vm8863_vm12, %v5143_v53, %v5144_v50  ;;  %v5145_v30 = vrot.slane %v5067_v12, 2  ;;  %v5131_v24 = vrot.slane %v5051_v46, 2  ;;  %v5181_v11 = vsel %vm5164_vm11, %v5179_v8, %v5180_v40 }
 0x417   : > { %v5146_v21 = vrot.slane %v5068_v61, 1  ;;  %v5052_v47 = vadd.f32 %v8321_v63, %v4806_v29 }
 0x418   : > { %v4247_v52 = vpop.f32.mrf.mxu2  ;;  %v4270_v28 = vpop.f32.mrf.mxu3 }
 0x419   : > { %v5183_v25 = vsel %vm8865_vm2, %v5145_v30, %v5146_v21  ;;  %v5132_v19 = vrot.slane %v5052_v47, 1  ;;  %v4224_v0 = vpop.f32.mrf.mxu1  ;;  %v4201_v57 = vpop.f32.mrf.mxu0  ;;  %v4248_v40 = vadd.f32 %v4247_v52, %v8227_v58  ;;  %v4271_v17 = vadd.f32 %v4270_v28, %v8227_v58 }
 0x41a   : > { %v5184_v6 = vsel %vm5168_vm10, %v5182_v51, %v5183_v25  ;;  %v4225_v39 = vadd.f32 %v4224_v0, %v8227_v58  ;;  %v4202_v59 = vadd.f32 %v4201_v57, %v8227_v58 }
 0x41b   : > { %v5185_v31 = vsel %vm5170_vm8, %v5181_v11, %v5184_v6  ;;  %v5167_v56 = vsel %vm8866_vm5, %v5131_v24, %v5132_v19  ;;  %v4601_v36 = vmax.f32 %v4248_v40, 0.0  ;;  %v4602_v54 = vmax.f32 %v4271_v17, 0.0 }
 0x41c   : > { %5207 = vst [vmem:[%s8486_s29 + $0x10] sm:$0xff] %v5185_v31  ;;  %v5169_v4 = vsel %vm5168_vm10, %v5166_v14, %v5167_v56  ;;  %v4600_v44 = vmax.f32 %v4225_v39, 0.0  ;;  %v4599_v62 = vmax.f32 %v4202_v59, 0.0 }
 0x41d   : > { %v5171_v8 = vsel %vm5170_vm8, %v5165_v15, %v5169_v4  ;;  %v4695_v32 = vmul.f32 %v8237_v33, %v4601_v36  ;;  %v4696_v43 = vmul.f32 %v8237_v33, %v4602_v54 }
 0x41e   : > { %5205 = vst [vmem:[%s8486_s29] sm:$0xff] %v5171_v8  ;;  %v4694_v22 = vmul.f32 %v8237_v33, %v4600_v44  ;;  %v4693_v34 = vmul.f32 %v8237_v33, %v4599_v62 }
 0x421   : > { %v4227_v3 = vpop.f32.mrf.mxu1  ;;  %v4204_v60 = vpop.f32.mrf.mxu0 }
 0x422   : > { %v4228_v7 = vadd.f32 %v4227_v3, %v8255_v45  ;;  %v4205_v1 = vadd.f32 %v4204_v60, %v8255_v45 }
 0x424   : > { %v4641_v35 = vmax.f32 %v4228_v7, 0.0  ;;  %v4640_v48 = vmax.f32 %v4205_v1, 0.0  ;;  %v4250_v42 = vpop.f32.mrf.mxu2  ;;  %v4273_v55 = vpop.f32.mrf.mxu3 }
 0x425   : > { %v4251_v38 = vadd.f32 %v4250_v42, %v8255_v45  ;;  %v4274_v49 = vadd.f32 %v4273_v55, %v8255_v45 }
 0x426   : > { %v4735_v18 = vmul.f32 %v8319_v27, %v4641_v35  ;;  %v4734_v10 = vmul.f32 %v8319_v27, %v4640_v48 }
 0x427   : > { %v4642_v41 = vmax.f32 %v4251_v38, 0.0  ;;  %v4643_v5 = vmax.f32 %v4274_v49, 0.0 }
 0x428   : > { %v4926_v20 = vadd.f32 %v4735_v18, %v4694_v22  ;;  %v4919_v50 = vadd.f32 %v4734_v10, %v4693_v34 }
 0x429   : > { %v4736_v16 = vmul.f32 %v8319_v27, %v4642_v41  ;;  %v4737_v23 = vmul.f32 %v8319_v27, %v4643_v5  ;;  %v4293_v26 = vpop.f32.mrf.mxu0  ;;  %v4316_v9 = vpop.f32.mrf.mxu1 }
 0x42a   : > { %v4927_v53 = vrot.slane %v4926_v20, 4  ;;  %v4294_v12 = vadd.f32 %v4293_v26, %v8227_v58  ;;  %v4317_v61 = vadd.f32 %v4316_v9, %v8227_v58  ;;  %v4920_v47 = vrot.slane %v4919_v50, 4 }
 0x42b   : > { %v4933_v37 = vadd.f32 %v4736_v16, %v4695_v32  ;;  %v4940_v2 = vadd.f32 %v4737_v23, %v4696_v43 }
 0x42c   : > { %v4339_v29 = vpop.f32.mrf.mxu2  ;;  %v4362_v46 = vpop.f32.mrf.mxu3  ;;  %v4928_v21 = vadd.f32 %v4927_v53, %v4926_v20  ;;  %v4603_v25 = vmax.f32 %v4294_v12, 0.0  ;;  %v4604_v19 = vmax.f32 %v4317_v61, 0.0  ;;  %v4921_v4 = vadd.f32 %v4920_v47, %v4919_v50 }
 0x42d   : > { %v4934_v51 = vrot.slane %v4933_v37, 4  ;;  %v4941_v15 = vrot.slane %v4940_v2, 4  ;;  %v4340_v14 = vadd.f32 %v4339_v29, %v8227_v58  ;;  %v4363_v30 = vadd.f32 %v4362_v46, %v8227_v58 }
 0x42e   : > { %v4929_v56 = vrot.slane %v4928_v21, 2  ;;  %v4697_v40 = vmul.f32 %v8237_v33, %v4603_v25  ;;  %v4698_v17 = vmul.f32 %v8237_v33, %v4604_v19  ;;  %v4922_v49 = vrot.slane %v4921_v4, 2 }
 0x42f   : > { %v4935_v24 = vadd.f32 %v4934_v51, %v4933_v37  ;;  %v4942_v11 = vadd.f32 %v4941_v15, %v4940_v2  ;;  %v4605_v57 = vmax.f32 %v4340_v14, 0.0  ;;  %v4606_v31 = vmax.f32 %v4363_v30, 0.0 }
 0x430   : > { %v4930_v38 = vadd.f32 %v4929_v56, %v4928_v21  ;;  %v4923_v9 = vadd.f32 %v4922_v49, %v4921_v4 }
 0x431   : > { %v4296_v6 = vpop.f32.mrf.mxu0  ;;  %v4319_v0 = vpop.f32.mrf.mxu1  ;;  %v4936_v39 = vrot.slane %v4935_v24, 2  ;;  %v4943_v8 = vrot.slane %v4942_v11, 2  ;;  %v4699_v7 = vmul.f32 %v8237_v33, %v4605_v57  ;;  %v4700_v1 = vmul.f32 %v8237_v33, %v4606_v31 }
 0x432   : > { %v4297_v52 = vadd.f32 %v4296_v6, %v8255_v45  ;;  %v4320_v28 = vadd.f32 %v4319_v0, %v8255_v45  ;;  %v4931_v26 = vrot.slane %v4930_v38, 1  ;;  %v4924_v30 = vrot.slane %v4923_v9, 1 }
 0x433   : > { %v4937_v35 = vadd.f32 %v4936_v39, %v4935_v24  ;;  %v4944_v48 = vadd.f32 %v4943_v8, %v4942_v11 }
 0x434   : > { %v4644_v59 = vmax.f32 %v4297_v52, 0.0  ;;  %v4645_v44 = vmax.f32 %v4320_v28, 0.0  ;;  %v4342_v3 = vpop.f32.mrf.mxu2  ;;  %v4365_v60 = vpop.f32.mrf.mxu3  ;;  %v4932_v14 = vadd.f32 %v4931_v26, %v4930_v38  ;;  %v4925_v56 = vadd.f32 %v4924_v30, %v4923_v9 }
 0x435   : > { %v4343_v36 = vadd.f32 %v4342_v3, %v8255_v45  ;;  %v4366_v54 = vadd.f32 %v4365_v60, %v8255_v45  ;;  %v4938_v5 = vrot.slane %v4937_v35, 1  ;;  %v4945_v20 = vrot.slane %v4944_v48, 1 }
 0x436   : > { %v4738_v62 = vmul.f32 %v8319_v27, %v4644_v59  ;;  %v4739_v22 = vmul.f32 %v8319_v27, %v4645_v44  ;;  %v5070_v28 = vadd.f32 %v8321_v63, %v4932_v14 }
 0x437   : > { %v4646_v42 = vmax.f32 %v4343_v36, 0.0  ;;  %v4647_v55 = vmax.f32 %v4366_v54, 0.0  ;;  %v4939_v29 = vadd.f32 %v4938_v5, %v4937_v35  ;;  %v4946_v46 = vadd.f32 %v4945_v20, %v4944_v48 }
 0x438   : > { %v4947_v32 = vadd.f32 %v4738_v62, %v4697_v40  ;;  %v4954_v43 = vadd.f32 %v4739_v22, %v4698_v17 }
 0x439   : > { %v4740_v18 = vmul.f32 %v8319_v27, %v4646_v42  ;;  %v4741_v34 = vmul.f32 %v8319_v27, %v4647_v55  ;;  %v5071_v6 = vadd.f32 %v8321_v63, %v4939_v29  ;;  %v5072_v0 = vadd.f32 %v8321_v63, %v4946_v46 }
 0x43a   : > { %v4948_v10 = vrot.slane %v4947_v32, 4  ;;  %v4955_v41 = vrot.slane %v4954_v43, 4 }
 0x43b   : > { %v4961_v16 = vadd.f32 %v4740_v18, %v4699_v7  ;;  %v4968_v23 = vadd.f32 %v4741_v34, %v4700_v1  ;;  %v5148_v3 = vrot.slane %v5071_v6, 6  ;;  %v5149_v60 = vrot.slane %v5072_v0, 5 }
 0x43c   : > { %v4949_v53 = vadd.f32 %v4948_v10, %v4947_v32  ;;  %v4956_v50 = vadd.f32 %v4955_v41, %v4954_v43  ;;  %v5147_v7 = vrot.slane %v5070_v28, 7  ;;  %v5069_v1 = vadd.f32 %v8321_v63, %v4925_v56 }
 0x43d   : > { %v4962_v37 = vrot.slane %v4961_v16, 4  ;;  %v4969_v2 = vrot.slane %v4968_v23, 4  ;;  %v5187_v55 = vsel %vm8867_vm9, %v5148_v3, %v5149_v60 }
 0x43e   : > { %v4950_v12 = vrot.slane %v4949_v53, 2  ;;  %v4957_v61 = vrot.slane %v4956_v50, 2  ;;  %v5186_v43 = vsel %vm5161_vm14, %v5069_v1, %v5147_v7 }
 0x43f   : > { %v4963_v51 = vadd.f32 %v4962_v37, %v4961_v16  ;;  %v4970_v15 = vadd.f32 %v4969_v2, %v4968_v23  ;;  %v5188_v41 = vsel %vm5164_vm11, %v5186_v43, %v5187_v55 }
 0x440   : > { %v4951_v21 = vadd.f32 %v4950_v12, %v4949_v53  ;;  %v4958_v47 = vadd.f32 %v4957_v61, %v4956_v50 }
 0x441   : > { %v4964_v24 = vrot.slane %v4963_v51, 2  ;;  %v4971_v11 = vrot.slane %v4970_v15, 2 }
 0x442   : > { %v4952_v25 = vrot.slane %v4951_v21, 1  ;;  %v4959_v19 = vrot.slane %v4958_v47, 1 }
 0x443   : > { %v4965_v57 = vadd.f32 %v4964_v24, %v4963_v51  ;;  %v4972_v31 = vadd.f32 %v4971_v11, %v4970_v15  ;;  %v4408_v52 = vpop.f32.mrf.mxu1  ;;  %v4385_v8 = vpop.f32.mrf.mxu0 }
 0x444   : > { %v4953_v4 = vadd.f32 %v4952_v25, %v4951_v21  ;;  %v4960_v39 = vadd.f32 %v4959_v19, %v4958_v47  ;;  %v4409_v20 = vadd.f32 %v4408_v52, %v8227_v58  ;;  %v4386_v61 = vadd.f32 %v4385_v8, %v8227_v58 }
 0x445   : > { %v4966_v40 = vrot.slane %v4965_v57, 1  ;;  %v4973_v17 = vrot.slane %v4972_v31, 1 }
 0x446   : > { %v5073_v59 = vadd.f32 %v8321_v63, %v4953_v4  ;;  %v5074_v44 = vadd.f32 %v8321_v63, %v4960_v39  ;;  %v4608_v53 = vmax.f32 %v4409_v20, 0.0  ;;  %v4607_v0 = vmax.f32 %v4386_v61, 0.0 }
 0x447   : > { %v4967_v36 = vadd.f32 %v4966_v40, %v4965_v57  ;;  %v4974_v54 = vadd.f32 %v4973_v17, %v4972_v31 }
 0x448   : > { %v5150_v62 = vrot.slane %v5073_v59, 4  ;;  %v5151_v22 = vrot.slane %v5074_v44, 3  ;;  %v4702_v14 = vmul.f32 %v8237_v33, %v4608_v53  ;;  %v4701_v44 = vmul.f32 %v8237_v33, %v4607_v0 }
 0x449   : > { %v5075_v35 = vadd.f32 %v8321_v63, %v4967_v36  ;;  %v5076_v48 = vadd.f32 %v8321_v63, %v4974_v54 }
 0x44a   : > { %v4431_v42 = vpop.f32.mrf.mxu2  ;;  %v4454_v32 = vpop.f32.mrf.mxu3  ;;  %v5189_v18 = vsel %vm8868_vm3, %v5150_v62, %v5151_v22 }
 0x44b   : > { %v5152_v38 = vrot.slane %v5075_v35, 2  ;;  %v5153_v49 = vrot.slane %v5076_v48, 1  ;;  %v4432_v9 = vadd.f32 %v4431_v42, %v8227_v58  ;;  %v4455_v50 = vadd.f32 %v4454_v32, %v8227_v58 }
 0x44d   : > { %v5190_v34 = vsel %vm8869_vm6, %v5152_v38, %v5153_v49  ;;  %v4411_v10 = vpop.f32.mrf.mxu1  ;;  %v4609_v29 = vmax.f32 %v4432_v9, 0.0  ;;  %v4610_v30 = vmax.f32 %v4455_v50, 0.0 }
 0x44e   : > { %v5191_v5 = vsel %vm5168_vm10, %v5189_v18, %v5190_v34  ;;  %v4388_v16 = vpop.f32.mrf.mxu0  ;;  %v4412_v23 = vadd.f32 %v4411_v10, %v8255_v45 }
 0x44f   : > { %v5192_v26 = vsel %vm5170_vm8, %v5188_v41, %v5191_v5  ;;  %v4389_v2 = vadd.f32 %v4388_v16, %v8255_v45  ;;  %v4703_v57 = vmul.f32 %v8237_v33, %v4609_v29  ;;  %v4704_v52 = vmul.f32 %v8237_v33, %v4610_v30 }
 0x450   : > { %5208 = vst [vmem:[%s8486_s29 + $0x18] sm:$0xff] %v5192_v26  ;;  %v4649_v37 = vmax.f32 %v4412_v23, 0.0 }
 0x451   : > { %v4648_v11 = vmax.f32 %v4389_v2, 0.0 }
 0x452   : > { %v4743_v21 = vmul.f32 %v8319_v27, %v4649_v37 }
 0x453   : > { %v4742_v4 = vmul.f32 %v8319_v27, %v4648_v11 }
 0x454   : > { %v4434_v12 = vpop.f32.mrf.mxu2  ;;  %v4982_v28 = vadd.f32 %v4743_v21, %v4702_v14 }
 0x455   : > { %v4435_v46 = vadd.f32 %v4434_v12, %v8255_v45  ;;  %v4457_v51 = vpop.f32.mrf.mxu3  ;;  %v4500_v15 = vpop.f32.mrf.mxu1  ;;  %v4975_v22 = vadd.f32 %v4742_v4, %v4701_v44 }
 0x456   : > { %v4458_v47 = vadd.f32 %v4457_v51, %v8255_v45  ;;  %v4477_v24 = vpop.f32.mrf.mxu0  ;;  %v4501_v6 = vadd.f32 %v4500_v15, %v8227_v58  ;;  %v4983_v54 = vrot.slane %v4982_v28, 4 }
 0x457   : > { %v4650_v25 = vmax.f32 %v4435_v46, 0.0  ;;  %v4478_v8 = vadd.f32 %v4477_v24, %v8227_v58  ;;  %v4976_v41 = vrot.slane %v4975_v22, 4 }
 0x458   : > { %v4651_v19 = vmax.f32 %v4458_v47, 0.0  ;;  %v4612_v17 = vmax.f32 %v4501_v6, 0.0  ;;  %v4984_v18 = vadd.f32 %v4983_v54, %v4982_v28 }
 0x459   : > { %v4744_v31 = vmul.f32 %v8319_v27, %v4650_v25  ;;  %v4611_v35 = vmax.f32 %v4478_v8, 0.0  ;;  %v4977_v15 = vadd.f32 %v4976_v41, %v4975_v22 }
 0x45a   : > { %v4745_v56 = vmul.f32 %v8319_v27, %v4651_v19  ;;  %v4706_v38 = vmul.f32 %v8237_v33, %v4612_v17  ;;  %v4985_v12 = vrot.slane %v4984_v18, 2 }
 0x45b   : > { %v4989_v39 = vadd.f32 %v4744_v31, %v4703_v57  ;;  %v4705_v5 = vmul.f32 %v8237_v33, %v4611_v35  ;;  %v4978_v28 = vrot.slane %v4977_v15, 2 }
 0x45c   : > { %v4996_v40 = vadd.f32 %v4745_v56, %v4704_v52  ;;  %v4523_v59 = vpop.f32.mrf.mxu2  ;;  %v4986_v0 = vadd.f32 %v4985_v12, %v4984_v18 }
 0x45d   : > { %v4990_v3 = vrot.slane %v4989_v39, 4  ;;  %v4546_v60 = vpop.f32.mrf.mxu3  ;;  %v4503_v36 = vpop.f32.mrf.mxu1  ;;  %v4524_v32 = vadd.f32 %v4523_v59, %v8227_v58 }
 0x45e   : > { %v4997_v7 = vrot.slane %v4996_v40, 4  ;;  %v4480_v1 = vpop.f32.mrf.mxu0  ;;  %v4504_v62 = vadd.f32 %v4503_v36, %v8255_v45  ;;  %v4547_v34 = vadd.f32 %v4546_v60, %v8227_v58  ;;  %v4987_v60 = vrot.slane %v4986_v0, 1 }
 0x45f   : > { %v4481_v48 = vadd.f32 %v4480_v1, %v8255_v45  ;;  %v4991_v42 = vadd.f32 %v4990_v3, %v4989_v39  ;;  %v4613_v53 = vmax.f32 %v4524_v32, 0.0 }
 0x460   : > { %v4998_v55 = vadd.f32 %v4997_v7, %v4996_v40  ;;  %v4653_v49 = vmax.f32 %v4504_v62, 0.0  ;;  %v4614_v61 = vmax.f32 %v4547_v34, 0.0  ;;  %v4988_v32 = vadd.f32 %v4987_v60, %v4986_v0 }
 0x461   : > { %v4652_v43 = vmax.f32 %v4481_v48, 0.0  ;;  %v4992_v16 = vrot.slane %v4991_v42, 2  ;;  %v4707_v25 = vmul.f32 %v8237_v33, %v4613_v53  ;;  %v4979_v48 = vadd.f32 %v4978_v28, %v4977_v15 }
 0x462   : > { %v4747_v10 = vmul.f32 %v8319_v27, %v4653_v49  ;;  %v4999_v23 = vrot.slane %v4998_v55, 2  ;;  %v4708_v57 = vmul.f32 %v8237_v33, %v4614_v61  ;;  %v5078_v53 = vadd.f32 %v8321_v63, %v4988_v32 }
 0x463   : > { %v4746_v20 = vmul.f32 %v8319_v27, %v4652_v43  ;;  %v4993_v21 = vadd.f32 %v4992_v16, %v4991_v42 }
 0x464   : > { %v5010_v26 = vadd.f32 %v4747_v10, %v4706_v38  ;;  %v4526_v9 = vpop.f32.mrf.mxu2  ;;  %v5000_v47 = vadd.f32 %v4999_v23, %v4998_v55 }
 0x465   : > { %v5003_v50 = vadd.f32 %v4746_v20, %v4705_v5  ;;  %v4527_v37 = vadd.f32 %v4526_v9, %v8255_v45  ;;  %v4549_v2 = vpop.f32.mrf.mxu3  ;;  %v4994_v8 = vrot.slane %v4993_v21, 1  ;;  %v4980_v20 = vrot.slane %v4979_v48, 1 }
 0x466   : > { %v5011_v29 = vrot.slane %v5010_v26, 4  ;;  %v4550_v46 = vadd.f32 %v4549_v2, %v8255_v45  ;;  %v4569_v51 = vpop.f32.mrf.mxu0  ;;  %v5001_v40 = vrot.slane %v5000_v47, 1 }
 0x467   : > { %v5004_v14 = vrot.slane %v5003_v50, 4  ;;  %v4654_v30 = vmax.f32 %v4527_v37, 0.0  ;;  %v4570_v39 = vadd.f32 %v4569_v51, %v8227_v58  ;;  %v4995_v42 = vadd.f32 %v4994_v8, %v4993_v21 }
 0x468   : > { %v5012_v24 = vadd.f32 %v5011_v29, %v5010_v26  ;;  %v4655_v11 = vmax.f32 %v4550_v46, 0.0  ;;  %v5002_v55 = vadd.f32 %v5001_v40, %v5000_v47  ;;  %v4981_v61 = vadd.f32 %v4980_v20, %v4979_v48 }
 0x469   : > { %v5005_v19 = vadd.f32 %v5004_v14, %v5003_v50  ;;  %v4748_v6 = vmul.f32 %v8319_v27, %v4654_v30  ;;  %v4615_v22 = vmax.f32 %v4570_v39, 0.0  ;;  %v5079_v16 = vadd.f32 %v8321_v63, %v4995_v42 }
 0x46a   : > { %v5013_v31 = vrot.slane %v5012_v24, 2  ;;  %v4749_v52 = vmul.f32 %v8319_v27, %v4655_v11  ;;  %v5154_v14 = vrot.slane %v5078_v53, 7 }
 0x46b   : > { %v5006_v56 = vrot.slane %v5005_v19, 2  ;;  %v5017_v4 = vadd.f32 %v4748_v6, %v4707_v25  ;;  %v4709_v41 = vmul.f32 %v8237_v33, %v4615_v22  ;;  %v5077_v25 = vadd.f32 %v8321_v63, %v4981_v61 }
 0x46c   : > { %v5014_v17 = vadd.f32 %v5013_v31, %v5012_v24  ;;  %v5024_v59 = vadd.f32 %v4749_v52, %v4708_v57 }
 0x46d   : > { %v5007_v44 = vadd.f32 %v5006_v56, %v5005_v19  ;;  %v5018_v3 = vrot.slane %v5017_v4, 4  ;;  %v5193_v57 = vsel %vm5161_vm14, %v5077_v25, %v5154_v14 }
 0x46e   : > { %v5015_v36 = vrot.slane %v5014_v17, 1  ;;  %v5025_v54 = vrot.slane %v5024_v59, 4  ;;  %v4572_v7 = vpop.f32.mrf.mxu0 }
 0x46f   : > { %v5008_v1 = vrot.slane %v5007_v44, 1  ;;  %v5019_v62 = vadd.f32 %v5018_v3, %v5017_v4  ;;  %v4573_v35 = vadd.f32 %v4572_v7, %v8255_v45  ;;  %v5080_v45 = vadd.f32 %v8321_v63, %v5002_v55 }
 0x470   : > { %v5026_v38 = vadd.f32 %v5025_v54, %v5024_v59  ;;  %v5016_v18 = vadd.f32 %v5015_v36, %v5014_v17 }
 0x471   : > { %v5020_v58 = vrot.slane %v5019_v62, 2  ;;  %v4656_v49 = vmax.f32 %v4573_v35, 0.0  ;;  %v5009_v43 = vadd.f32 %v5008_v1, %v5007_v44  ;;  %v5156_v29 = vrot.slane %v5080_v45, 5 }
 0x472   : > { %v5027_v34 = vrot.slane %v5026_v38, 2  ;;  %v5082_v37 = vadd.f32 %v8321_v63, %v5016_v18 }
 0x473   : > { %v5021_v10 = vadd.f32 %v5020_v58, %v5019_v62  ;;  %v4750_v5 = vmul.f32 %v8319_v27, %v4656_v49  ;;  %v5081_v50 = vadd.f32 %v8321_v63, %v5009_v43  ;;  %v5155_v27 = vrot.slane %v5079_v16, 6 }
 0x474   : > { %v5028_v23 = vadd.f32 %v5027_v34, %v5026_v38  ;;  %v5158_v21 = vrot.slane %v5082_v37, 3 }
 0x475   : > { %v5022_v26 = vrot.slane %v5021_v10, 1  ;;  %v5031_v9 = vadd.f32 %v4750_v5, %v4709_v41  ;;  %v5157_v30 = vrot.slane %v5081_v50, 4  ;;  %v5194_v19 = vsel %vm8870_vm13, %v5155_v27, %v5156_v29 }
 0x476   : > { %v5029_v2 = vrot.slane %v5028_v23, 1  ;;  %v5195_v28 = vsel %vm5164_vm11, %v5193_v57, %v5194_v19 }
 0x477   : > { %v5023_v12 = vadd.f32 %v5022_v26, %v5021_v10  ;;  %v5032_v33 = vrot.slane %v5031_v9, 4  ;;  %v5196_v31 = vsel %vm8871_vm0, %v5157_v30, %v5158_v21 }
 0x478   : > { %v5030_v46 = vadd.f32 %v5029_v2, %v5028_v23 }
 0x479   : > { %v5083_v51 = vadd.f32 %v8321_v63, %v5023_v12  ;;  %v5033_v15 = vadd.f32 %v5032_v33, %v5031_v9 }
 0x47a   : > { %v5084_v47 = vadd.f32 %v8321_v63, %v5030_v46 }
 0x47b   : > { %v5159_v24 = vrot.slane %v5083_v51, 2  ;;  %v5034_v11 = vrot.slane %v5033_v15, 2 }
 0x47c   : > { %v5160_v6 = vrot.slane %v5084_v47, 1 }
 0x47d   : > { %v5035_v0 = vadd.f32 %v5034_v11, %v5033_v15 }
 0x47e   : > { %v5197_v52 = vsel %vm8872_vm7, %v5159_v24, %v5160_v6 }
 0x47f   : > { %v5198_v56 = vsel %vm5168_vm10, %v5196_v31, %v5197_v52  ;;  %v5036_v4 = vrot.slane %v5035_v0, 1 }
 0x480   : > { %v5199_v39 = vsel %vm5170_vm8, %v5195_v28, %v5198_v56 }
 0x481   : > { %v5037_v8 = vadd.f32 %v5036_v4, %v5035_v0  ;;  %5209 = vst [vmem:[%s8486_s29 + $0x20] sm:$0xff] %v5199_v39 }
 0x483   : > { %v5085_v40 = vadd.f32 %v8321_v63, %v5037_v8 }
 0x485   : > { %5210 = vst.msk [vmem:[%s8486_s29 + $0x28] sm:$0x1] %vm6609_vm15, %v5085_v40 }
 0x486   : > { %5599 = shalt.err (!%p5596_p4)
}
 0x487   : > { %5439 = dma.vmem_to_hbm [thread:$0]  (%p5776_p11), %s5225_s16, 656, %s5227_s17, %s5212_s26  }
 0x488 PF: > { %s5238_s12 = sand.u32 1, %s5626_s20   ;;  %p8873_p7 = scmp.ge.s32.totalorder %s5638_s23, 2 }
 0x489   : > { %s5239_s24 = scalar_lea.sflag [#allocation8], %s5238_s12 }
 0x48a   : > { %p5446_p5 = pnand %p8873_p7, %p5780_p12 }
 0x48c   : > { %p5447_p8 = pneg %p5446_p5 }
 0x48e   : > { %5621 = dma.done.wait (%p5447_p8), %s5239_s24, 656  }
 0x48f   : > { %5623 = vsyncadd (%p5447_p8), %s5239_s24, 4294966640  ;;  %p20_p10 = scmp.ge.s32.totalorder %s5751_s25, 4   ;;  %s8874_s20 = smov %s5630_s21 }
 0x490   : > { %s8875_s21 = smov %s5634_s22  ;;  %s8876_s22 = smov %s5763_s28 }
 0x491   : > { %s8877_s23 = smov %s5751_s25  ;;  %22 = sbr.rel (!%p20_p10) target bundleno = 8 (0x8), region = 261 }
 0x496   :  { %5245 = vsyncpa [#allocation7], 1 }
 0x497   :  { %5247 = vsyncpa [#allocation7 + $0x1], 1 }
 0x498   :  { %5248 = vsyncpa [#allocation8], 1 }
 0x499   :  { %5250 = vsyncpa [#allocation8 + $0x1], 1 }

</bundles_post_ra>
